<compile_context>
chip_gen: v7x
topology: tpu7x:2x2x1
jax: 0.10.0
libtpu: 0.0.40
codegen_flags: <defaults>
</compile_context>

<pallas_src>
import functools

import jax
import jax.numpy as jnp
from jax import lax
from jax.experimental import pallas as pl
from jax.experimental.pallas import tpu as pltpu

LANES = 128        # lane width of the slab
CHUNK_ROWS = 16    # rows per inner step (2 f32 vregs per live value)


def scorer_kernel(x_ref, w1_ref, b1_ref, w2_ref, b2_ref, w3_ref, b3_ref, o_ref,
                  *, hidden):
    """x_ref/o_ref: lane-dense [TILE_R, 128] f32 tiles. Weights are SMEM scalars."""
    H = hidden

    # Scalar weights from SMEM (loop-invariant, read once per grid step).
    w1 = [w1_ref[j] for j in range(H)]
    b1 = [b1_ref[j] for j in range(H)]
    w2 = [[w2_ref[j * H + k] for k in range(H)] for j in range(H)]
    b2 = [b2_ref[k] for k in range(H)]
    w3 = [w3_ref[k] for k in range(H)]
    b3 = b3_ref[0]

    tile_rows = x_ref.shape[0]
    n_chunks = tile_rows // CHUNK_ROWS

    def body(c, carry):
        r0 = pl.multiple_of(c * CHUNK_ROWS, CHUNK_ROWS)
        x = x_ref[pl.ds(r0, CHUNK_ROWS), :].astype(jnp.float32)  # [16, 128]

        # Layer 1 (outer product w/ scalar input) + ReLU, accumulated straight
        # into the layer-2 sums so only one h1 channel is live at a time.
        acc2 = [None] * H
        for j in range(H):
            h1j = jnp.maximum(x * w1[j] + b1[j], 0.0)
            for k in range(H):
                t = h1j * w2[j][k]
                acc2[k] = t if acc2[k] is None else acc2[k] + t

        # Layer 2 bias + ReLU, then layer 3 (16-term weighted sum) + bias.
        out = None
        for k in range(H):
            h2k = jnp.maximum(acc2[k] + b2[k], 0.0)
            t = h2k * w3[k]
            out = t if out is None else out + t
        out = out + b3

        o_ref[pl.ds(r0, CHUNK_ROWS), :] = out.astype(o_ref.dtype)
        return carry

    lax.fori_loop(0, n_chunks, body, 0)


def scorer_forward(x, params, *, tile_rows=256):
    """x: [..., 1] -> [..., 1], matching the PyTorch Scorer.forward."""
    w1, b1, w2, b2, w3, b3 = params
    if x.shape[-1] != 1:
        # TODO(synk): general input_dim > 1 would need a matmul-based first layer.
        raise NotImplementedError("Scorer kernel is specialized for input_dim == 1")
    hidden = w1.shape[-1]
    orig_shape = x.shape

    # Flatten to scalars and pack into a lane-dense [rows, 128] slab.
    xf = x.reshape(-1)
    n = xf.shape[0]

    rows = max(pl.cdiv(n, LANES), 1)
    rows = ((rows + CHUNK_ROWS - 1) // CHUNK_ROWS) * CHUNK_ROWS
    tile_rows = max(CHUNK_ROWS, (tile_rows // CHUNK_ROWS) * CHUNK_ROWS)
    tile_r = min(tile_rows, rows)
    num_tiles = pl.cdiv(rows, tile_r)
    rows = num_tiles * tile_r
    n_pad = rows * LANES

    xf = jnp.pad(xf, (0, n_pad - n))
    x2d = xf.reshape(rows, LANES)

    # Weights/biases as flat f32 vectors for SMEM.
    w1v = jnp.asarray(w1, jnp.float32).reshape(hidden)
    b1v = jnp.asarray(b1, jnp.float32).reshape(hidden)
    w2f = jnp.asarray(w2, jnp.float32).reshape(hidden * hidden)
    b2v = jnp.asarray(b2, jnp.float32).reshape(hidden)
    w3v = jnp.asarray(w3, jnp.float32).reshape(hidden)
    b3v = jnp.asarray(b3, jnp.float32).reshape(1)

    smem = pl.BlockSpec(memory_space=pltpu.MemorySpace.SMEM)

    out2d = pl.pallas_call(
        functools.partial(scorer_kernel, hidden=hidden),
        out_shape=jax.ShapeDtypeStruct((rows, LANES), x.dtype),
        grid=(num_tiles,),
        in_specs=[
            pl.BlockSpec((tile_r, LANES), lambda i: (i, 0)),
            smem, smem, smem, smem, smem, smem,
        ],
        out_specs=pl.BlockSpec((tile_r, LANES), lambda i: (i, 0)),
        compiler_params=pltpu.CompilerParams(
            dimension_semantics=("parallel",),
        ),
    )(x2d, w1v, b1v, w2f, b2v, w3v, b3v)

    out_flat = out2d.reshape(-1)[:n]
    return out_flat.reshape(*orig_shape[:-1], 1)


def init_scorer_params(key, input_dim=1, hidden_dim=16, dtype=jnp.float32):
    """Mimics PyTorch nn.Linear default init (U[-1/sqrt(fan_in), 1/sqrt(fan_in)])."""
    keys = jax.random.split(key, 6)

    def linear(kw, kb, fan_in, fan_out):
        bound = 1.0 / jnp.sqrt(jnp.asarray(fan_in, dtype=jnp.float32))
        w = jax.random.uniform(kw, (fan_in, fan_out), dtype=dtype,
                               minval=-bound, maxval=bound)
        b = jax.random.uniform(kb, (1, fan_out), dtype=dtype,
                               minval=-bound, maxval=bound)
        return w, b

    w1, b1 = linear(keys[0], keys[1], input_dim, hidden_dim)
    w2, b2 = linear(keys[2], keys[3], hidden_dim, hidden_dim)
    w3, b3 = linear(keys[4], keys[5], hidden_dim, 1)
    return (w1, b1, w2, b2, w3, b3)


def scorer_forward_ref(x, params):
    """Pure-JAX reference for the correctness check."""
    w1, b1, w2, b2, w3, b3 = params
    h1 = jnp.maximum(x @ w1 + b1, 0.0)
    h2 = jnp.maximum(h1 @ w2 + b2, 0.0)
    return h2 @ w3 + b3


if __name__ == "__main__":
    key = jax.random.PRNGKey(0)
    k_param, k_x1, k_x2 = jax.random.split(key, 3)

    input_dim = 1
    hidden_dim = 16
    params = init_scorer_params(k_param, input_dim=input_dim, hidden_dim=hidden_dim)

    # Small test matching the module usage: [batch, slate_len, 1].
    batch, seq = 2, 8
    x = jax.random.normal(k_x1, (batch, seq, input_dim), dtype=jnp.float32)
    out = jax.block_until_ready(scorer_forward(x, params))
    ref = scorer_forward_ref(x.reshape(-1, input_dim), params).reshape(batch, seq, 1)
    assert out.shape == (batch, seq, 1), out.shape
    assert jnp.allclose(out, ref, atol=1e-5, rtol=1e-5), "mismatch vs reference (small)"

    # Larger test exercising multi-tile grid + row padding.
    x2 = jax.random.normal(k_x2, (4, 10000, input_dim), dtype=jnp.float32)
    out2 = jax.block_until_ready(scorer_forward(x2, params))
    ref2 = scorer_forward_ref(x2.reshape(-1, input_dim), params).reshape(4, 10000, 1)
    assert out2.shape == (4, 10000, 1), out2.shape
    assert jnp.allclose(out2, ref2, atol=1e-5, rtol=1e-5), "mismatch vs reference (tiled)"

    # TODO(synk): listMLE / generate_loss is a training-time loss (randperm, sort,
    # gather); it is not part of Scorer.forward and is not implemented here.

    print("KERNEL_OK")
</pallas_src>

<mosaic_0001>
module attributes {stable_mosaic.version = 11 : i64} {
  func.func @scorer_kernel(%arg0: i32, %arg1: memref<16x128xf32, #tpu.memory_space<vmem>>, %arg2: memref<16xf32, #tpu.memory_space<smem>>, %arg3: memref<16xf32, #tpu.memory_space<smem>>, %arg4: memref<256xf32, #tpu.memory_space<smem>>, %arg5: memref<16xf32, #tpu.memory_space<smem>>, %arg6: memref<16xf32, #tpu.memory_space<smem>>, %arg7: memref<1xf32, #tpu.memory_space<smem>>, %arg8: memref<16x128xf32, #tpu.memory_space<vmem>>) attributes {dimension_semantics = [#tpu.dimension_semantics<parallel>], iteration_bounds = array<i64: 1>, scalar_prefetch = 0 : i64, scratch_operands = 0 : i64, tpu.core_type = #tpu.core_type<tc>, window_params = [{transform_indices = @transform_0, window_bounds = array<i64: 16, 128>}, {transform_indices = @transform_1, window_bounds = array<i64: 16>}, {transform_indices = @transform_2, window_bounds = array<i64: 16>}, {transform_indices = @transform_3, window_bounds = array<i64: 256>}, {transform_indices = @transform_4, window_bounds = array<i64: 16>}, {transform_indices = @transform_5, window_bounds = array<i64: 16>}, {transform_indices = @transform_6, window_bounds = array<i64: 1>}, {transform_indices = @transform_7, window_bounds = array<i64: 16, 128>}]} {
    %c0 = arith.constant 0 : index
    %0 = memref.load %arg2[%c0] : memref<16xf32, #tpu.memory_space<smem>>
    %c1 = arith.constant 1 : index
    %1 = memref.load %arg2[%c1] : memref<16xf32, #tpu.memory_space<smem>>
    %c2 = arith.constant 2 : index
    %2 = memref.load %arg2[%c2] : memref<16xf32, #tpu.memory_space<smem>>
    %c3 = arith.constant 3 : index
    %3 = memref.load %arg2[%c3] : memref<16xf32, #tpu.memory_space<smem>>
    %c4 = arith.constant 4 : index
    %4 = memref.load %arg2[%c4] : memref<16xf32, #tpu.memory_space<smem>>
    %c5 = arith.constant 5 : index
    %5 = memref.load %arg2[%c5] : memref<16xf32, #tpu.memory_space<smem>>
    %c6 = arith.constant 6 : index
    %6 = memref.load %arg2[%c6] : memref<16xf32, #tpu.memory_space<smem>>
    %c7 = arith.constant 7 : index
    %7 = memref.load %arg2[%c7] : memref<16xf32, #tpu.memory_space<smem>>
    %c8 = arith.constant 8 : index
    %8 = memref.load %arg2[%c8] : memref<16xf32, #tpu.memory_space<smem>>
    %c9 = arith.constant 9 : index
    %9 = memref.load %arg2[%c9] : memref<16xf32, #tpu.memory_space<smem>>
    %c10 = arith.constant 10 : index
    %10 = memref.load %arg2[%c10] : memref<16xf32, #tpu.memory_space<smem>>
    %c11 = arith.constant 11 : index
    %11 = memref.load %arg2[%c11] : memref<16xf32, #tpu.memory_space<smem>>
    %c12 = arith.constant 12 : index
    %12 = memref.load %arg2[%c12] : memref<16xf32, #tpu.memory_space<smem>>
    %c13 = arith.constant 13 : index
    %13 = memref.load %arg2[%c13] : memref<16xf32, #tpu.memory_space<smem>>
    %c14 = arith.constant 14 : index
    %14 = memref.load %arg2[%c14] : memref<16xf32, #tpu.memory_space<smem>>
    %c15 = arith.constant 15 : index
    %15 = memref.load %arg2[%c15] : memref<16xf32, #tpu.memory_space<smem>>
    %c0_0 = arith.constant 0 : index
    %16 = memref.load %arg3[%c0_0] : memref<16xf32, #tpu.memory_space<smem>>
    %c1_1 = arith.constant 1 : index
    %17 = memref.load %arg3[%c1_1] : memref<16xf32, #tpu.memory_space<smem>>
    %c2_2 = arith.constant 2 : index
    %18 = memref.load %arg3[%c2_2] : memref<16xf32, #tpu.memory_space<smem>>
    %c3_3 = arith.constant 3 : index
    %19 = memref.load %arg3[%c3_3] : memref<16xf32, #tpu.memory_space<smem>>
    %c4_4 = arith.constant 4 : index
    %20 = memref.load %arg3[%c4_4] : memref<16xf32, #tpu.memory_space<smem>>
    %c5_5 = arith.constant 5 : index
    %21 = memref.load %arg3[%c5_5] : memref<16xf32, #tpu.memory_space<smem>>
    %c6_6 = arith.constant 6 : index
    %22 = memref.load %arg3[%c6_6] : memref<16xf32, #tpu.memory_space<smem>>
    %c7_7 = arith.constant 7 : index
    %23 = memref.load %arg3[%c7_7] : memref<16xf32, #tpu.memory_space<smem>>
    %c8_8 = arith.constant 8 : index
    %24 = memref.load %arg3[%c8_8] : memref<16xf32, #tpu.memory_space<smem>>
    %c9_9 = arith.constant 9 : index
    %25 = memref.load %arg3[%c9_9] : memref<16xf32, #tpu.memory_space<smem>>
    %c10_10 = arith.constant 10 : index
    %26 = memref.load %arg3[%c10_10] : memref<16xf32, #tpu.memory_space<smem>>
    %c11_11 = arith.constant 11 : index
    %27 = memref.load %arg3[%c11_11] : memref<16xf32, #tpu.memory_space<smem>>
    %c12_12 = arith.constant 12 : index
    %28 = memref.load %arg3[%c12_12] : memref<16xf32, #tpu.memory_space<smem>>
    %c13_13 = arith.constant 13 : index
    %29 = memref.load %arg3[%c13_13] : memref<16xf32, #tpu.memory_space<smem>>
    %c14_14 = arith.constant 14 : index
    %30 = memref.load %arg3[%c14_14] : memref<16xf32, #tpu.memory_space<smem>>
    %c15_15 = arith.constant 15 : index
    %31 = memref.load %arg3[%c15_15] : memref<16xf32, #tpu.memory_space<smem>>
    %c0_16 = arith.constant 0 : index
    %32 = memref.load %arg4[%c0_16] : memref<256xf32, #tpu.memory_space<smem>>
    %c1_17 = arith.constant 1 : index
    %33 = memref.load %arg4[%c1_17] : memref<256xf32, #tpu.memory_space<smem>>
    %c2_18 = arith.constant 2 : index
    %34 = memref.load %arg4[%c2_18] : memref<256xf32, #tpu.memory_space<smem>>
    %c3_19 = arith.constant 3 : index
    %35 = memref.load %arg4[%c3_19] : memref<256xf32, #tpu.memory_space<smem>>
    %c4_20 = arith.constant 4 : index
    %36 = memref.load %arg4[%c4_20] : memref<256xf32, #tpu.memory_space<smem>>
    %c5_21 = arith.constant 5 : index
    %37 = memref.load %arg4[%c5_21] : memref<256xf32, #tpu.memory_space<smem>>
    %c6_22 = arith.constant 6 : index
    %38 = memref.load %arg4[%c6_22] : memref<256xf32, #tpu.memory_space<smem>>
    %c7_23 = arith.constant 7 : index
    %39 = memref.load %arg4[%c7_23] : memref<256xf32, #tpu.memory_space<smem>>
    %c8_24 = arith.constant 8 : index
    %40 = memref.load %arg4[%c8_24] : memref<256xf32, #tpu.memory_space<smem>>
    %c9_25 = arith.constant 9 : index
    %41 = memref.load %arg4[%c9_25] : memref<256xf32, #tpu.memory_space<smem>>
    %c10_26 = arith.constant 10 : index
    %42 = memref.load %arg4[%c10_26] : memref<256xf32, #tpu.memory_space<smem>>
    %c11_27 = arith.constant 11 : index
    %43 = memref.load %arg4[%c11_27] : memref<256xf32, #tpu.memory_space<smem>>
    %c12_28 = arith.constant 12 : index
    %44 = memref.load %arg4[%c12_28] : memref<256xf32, #tpu.memory_space<smem>>
    %c13_29 = arith.constant 13 : index
    %45 = memref.load %arg4[%c13_29] : memref<256xf32, #tpu.memory_space<smem>>
    %c14_30 = arith.constant 14 : index
    %46 = memref.load %arg4[%c14_30] : memref<256xf32, #tpu.memory_space<smem>>
    %c15_31 = arith.constant 15 : index
    %47 = memref.load %arg4[%c15_31] : memref<256xf32, #tpu.memory_space<smem>>
    %c16 = arith.constant 16 : index
    %48 = memref.load %arg4[%c16] : memref<256xf32, #tpu.memory_space<smem>>
    %c17 = arith.constant 17 : index
    %49 = memref.load %arg4[%c17] : memref<256xf32, #tpu.memory_space<smem>>
    %c18 = arith.constant 18 : index
    %50 = memref.load %arg4[%c18] : memref<256xf32, #tpu.memory_space<smem>>
    %c19 = arith.constant 19 : index
    %51 = memref.load %arg4[%c19] : memref<256xf32, #tpu.memory_space<smem>>
    %c20 = arith.constant 20 : index
    %52 = memref.load %arg4[%c20] : memref<256xf32, #tpu.memory_space<smem>>
    %c21 = arith.constant 21 : index
    %53 = memref.load %arg4[%c21] : memref<256xf32, #tpu.memory_space<smem>>
    %c22 = arith.constant 22 : index
    %54 = memref.load %arg4[%c22] : memref<256xf32, #tpu.memory_space<smem>>
    %c23 = arith.constant 23 : index
    %55 = memref.load %arg4[%c23] : memref<256xf32, #tpu.memory_space<smem>>
    %c24 = arith.constant 24 : index
    %56 = memref.load %arg4[%c24] : memref<256xf32, #tpu.memory_space<smem>>
    %c25 = arith.constant 25 : index
    %57 = memref.load %arg4[%c25] : memref<256xf32, #tpu.memory_space<smem>>
    %c26 = arith.constant 26 : index
    %58 = memref.load %arg4[%c26] : memref<256xf32, #tpu.memory_space<smem>>
    %c27 = arith.constant 27 : index
    %59 = memref.load %arg4[%c27] : memref<256xf32, #tpu.memory_space<smem>>
    %c28 = arith.constant 28 : index
    %60 = memref.load %arg4[%c28] : memref<256xf32, #tpu.memory_space<smem>>
    %c29 = arith.constant 29 : index
    %61 = memref.load %arg4[%c29] : memref<256xf32, #tpu.memory_space<smem>>
    %c30 = arith.constant 30 : index
    %62 = memref.load %arg4[%c30] : memref<256xf32, #tpu.memory_space<smem>>
    %c31 = arith.constant 31 : index
    %63 = memref.load %arg4[%c31] : memref<256xf32, #tpu.memory_space<smem>>
    %c32 = arith.constant 32 : index
    %64 = memref.load %arg4[%c32] : memref<256xf32, #tpu.memory_space<smem>>
    %c33 = arith.constant 33 : index
    %65 = memref.load %arg4[%c33] : memref<256xf32, #tpu.memory_space<smem>>
    %c34 = arith.constant 34 : index
    %66 = memref.load %arg4[%c34] : memref<256xf32, #tpu.memory_space<smem>>
    %c35 = arith.constant 35 : index
    %67 = memref.load %arg4[%c35] : memref<256xf32, #tpu.memory_space<smem>>
    %c36 = arith.constant 36 : index
    %68 = memref.load %arg4[%c36] : memref<256xf32, #tpu.memory_space<smem>>
    %c37 = arith.constant 37 : index
    %69 = memref.load %arg4[%c37] : memref<256xf32, #tpu.memory_space<smem>>
    %c38 = arith.constant 38 : index
    %70 = memref.load %arg4[%c38] : memref<256xf32, #tpu.memory_space<smem>>
    %c39 = arith.constant 39 : index
    %71 = memref.load %arg4[%c39] : memref<256xf32, #tpu.memory_space<smem>>
    %c40 = arith.constant 40 : index
    %72 = memref.load %arg4[%c40] : memref<256xf32, #tpu.memory_space<smem>>
    %c41 = arith.constant 41 : index
    %73 = memref.load %arg4[%c41] : memref<256xf32, #tpu.memory_space<smem>>
    %c42 = arith.constant 42 : index
    %74 = memref.load %arg4[%c42] : memref<256xf32, #tpu.memory_space<smem>>
    %c43 = arith.constant 43 : index
    %75 = memref.load %arg4[%c43] : memref<256xf32, #tpu.memory_space<smem>>
    %c44 = arith.constant 44 : index
    %76 = memref.load %arg4[%c44] : memref<256xf32, #tpu.memory_space<smem>>
    %c45 = arith.constant 45 : index
    %77 = memref.load %arg4[%c45] : memref<256xf32, #tpu.memory_space<smem>>
    %c46 = arith.constant 46 : index
    %78 = memref.load %arg4[%c46] : memref<256xf32, #tpu.memory_space<smem>>
    %c47 = arith.constant 47 : index
    %79 = memref.load %arg4[%c47] : memref<256xf32, #tpu.memory_space<smem>>
    %c48 = arith.constant 48 : index
    %80 = memref.load %arg4[%c48] : memref<256xf32, #tpu.memory_space<smem>>
    %c49 = arith.constant 49 : index
    %81 = memref.load %arg4[%c49] : memref<256xf32, #tpu.memory_space<smem>>
    %c50 = arith.constant 50 : index
    %82 = memref.load %arg4[%c50] : memref<256xf32, #tpu.memory_space<smem>>
    %c51 = arith.constant 51 : index
    %83 = memref.load %arg4[%c51] : memref<256xf32, #tpu.memory_space<smem>>
    %c52 = arith.constant 52 : index
    %84 = memref.load %arg4[%c52] : memref<256xf32, #tpu.memory_space<smem>>
    %c53 = arith.constant 53 : index
    %85 = memref.load %arg4[%c53] : memref<256xf32, #tpu.memory_space<smem>>
    %c54 = arith.constant 54 : index
    %86 = memref.load %arg4[%c54] : memref<256xf32, #tpu.memory_space<smem>>
    %c55 = arith.constant 55 : index
    %87 = memref.load %arg4[%c55] : memref<256xf32, #tpu.memory_space<smem>>
    %c56 = arith.constant 56 : index
    %88 = memref.load %arg4[%c56] : memref<256xf32, #tpu.memory_space<smem>>
    %c57 = arith.constant 57 : index
    %89 = memref.load %arg4[%c57] : memref<256xf32, #tpu.memory_space<smem>>
    %c58 = arith.constant 58 : index
    %90 = memref.load %arg4[%c58] : memref<256xf32, #tpu.memory_space<smem>>
    %c59 = arith.constant 59 : index
    %91 = memref.load %arg4[%c59] : memref<256xf32, #tpu.memory_space<smem>>
    %c60 = arith.constant 60 : index
    %92 = memref.load %arg4[%c60] : memref<256xf32, #tpu.memory_space<smem>>
    %c61 = arith.constant 61 : index
    %93 = memref.load %arg4[%c61] : memref<256xf32, #tpu.memory_space<smem>>
    %c62 = arith.constant 62 : index
    %94 = memref.load %arg4[%c62] : memref<256xf32, #tpu.memory_space<smem>>
    %c63 = arith.constant 63 : index
    %95 = memref.load %arg4[%c63] : memref<256xf32, #tpu.memory_space<smem>>
    %c64 = arith.constant 64 : index
    %96 = memref.load %arg4[%c64] : memref<256xf32, #tpu.memory_space<smem>>
    %c65 = arith.constant 65 : index
    %97 = memref.load %arg4[%c65] : memref<256xf32, #tpu.memory_space<smem>>
    %c66 = arith.constant 66 : index
    %98 = memref.load %arg4[%c66] : memref<256xf32, #tpu.memory_space<smem>>
    %c67 = arith.constant 67 : index
    %99 = memref.load %arg4[%c67] : memref<256xf32, #tpu.memory_space<smem>>
    %c68 = arith.constant 68 : index
    %100 = memref.load %arg4[%c68] : memref<256xf32, #tpu.memory_space<smem>>
    %c69 = arith.constant 69 : index
    %101 = memref.load %arg4[%c69] : memref<256xf32, #tpu.memory_space<smem>>
    %c70 = arith.constant 70 : index
    %102 = memref.load %arg4[%c70] : memref<256xf32, #tpu.memory_space<smem>>
    %c71 = arith.constant 71 : index
    %103 = memref.load %arg4[%c71] : memref<256xf32, #tpu.memory_space<smem>>
    %c72 = arith.constant 72 : index
    %104 = memref.load %arg4[%c72] : memref<256xf32, #tpu.memory_space<smem>>
    %c73 = arith.constant 73 : index
    %105 = memref.load %arg4[%c73] : memref<256xf32, #tpu.memory_space<smem>>
    %c74 = arith.constant 74 : index
    %106 = memref.load %arg4[%c74] : memref<256xf32, #tpu.memory_space<smem>>
    %c75 = arith.constant 75 : index
    %107 = memref.load %arg4[%c75] : memref<256xf32, #tpu.memory_space<smem>>
    %c76 = arith.constant 76 : index
    %108 = memref.load %arg4[%c76] : memref<256xf32, #tpu.memory_space<smem>>
    %c77 = arith.constant 77 : index
    %109 = memref.load %arg4[%c77] : memref<256xf32, #tpu.memory_space<smem>>
    %c78 = arith.constant 78 : index
    %110 = memref.load %arg4[%c78] : memref<256xf32, #tpu.memory_space<smem>>
    %c79 = arith.constant 79 : index
    %111 = memref.load %arg4[%c79] : memref<256xf32, #tpu.memory_space<smem>>
    %c80 = arith.constant 80 : index
    %112 = memref.load %arg4[%c80] : memref<256xf32, #tpu.memory_space<smem>>
    %c81 = arith.constant 81 : index
    %113 = memref.load %arg4[%c81] : memref<256xf32, #tpu.memory_space<smem>>
    %c82 = arith.constant 82 : index
    %114 = memref.load %arg4[%c82] : memref<256xf32, #tpu.memory_space<smem>>
    %c83 = arith.constant 83 : index
    %115 = memref.load %arg4[%c83] : memref<256xf32, #tpu.memory_space<smem>>
    %c84 = arith.constant 84 : index
    %116 = memref.load %arg4[%c84] : memref<256xf32, #tpu.memory_space<smem>>
    %c85 = arith.constant 85 : index
    %117 = memref.load %arg4[%c85] : memref<256xf32, #tpu.memory_space<smem>>
    %c86 = arith.constant 86 : index
    %118 = memref.load %arg4[%c86] : memref<256xf32, #tpu.memory_space<smem>>
    %c87 = arith.constant 87 : index
    %119 = memref.load %arg4[%c87] : memref<256xf32, #tpu.memory_space<smem>>
    %c88 = arith.constant 88 : index
    %120 = memref.load %arg4[%c88] : memref<256xf32, #tpu.memory_space<smem>>
    %c89 = arith.constant 89 : index
    %121 = memref.load %arg4[%c89] : memref<256xf32, #tpu.memory_space<smem>>
    %c90 = arith.constant 90 : index
    %122 = memref.load %arg4[%c90] : memref<256xf32, #tpu.memory_space<smem>>
    %c91 = arith.constant 91 : index
    %123 = memref.load %arg4[%c91] : memref<256xf32, #tpu.memory_space<smem>>
    %c92 = arith.constant 92 : index
    %124 = memref.load %arg4[%c92] : memref<256xf32, #tpu.memory_space<smem>>
    %c93 = arith.constant 93 : index
    %125 = memref.load %arg4[%c93] : memref<256xf32, #tpu.memory_space<smem>>
    %c94 = arith.constant 94 : index
    %126 = memref.load %arg4[%c94] : memref<256xf32, #tpu.memory_space<smem>>
    %c95 = arith.constant 95 : index
    %127 = memref.load %arg4[%c95] : memref<256xf32, #tpu.memory_space<smem>>
    %c96 = arith.constant 96 : index
    %128 = memref.load %arg4[%c96] : memref<256xf32, #tpu.memory_space<smem>>
    %c97 = arith.constant 97 : index
    %129 = memref.load %arg4[%c97] : memref<256xf32, #tpu.memory_space<smem>>
    %c98 = arith.constant 98 : index
    %130 = memref.load %arg4[%c98] : memref<256xf32, #tpu.memory_space<smem>>
    %c99 = arith.constant 99 : index
    %131 = memref.load %arg4[%c99] : memref<256xf32, #tpu.memory_space<smem>>
    %c100 = arith.constant 100 : index
    %132 = memref.load %arg4[%c100] : memref<256xf32, #tpu.memory_space<smem>>
    %c101 = arith.constant 101 : index
    %133 = memref.load %arg4[%c101] : memref<256xf32, #tpu.memory_space<smem>>
    %c102 = arith.constant 102 : index
    %134 = memref.load %arg4[%c102] : memref<256xf32, #tpu.memory_space<smem>>
    %c103 = arith.constant 103 : index
    %135 = memref.load %arg4[%c103] : memref<256xf32, #tpu.memory_space<smem>>
    %c104 = arith.constant 104 : index
    %136 = memref.load %arg4[%c104] : memref<256xf32, #tpu.memory_space<smem>>
    %c105 = arith.constant 105 : index
    %137 = memref.load %arg4[%c105] : memref<256xf32, #tpu.memory_space<smem>>
    %c106 = arith.constant 106 : index
    %138 = memref.load %arg4[%c106] : memref<256xf32, #tpu.memory_space<smem>>
    %c107 = arith.constant 107 : index
    %139 = memref.load %arg4[%c107] : memref<256xf32, #tpu.memory_space<smem>>
    %c108 = arith.constant 108 : index
    %140 = memref.load %arg4[%c108] : memref<256xf32, #tpu.memory_space<smem>>
    %c109 = arith.constant 109 : index
    %141 = memref.load %arg4[%c109] : memref<256xf32, #tpu.memory_space<smem>>
    %c110 = arith.constant 110 : index
    %142 = memref.load %arg4[%c110] : memref<256xf32, #tpu.memory_space<smem>>
    %c111 = arith.constant 111 : index
    %143 = memref.load %arg4[%c111] : memref<256xf32, #tpu.memory_space<smem>>
    %c112 = arith.constant 112 : index
    %144 = memref.load %arg4[%c112] : memref<256xf32, #tpu.memory_space<smem>>
    %c113 = arith.constant 113 : index
    %145 = memref.load %arg4[%c113] : memref<256xf32, #tpu.memory_space<smem>>
    %c114 = arith.constant 114 : index
    %146 = memref.load %arg4[%c114] : memref<256xf32, #tpu.memory_space<smem>>
    %c115 = arith.constant 115 : index
    %147 = memref.load %arg4[%c115] : memref<256xf32, #tpu.memory_space<smem>>
    %c116 = arith.constant 116 : index
    %148 = memref.load %arg4[%c116] : memref<256xf32, #tpu.memory_space<smem>>
    %c117 = arith.constant 117 : index
    %149 = memref.load %arg4[%c117] : memref<256xf32, #tpu.memory_space<smem>>
    %c118 = arith.constant 118 : index
    %150 = memref.load %arg4[%c118] : memref<256xf32, #tpu.memory_space<smem>>
    %c119 = arith.constant 119 : index
    %151 = memref.load %arg4[%c119] : memref<256xf32, #tpu.memory_space<smem>>
    %c120 = arith.constant 120 : index
    %152 = memref.load %arg4[%c120] : memref<256xf32, #tpu.memory_space<smem>>
    %c121 = arith.constant 121 : index
    %153 = memref.load %arg4[%c121] : memref<256xf32, #tpu.memory_space<smem>>
    %c122 = arith.constant 122 : index
    %154 = memref.load %arg4[%c122] : memref<256xf32, #tpu.memory_space<smem>>
    %c123 = arith.constant 123 : index
    %155 = memref.load %arg4[%c123] : memref<256xf32, #tpu.memory_space<smem>>
    %c124 = arith.constant 124 : index
    %156 = memref.load %arg4[%c124] : memref<256xf32, #tpu.memory_space<smem>>
    %c125 = arith.constant 125 : index
    %157 = memref.load %arg4[%c125] : memref<256xf32, #tpu.memory_space<smem>>
    %c126 = arith.constant 126 : index
    %158 = memref.load %arg4[%c126] : memref<256xf32, #tpu.memory_space<smem>>
    %c127 = arith.constant 127 : index
    %159 = memref.load %arg4[%c127] : memref<256xf32, #tpu.memory_space<smem>>
    %c128 = arith.constant 128 : index
    %160 = memref.load %arg4[%c128] : memref<256xf32, #tpu.memory_space<smem>>
    %c129 = arith.constant 129 : index
    %161 = memref.load %arg4[%c129] : memref<256xf32, #tpu.memory_space<smem>>
    %c130 = arith.constant 130 : index
    %162 = memref.load %arg4[%c130] : memref<256xf32, #tpu.memory_space<smem>>
    %c131 = arith.constant 131 : index
    %163 = memref.load %arg4[%c131] : memref<256xf32, #tpu.memory_space<smem>>
    %c132 = arith.constant 132 : index
    %164 = memref.load %arg4[%c132] : memref<256xf32, #tpu.memory_space<smem>>
    %c133 = arith.constant 133 : index
    %165 = memref.load %arg4[%c133] : memref<256xf32, #tpu.memory_space<smem>>
    %c134 = arith.constant 134 : index
    %166 = memref.load %arg4[%c134] : memref<256xf32, #tpu.memory_space<smem>>
    %c135 = arith.constant 135 : index
    %167 = memref.load %arg4[%c135] : memref<256xf32, #tpu.memory_space<smem>>
    %c136 = arith.constant 136 : index
    %168 = memref.load %arg4[%c136] : memref<256xf32, #tpu.memory_space<smem>>
    %c137 = arith.constant 137 : index
    %169 = memref.load %arg4[%c137] : memref<256xf32, #tpu.memory_space<smem>>
    %c138 = arith.constant 138 : index
    %170 = memref.load %arg4[%c138] : memref<256xf32, #tpu.memory_space<smem>>
    %c139 = arith.constant 139 : index
    %171 = memref.load %arg4[%c139] : memref<256xf32, #tpu.memory_space<smem>>
    %c140 = arith.constant 140 : index
    %172 = memref.load %arg4[%c140] : memref<256xf32, #tpu.memory_space<smem>>
    %c141 = arith.constant 141 : index
    %173 = memref.load %arg4[%c141] : memref<256xf32, #tpu.memory_space<smem>>
    %c142 = arith.constant 142 : index
    %174 = memref.load %arg4[%c142] : memref<256xf32, #tpu.memory_space<smem>>
    %c143 = arith.constant 143 : index
    %175 = memref.load %arg4[%c143] : memref<256xf32, #tpu.memory_space<smem>>
    %c144 = arith.constant 144 : index
    %176 = memref.load %arg4[%c144] : memref<256xf32, #tpu.memory_space<smem>>
    %c145 = arith.constant 145 : index
    %177 = memref.load %arg4[%c145] : memref<256xf32, #tpu.memory_space<smem>>
    %c146 = arith.constant 146 : index
    %178 = memref.load %arg4[%c146] : memref<256xf32, #tpu.memory_space<smem>>
    %c147 = arith.constant 147 : index
    %179 = memref.load %arg4[%c147] : memref<256xf32, #tpu.memory_space<smem>>
    %c148 = arith.constant 148 : index
    %180 = memref.load %arg4[%c148] : memref<256xf32, #tpu.memory_space<smem>>
    %c149 = arith.constant 149 : index
    %181 = memref.load %arg4[%c149] : memref<256xf32, #tpu.memory_space<smem>>
    %c150 = arith.constant 150 : index
    %182 = memref.load %arg4[%c150] : memref<256xf32, #tpu.memory_space<smem>>
    %c151 = arith.constant 151 : index
    %183 = memref.load %arg4[%c151] : memref<256xf32, #tpu.memory_space<smem>>
    %c152 = arith.constant 152 : index
    %184 = memref.load %arg4[%c152] : memref<256xf32, #tpu.memory_space<smem>>
    %c153 = arith.constant 153 : index
    %185 = memref.load %arg4[%c153] : memref<256xf32, #tpu.memory_space<smem>>
    %c154 = arith.constant 154 : index
    %186 = memref.load %arg4[%c154] : memref<256xf32, #tpu.memory_space<smem>>
    %c155 = arith.constant 155 : index
    %187 = memref.load %arg4[%c155] : memref<256xf32, #tpu.memory_space<smem>>
    %c156 = arith.constant 156 : index
    %188 = memref.load %arg4[%c156] : memref<256xf32, #tpu.memory_space<smem>>
    %c157 = arith.constant 157 : index
    %189 = memref.load %arg4[%c157] : memref<256xf32, #tpu.memory_space<smem>>
    %c158 = arith.constant 158 : index
    %190 = memref.load %arg4[%c158] : memref<256xf32, #tpu.memory_space<smem>>
    %c159 = arith.constant 159 : index
    %191 = memref.load %arg4[%c159] : memref<256xf32, #tpu.memory_space<smem>>
    %c160 = arith.constant 160 : index
    %192 = memref.load %arg4[%c160] : memref<256xf32, #tpu.memory_space<smem>>
    %c161 = arith.constant 161 : index
    %193 = memref.load %arg4[%c161] : memref<256xf32, #tpu.memory_space<smem>>
    %c162 = arith.constant 162 : index
    %194 = memref.load %arg4[%c162] : memref<256xf32, #tpu.memory_space<smem>>
    %c163 = arith.constant 163 : index
    %195 = memref.load %arg4[%c163] : memref<256xf32, #tpu.memory_space<smem>>
    %c164 = arith.constant 164 : index
    %196 = memref.load %arg4[%c164] : memref<256xf32, #tpu.memory_space<smem>>
    %c165 = arith.constant 165 : index
    %197 = memref.load %arg4[%c165] : memref<256xf32, #tpu.memory_space<smem>>
    %c166 = arith.constant 166 : index
    %198 = memref.load %arg4[%c166] : memref<256xf32, #tpu.memory_space<smem>>
    %c167 = arith.constant 167 : index
    %199 = memref.load %arg4[%c167] : memref<256xf32, #tpu.memory_space<smem>>
    %c168 = arith.constant 168 : index
    %200 = memref.load %arg4[%c168] : memref<256xf32, #tpu.memory_space<smem>>
    %c169 = arith.constant 169 : index
    %201 = memref.load %arg4[%c169] : memref<256xf32, #tpu.memory_space<smem>>
    %c170 = arith.constant 170 : index
    %202 = memref.load %arg4[%c170] : memref<256xf32, #tpu.memory_space<smem>>
    %c171 = arith.constant 171 : index
    %203 = memref.load %arg4[%c171] : memref<256xf32, #tpu.memory_space<smem>>
    %c172 = arith.constant 172 : index
    %204 = memref.load %arg4[%c172] : memref<256xf32, #tpu.memory_space<smem>>
    %c173 = arith.constant 173 : index
    %205 = memref.load %arg4[%c173] : memref<256xf32, #tpu.memory_space<smem>>
    %c174 = arith.constant 174 : index
    %206 = memref.load %arg4[%c174] : memref<256xf32, #tpu.memory_space<smem>>
    %c175 = arith.constant 175 : index
    %207 = memref.load %arg4[%c175] : memref<256xf32, #tpu.memory_space<smem>>
    %c176 = arith.constant 176 : index
    %208 = memref.load %arg4[%c176] : memref<256xf32, #tpu.memory_space<smem>>
    %c177 = arith.constant 177 : index
    %209 = memref.load %arg4[%c177] : memref<256xf32, #tpu.memory_space<smem>>
    %c178 = arith.constant 178 : index
    %210 = memref.load %arg4[%c178] : memref<256xf32, #tpu.memory_space<smem>>
    %c179 = arith.constant 179 : index
    %211 = memref.load %arg4[%c179] : memref<256xf32, #tpu.memory_space<smem>>
    %c180 = arith.constant 180 : index
    %212 = memref.load %arg4[%c180] : memref<256xf32, #tpu.memory_space<smem>>
    %c181 = arith.constant 181 : index
    %213 = memref.load %arg4[%c181] : memref<256xf32, #tpu.memory_space<smem>>
    %c182 = arith.constant 182 : index
    %214 = memref.load %arg4[%c182] : memref<256xf32, #tpu.memory_space<smem>>
    %c183 = arith.constant 183 : index
    %215 = memref.load %arg4[%c183] : memref<256xf32, #tpu.memory_space<smem>>
    %c184 = arith.constant 184 : index
    %216 = memref.load %arg4[%c184] : memref<256xf32, #tpu.memory_space<smem>>
    %c185 = arith.constant 185 : index
    %217 = memref.load %arg4[%c185] : memref<256xf32, #tpu.memory_space<smem>>
    %c186 = arith.constant 186 : index
    %218 = memref.load %arg4[%c186] : memref<256xf32, #tpu.memory_space<smem>>
    %c187 = arith.constant 187 : index
    %219 = memref.load %arg4[%c187] : memref<256xf32, #tpu.memory_space<smem>>
    %c188 = arith.constant 188 : index
    %220 = memref.load %arg4[%c188] : memref<256xf32, #tpu.memory_space<smem>>
    %c189 = arith.constant 189 : index
    %221 = memref.load %arg4[%c189] : memref<256xf32, #tpu.memory_space<smem>>
    %c190 = arith.constant 190 : index
    %222 = memref.load %arg4[%c190] : memref<256xf32, #tpu.memory_space<smem>>
    %c191 = arith.constant 191 : index
    %223 = memref.load %arg4[%c191] : memref<256xf32, #tpu.memory_space<smem>>
    %c192 = arith.constant 192 : index
    %224 = memref.load %arg4[%c192] : memref<256xf32, #tpu.memory_space<smem>>
    %c193 = arith.constant 193 : index
    %225 = memref.load %arg4[%c193] : memref<256xf32, #tpu.memory_space<smem>>
    %c194 = arith.constant 194 : index
    %226 = memref.load %arg4[%c194] : memref<256xf32, #tpu.memory_space<smem>>
    %c195 = arith.constant 195 : index
    %227 = memref.load %arg4[%c195] : memref<256xf32, #tpu.memory_space<smem>>
    %c196 = arith.constant 196 : index
    %228 = memref.load %arg4[%c196] : memref<256xf32, #tpu.memory_space<smem>>
    %c197 = arith.constant 197 : index
    %229 = memref.load %arg4[%c197] : memref<256xf32, #tpu.memory_space<smem>>
    %c198 = arith.constant 198 : index
    %230 = memref.load %arg4[%c198] : memref<256xf32, #tpu.memory_space<smem>>
    %c199 = arith.constant 199 : index
    %231 = memref.load %arg4[%c199] : memref<256xf32, #tpu.memory_space<smem>>
    %c200 = arith.constant 200 : index
    %232 = memref.load %arg4[%c200] : memref<256xf32, #tpu.memory_space<smem>>
    %c201 = arith.constant 201 : index
    %233 = memref.load %arg4[%c201] : memref<256xf32, #tpu.memory_space<smem>>
    %c202 = arith.constant 202 : index
    %234 = memref.load %arg4[%c202] : memref<256xf32, #tpu.memory_space<smem>>
    %c203 = arith.constant 203 : index
    %235 = memref.load %arg4[%c203] : memref<256xf32, #tpu.memory_space<smem>>
    %c204 = arith.constant 204 : index
    %236 = memref.load %arg4[%c204] : memref<256xf32, #tpu.memory_space<smem>>
    %c205 = arith.constant 205 : index
    %237 = memref.load %arg4[%c205] : memref<256xf32, #tpu.memory_space<smem>>
    %c206 = arith.constant 206 : index
    %238 = memref.load %arg4[%c206] : memref<256xf32, #tpu.memory_space<smem>>
    %c207 = arith.constant 207 : index
    %239 = memref.load %arg4[%c207] : memref<256xf32, #tpu.memory_space<smem>>
    %c208 = arith.constant 208 : index
    %240 = memref.load %arg4[%c208] : memref<256xf32, #tpu.memory_space<smem>>
    %c209 = arith.constant 209 : index
    %241 = memref.load %arg4[%c209] : memref<256xf32, #tpu.memory_space<smem>>
    %c210 = arith.constant 210 : index
    %242 = memref.load %arg4[%c210] : memref<256xf32, #tpu.memory_space<smem>>
    %c211 = arith.constant 211 : index
    %243 = memref.load %arg4[%c211] : memref<256xf32, #tpu.memory_space<smem>>
    %c212 = arith.constant 212 : index
    %244 = memref.load %arg4[%c212] : memref<256xf32, #tpu.memory_space<smem>>
    %c213 = arith.constant 213 : index
    %245 = memref.load %arg4[%c213] : memref<256xf32, #tpu.memory_space<smem>>
    %c214 = arith.constant 214 : index
    %246 = memref.load %arg4[%c214] : memref<256xf32, #tpu.memory_space<smem>>
    %c215 = arith.constant 215 : index
    %247 = memref.load %arg4[%c215] : memref<256xf32, #tpu.memory_space<smem>>
    %c216 = arith.constant 216 : index
    %248 = memref.load %arg4[%c216] : memref<256xf32, #tpu.memory_space<smem>>
    %c217 = arith.constant 217 : index
    %249 = memref.load %arg4[%c217] : memref<256xf32, #tpu.memory_space<smem>>
    %c218 = arith.constant 218 : index
    %250 = memref.load %arg4[%c218] : memref<256xf32, #tpu.memory_space<smem>>
    %c219 = arith.constant 219 : index
    %251 = memref.load %arg4[%c219] : memref<256xf32, #tpu.memory_space<smem>>
    %c220 = arith.constant 220 : index
    %252 = memref.load %arg4[%c220] : memref<256xf32, #tpu.memory_space<smem>>
    %c221 = arith.constant 221 : index
    %253 = memref.load %arg4[%c221] : memref<256xf32, #tpu.memory_space<smem>>
    %c222 = arith.constant 222 : index
    %254 = memref.load %arg4[%c222] : memref<256xf32, #tpu.memory_space<smem>>
    %c223 = arith.constant 223 : index
    %255 = memref.load %arg4[%c223] : memref<256xf32, #tpu.memory_space<smem>>
    %c224 = arith.constant 224 : index
    %256 = memref.load %arg4[%c224] : memref<256xf32, #tpu.memory_space<smem>>
    %c225 = arith.constant 225 : index
    %257 = memref.load %arg4[%c225] : memref<256xf32, #tpu.memory_space<smem>>
    %c226 = arith.constant 226 : index
    %258 = memref.load %arg4[%c226] : memref<256xf32, #tpu.memory_space<smem>>
    %c227 = arith.constant 227 : index
    %259 = memref.load %arg4[%c227] : memref<256xf32, #tpu.memory_space<smem>>
    %c228 = arith.constant 228 : index
    %260 = memref.load %arg4[%c228] : memref<256xf32, #tpu.memory_space<smem>>
    %c229 = arith.constant 229 : index
    %261 = memref.load %arg4[%c229] : memref<256xf32, #tpu.memory_space<smem>>
    %c230 = arith.constant 230 : index
    %262 = memref.load %arg4[%c230] : memref<256xf32, #tpu.memory_space<smem>>
    %c231 = arith.constant 231 : index
    %263 = memref.load %arg4[%c231] : memref<256xf32, #tpu.memory_space<smem>>
    %c232 = arith.constant 232 : index
    %264 = memref.load %arg4[%c232] : memref<256xf32, #tpu.memory_space<smem>>
    %c233 = arith.constant 233 : index
    %265 = memref.load %arg4[%c233] : memref<256xf32, #tpu.memory_space<smem>>
    %c234 = arith.constant 234 : index
    %266 = memref.load %arg4[%c234] : memref<256xf32, #tpu.memory_space<smem>>
    %c235 = arith.constant 235 : index
    %267 = memref.load %arg4[%c235] : memref<256xf32, #tpu.memory_space<smem>>
    %c236 = arith.constant 236 : index
    %268 = memref.load %arg4[%c236] : memref<256xf32, #tpu.memory_space<smem>>
    %c237 = arith.constant 237 : index
    %269 = memref.load %arg4[%c237] : memref<256xf32, #tpu.memory_space<smem>>
    %c238 = arith.constant 238 : index
    %270 = memref.load %arg4[%c238] : memref<256xf32, #tpu.memory_space<smem>>
    %c239 = arith.constant 239 : index
    %271 = memref.load %arg4[%c239] : memref<256xf32, #tpu.memory_space<smem>>
    %c240 = arith.constant 240 : index
    %272 = memref.load %arg4[%c240] : memref<256xf32, #tpu.memory_space<smem>>
    %c241 = arith.constant 241 : index
    %273 = memref.load %arg4[%c241] : memref<256xf32, #tpu.memory_space<smem>>
    %c242 = arith.constant 242 : index
    %274 = memref.load %arg4[%c242] : memref<256xf32, #tpu.memory_space<smem>>
    %c243 = arith.constant 243 : index
    %275 = memref.load %arg4[%c243] : memref<256xf32, #tpu.memory_space<smem>>
    %c244 = arith.constant 244 : index
    %276 = memref.load %arg4[%c244] : memref<256xf32, #tpu.memory_space<smem>>
    %c245 = arith.constant 245 : index
    %277 = memref.load %arg4[%c245] : memref<256xf32, #tpu.memory_space<smem>>
    %c246 = arith.constant 246 : index
    %278 = memref.load %arg4[%c246] : memref<256xf32, #tpu.memory_space<smem>>
    %c247 = arith.constant 247 : index
    %279 = memref.load %arg4[%c247] : memref<256xf32, #tpu.memory_space<smem>>
    %c248 = arith.constant 248 : index
    %280 = memref.load %arg4[%c248] : memref<256xf32, #tpu.memory_space<smem>>
    %c249 = arith.constant 249 : index
    %281 = memref.load %arg4[%c249] : memref<256xf32, #tpu.memory_space<smem>>
    %c250 = arith.constant 250 : index
    %282 = memref.load %arg4[%c250] : memref<256xf32, #tpu.memory_space<smem>>
    %c251 = arith.constant 251 : index
    %283 = memref.load %arg4[%c251] : memref<256xf32, #tpu.memory_space<smem>>
    %c252 = arith.constant 252 : index
    %284 = memref.load %arg4[%c252] : memref<256xf32, #tpu.memory_space<smem>>
    %c253 = arith.constant 253 : index
    %285 = memref.load %arg4[%c253] : memref<256xf32, #tpu.memory_space<smem>>
    %c254 = arith.constant 254 : index
    %286 = memref.load %arg4[%c254] : memref<256xf32, #tpu.memory_space<smem>>
    %c255 = arith.constant 255 : index
    %287 = memref.load %arg4[%c255] : memref<256xf32, #tpu.memory_space<smem>>
    %c0_32 = arith.constant 0 : index
    %288 = memref.load %arg5[%c0_32] : memref<16xf32, #tpu.memory_space<smem>>
    %c1_33 = arith.constant 1 : index
    %289 = memref.load %arg5[%c1_33] : memref<16xf32, #tpu.memory_space<smem>>
    %c2_34 = arith.constant 2 : index
    %290 = memref.load %arg5[%c2_34] : memref<16xf32, #tpu.memory_space<smem>>
    %c3_35 = arith.constant 3 : index
    %291 = memref.load %arg5[%c3_35] : memref<16xf32, #tpu.memory_space<smem>>
    %c4_36 = arith.constant 4 : index
    %292 = memref.load %arg5[%c4_36] : memref<16xf32, #tpu.memory_space<smem>>
    %c5_37 = arith.constant 5 : index
    %293 = memref.load %arg5[%c5_37] : memref<16xf32, #tpu.memory_space<smem>>
    %c6_38 = arith.constant 6 : index
    %294 = memref.load %arg5[%c6_38] : memref<16xf32, #tpu.memory_space<smem>>
    %c7_39 = arith.constant 7 : index
    %295 = memref.load %arg5[%c7_39] : memref<16xf32, #tpu.memory_space<smem>>
    %c8_40 = arith.constant 8 : index
    %296 = memref.load %arg5[%c8_40] : memref<16xf32, #tpu.memory_space<smem>>
    %c9_41 = arith.constant 9 : index
    %297 = memref.load %arg5[%c9_41] : memref<16xf32, #tpu.memory_space<smem>>
    %c10_42 = arith.constant 10 : index
    %298 = memref.load %arg5[%c10_42] : memref<16xf32, #tpu.memory_space<smem>>
    %c11_43 = arith.constant 11 : index
    %299 = memref.load %arg5[%c11_43] : memref<16xf32, #tpu.memory_space<smem>>
    %c12_44 = arith.constant 12 : index
    %300 = memref.load %arg5[%c12_44] : memref<16xf32, #tpu.memory_space<smem>>
    %c13_45 = arith.constant 13 : index
    %301 = memref.load %arg5[%c13_45] : memref<16xf32, #tpu.memory_space<smem>>
    %c14_46 = arith.constant 14 : index
    %302 = memref.load %arg5[%c14_46] : memref<16xf32, #tpu.memory_space<smem>>
    %c15_47 = arith.constant 15 : index
    %303 = memref.load %arg5[%c15_47] : memref<16xf32, #tpu.memory_space<smem>>
    %c0_48 = arith.constant 0 : index
    %304 = memref.load %arg6[%c0_48] : memref<16xf32, #tpu.memory_space<smem>>
    %c1_49 = arith.constant 1 : index
    %305 = memref.load %arg6[%c1_49] : memref<16xf32, #tpu.memory_space<smem>>
    %c2_50 = arith.constant 2 : index
    %306 = memref.load %arg6[%c2_50] : memref<16xf32, #tpu.memory_space<smem>>
    %c3_51 = arith.constant 3 : index
    %307 = memref.load %arg6[%c3_51] : memref<16xf32, #tpu.memory_space<smem>>
    %c4_52 = arith.constant 4 : index
    %308 = memref.load %arg6[%c4_52] : memref<16xf32, #tpu.memory_space<smem>>
    %c5_53 = arith.constant 5 : index
    %309 = memref.load %arg6[%c5_53] : memref<16xf32, #tpu.memory_space<smem>>
    %c6_54 = arith.constant 6 : index
    %310 = memref.load %arg6[%c6_54] : memref<16xf32, #tpu.memory_space<smem>>
    %c7_55 = arith.constant 7 : index
    %311 = memref.load %arg6[%c7_55] : memref<16xf32, #tpu.memory_space<smem>>
    %c8_56 = arith.constant 8 : index
    %312 = memref.load %arg6[%c8_56] : memref<16xf32, #tpu.memory_space<smem>>
    %c9_57 = arith.constant 9 : index
    %313 = memref.load %arg6[%c9_57] : memref<16xf32, #tpu.memory_space<smem>>
    %c10_58 = arith.constant 10 : index
    %314 = memref.load %arg6[%c10_58] : memref<16xf32, #tpu.memory_space<smem>>
    %c11_59 = arith.constant 11 : index
    %315 = memref.load %arg6[%c11_59] : memref<16xf32, #tpu.memory_space<smem>>
    %c12_60 = arith.constant 12 : index
    %316 = memref.load %arg6[%c12_60] : memref<16xf32, #tpu.memory_space<smem>>
    %c13_61 = arith.constant 13 : index
    %317 = memref.load %arg6[%c13_61] : memref<16xf32, #tpu.memory_space<smem>>
    %c14_62 = arith.constant 14 : index
    %318 = memref.load %arg6[%c14_62] : memref<16xf32, #tpu.memory_space<smem>>
    %c15_63 = arith.constant 15 : index
    %319 = memref.load %arg6[%c15_63] : memref<16xf32, #tpu.memory_space<smem>>
    %c0_64 = arith.constant 0 : index
    %320 = memref.load %arg7[%c0_64] : memref<1xf32, #tpu.memory_space<smem>>
    %c0_i32 = arith.constant 0 : i32
    %c16_i32 = arith.constant 16 : i32
    %321 = arith.muli %c0_i32, %c16_i32 : i32
    %322 = tpu.assume_multiple %321, 16 : i32
    %323 = arith.index_cast %322 : i32 to index
    %c0_65 = arith.constant 0 : index
    %324 = vector.load %arg1[%323, %c0_65] : memref<16x128xf32, #tpu.memory_space<vmem>>, vector<16x128xf32>
    %325 = vector.broadcast %0 : f32 to vector<16x128xf32>
    %326 = arith.mulf %324, %325 : vector<16x128xf32>
    %327 = vector.broadcast %16 : f32 to vector<16x128xf32>
    %328 = arith.addf %326, %327 : vector<16x128xf32>
    %cst = arith.constant 0.000000e+00 : f32
    %329 = vector.broadcast %cst : f32 to vector<16x128xf32>
    %330 = arith.maximumf %328, %329 : vector<16x128xf32>
    %331 = vector.broadcast %32 : f32 to vector<16x128xf32>
    %332 = arith.mulf %330, %331 : vector<16x128xf32>
    %333 = vector.broadcast %33 : f32 to vector<16x128xf32>
    %334 = arith.mulf %330, %333 : vector<16x128xf32>
    %335 = vector.broadcast %34 : f32 to vector<16x128xf32>
    %336 = arith.mulf %330, %335 : vector<16x128xf32>
    %337 = vector.broadcast %35 : f32 to vector<16x128xf32>
    %338 = arith.mulf %330, %337 : vector<16x128xf32>
    %339 = vector.broadcast %36 : f32 to vector<16x128xf32>
    %340 = arith.mulf %330, %339 : vector<16x128xf32>
    %341 = vector.broadcast %37 : f32 to vector<16x128xf32>
    %342 = arith.mulf %330, %341 : vector<16x128xf32>
    %343 = vector.broadcast %38 : f32 to vector<16x128xf32>
    %344 = arith.mulf %330, %343 : vector<16x128xf32>
    %345 = vector.broadcast %39 : f32 to vector<16x128xf32>
    %346 = arith.mulf %330, %345 : vector<16x128xf32>
    %347 = vector.broadcast %40 : f32 to vector<16x128xf32>
    %348 = arith.mulf %330, %347 : vector<16x128xf32>
    %349 = vector.broadcast %41 : f32 to vector<16x128xf32>
    %350 = arith.mulf %330, %349 : vector<16x128xf32>
    %351 = vector.broadcast %42 : f32 to vector<16x128xf32>
    %352 = arith.mulf %330, %351 : vector<16x128xf32>
    %353 = vector.broadcast %43 : f32 to vector<16x128xf32>
    %354 = arith.mulf %330, %353 : vector<16x128xf32>
    %355 = vector.broadcast %44 : f32 to vector<16x128xf32>
    %356 = arith.mulf %330, %355 : vector<16x128xf32>
    %357 = vector.broadcast %45 : f32 to vector<16x128xf32>
    %358 = arith.mulf %330, %357 : vector<16x128xf32>
    %359 = vector.broadcast %46 : f32 to vector<16x128xf32>
    %360 = arith.mulf %330, %359 : vector<16x128xf32>
    %361 = vector.broadcast %47 : f32 to vector<16x128xf32>
    %362 = arith.mulf %330, %361 : vector<16x128xf32>
    %363 = vector.broadcast %1 : f32 to vector<16x128xf32>
    %364 = arith.mulf %324, %363 : vector<16x128xf32>
    %365 = vector.broadcast %17 : f32 to vector<16x128xf32>
    %366 = arith.addf %364, %365 : vector<16x128xf32>
    %cst_66 = arith.constant 0.000000e+00 : f32
    %367 = vector.broadcast %cst_66 : f32 to vector<16x128xf32>
    %368 = arith.maximumf %366, %367 : vector<16x128xf32>
    %369 = vector.broadcast %48 : f32 to vector<16x128xf32>
    %370 = arith.mulf %368, %369 : vector<16x128xf32>
    %371 = arith.addf %332, %370 : vector<16x128xf32>
    %372 = vector.broadcast %49 : f32 to vector<16x128xf32>
    %373 = arith.mulf %368, %372 : vector<16x128xf32>
    %374 = arith.addf %334, %373 : vector<16x128xf32>
    %375 = vector.broadcast %50 : f32 to vector<16x128xf32>
    %376 = arith.mulf %368, %375 : vector<16x128xf32>
    %377 = arith.addf %336, %376 : vector<16x128xf32>
    %378 = vector.broadcast %51 : f32 to vector<16x128xf32>
    %379 = arith.mulf %368, %378 : vector<16x128xf32>
    %380 = arith.addf %338, %379 : vector<16x128xf32>
    %381 = vector.broadcast %52 : f32 to vector<16x128xf32>
    %382 = arith.mulf %368, %381 : vector<16x128xf32>
    %383 = arith.addf %340, %382 : vector<16x128xf32>
    %384 = vector.broadcast %53 : f32 to vector<16x128xf32>
    %385 = arith.mulf %368, %384 : vector<16x128xf32>
    %386 = arith.addf %342, %385 : vector<16x128xf32>
    %387 = vector.broadcast %54 : f32 to vector<16x128xf32>
    %388 = arith.mulf %368, %387 : vector<16x128xf32>
    %389 = arith.addf %344, %388 : vector<16x128xf32>
    %390 = vector.broadcast %55 : f32 to vector<16x128xf32>
    %391 = arith.mulf %368, %390 : vector<16x128xf32>
    %392 = arith.addf %346, %391 : vector<16x128xf32>
    %393 = vector.broadcast %56 : f32 to vector<16x128xf32>
    %394 = arith.mulf %368, %393 : vector<16x128xf32>
    %395 = arith.addf %348, %394 : vector<16x128xf32>
    %396 = vector.broadcast %57 : f32 to vector<16x128xf32>
    %397 = arith.mulf %368, %396 : vector<16x128xf32>
    %398 = arith.addf %350, %397 : vector<16x128xf32>
    %399 = vector.broadcast %58 : f32 to vector<16x128xf32>
    %400 = arith.mulf %368, %399 : vector<16x128xf32>
    %401 = arith.addf %352, %400 : vector<16x128xf32>
    %402 = vector.broadcast %59 : f32 to vector<16x128xf32>
    %403 = arith.mulf %368, %402 : vector<16x128xf32>
    %404 = arith.addf %354, %403 : vector<16x128xf32>
    %405 = vector.broadcast %60 : f32 to vector<16x128xf32>
    %406 = arith.mulf %368, %405 : vector<16x128xf32>
    %407 = arith.addf %356, %406 : vector<16x128xf32>
    %408 = vector.broadcast %61 : f32 to vector<16x128xf32>
    %409 = arith.mulf %368, %408 : vector<16x128xf32>
    %410 = arith.addf %358, %409 : vector<16x128xf32>
    %411 = vector.broadcast %62 : f32 to vector<16x128xf32>
    %412 = arith.mulf %368, %411 : vector<16x128xf32>
    %413 = arith.addf %360, %412 : vector<16x128xf32>
    %414 = vector.broadcast %63 : f32 to vector<16x128xf32>
    %415 = arith.mulf %368, %414 : vector<16x128xf32>
    %416 = arith.addf %362, %415 : vector<16x128xf32>
    %417 = vector.broadcast %2 : f32 to vector<16x128xf32>
    %418 = arith.mulf %324, %417 : vector<16x128xf32>
    %419 = vector.broadcast %18 : f32 to vector<16x128xf32>
    %420 = arith.addf %418, %419 : vector<16x128xf32>
    %cst_67 = arith.constant 0.000000e+00 : f32
    %421 = vector.broadcast %cst_67 : f32 to vector<16x128xf32>
    %422 = arith.maximumf %420, %421 : vector<16x128xf32>
    %423 = vector.broadcast %64 : f32 to vector<16x128xf32>
    %424 = arith.mulf %422, %423 : vector<16x128xf32>
    %425 = arith.addf %371, %424 : vector<16x128xf32>
    %426 = vector.broadcast %65 : f32 to vector<16x128xf32>
    %427 = arith.mulf %422, %426 : vector<16x128xf32>
    %428 = arith.addf %374, %427 : vector<16x128xf32>
    %429 = vector.broadcast %66 : f32 to vector<16x128xf32>
    %430 = arith.mulf %422, %429 : vector<16x128xf32>
    %431 = arith.addf %377, %430 : vector<16x128xf32>
    %432 = vector.broadcast %67 : f32 to vector<16x128xf32>
    %433 = arith.mulf %422, %432 : vector<16x128xf32>
    %434 = arith.addf %380, %433 : vector<16x128xf32>
    %435 = vector.broadcast %68 : f32 to vector<16x128xf32>
    %436 = arith.mulf %422, %435 : vector<16x128xf32>
    %437 = arith.addf %383, %436 : vector<16x128xf32>
    %438 = vector.broadcast %69 : f32 to vector<16x128xf32>
    %439 = arith.mulf %422, %438 : vector<16x128xf32>
    %440 = arith.addf %386, %439 : vector<16x128xf32>
    %441 = vector.broadcast %70 : f32 to vector<16x128xf32>
    %442 = arith.mulf %422, %441 : vector<16x128xf32>
    %443 = arith.addf %389, %442 : vector<16x128xf32>
    %444 = vector.broadcast %71 : f32 to vector<16x128xf32>
    %445 = arith.mulf %422, %444 : vector<16x128xf32>
    %446 = arith.addf %392, %445 : vector<16x128xf32>
    %447 = vector.broadcast %72 : f32 to vector<16x128xf32>
    %448 = arith.mulf %422, %447 : vector<16x128xf32>
    %449 = arith.addf %395, %448 : vector<16x128xf32>
    %450 = vector.broadcast %73 : f32 to vector<16x128xf32>
    %451 = arith.mulf %422, %450 : vector<16x128xf32>
    %452 = arith.addf %398, %451 : vector<16x128xf32>
    %453 = vector.broadcast %74 : f32 to vector<16x128xf32>
    %454 = arith.mulf %422, %453 : vector<16x128xf32>
    %455 = arith.addf %401, %454 : vector<16x128xf32>
    %456 = vector.broadcast %75 : f32 to vector<16x128xf32>
    %457 = arith.mulf %422, %456 : vector<16x128xf32>
    %458 = arith.addf %404, %457 : vector<16x128xf32>
    %459 = vector.broadcast %76 : f32 to vector<16x128xf32>
    %460 = arith.mulf %422, %459 : vector<16x128xf32>
    %461 = arith.addf %407, %460 : vector<16x128xf32>
    %462 = vector.broadcast %77 : f32 to vector<16x128xf32>
    %463 = arith.mulf %422, %462 : vector<16x128xf32>
    %464 = arith.addf %410, %463 : vector<16x128xf32>
    %465 = vector.broadcast %78 : f32 to vector<16x128xf32>
    %466 = arith.mulf %422, %465 : vector<16x128xf32>
    %467 = arith.addf %413, %466 : vector<16x128xf32>
    %468 = vector.broadcast %79 : f32 to vector<16x128xf32>
    %469 = arith.mulf %422, %468 : vector<16x128xf32>
    %470 = arith.addf %416, %469 : vector<16x128xf32>
    %471 = vector.broadcast %3 : f32 to vector<16x128xf32>
    %472 = arith.mulf %324, %471 : vector<16x128xf32>
    %473 = vector.broadcast %19 : f32 to vector<16x128xf32>
    %474 = arith.addf %472, %473 : vector<16x128xf32>
    %cst_68 = arith.constant 0.000000e+00 : f32
    %475 = vector.broadcast %cst_68 : f32 to vector<16x128xf32>
    %476 = arith.maximumf %474, %475 : vector<16x128xf32>
    %477 = vector.broadcast %80 : f32 to vector<16x128xf32>
    %478 = arith.mulf %476, %477 : vector<16x128xf32>
    %479 = arith.addf %425, %478 : vector<16x128xf32>
    %480 = vector.broadcast %81 : f32 to vector<16x128xf32>
    %481 = arith.mulf %476, %480 : vector<16x128xf32>
    %482 = arith.addf %428, %481 : vector<16x128xf32>
    %483 = vector.broadcast %82 : f32 to vector<16x128xf32>
    %484 = arith.mulf %476, %483 : vector<16x128xf32>
    %485 = arith.addf %431, %484 : vector<16x128xf32>
    %486 = vector.broadcast %83 : f32 to vector<16x128xf32>
    %487 = arith.mulf %476, %486 : vector<16x128xf32>
    %488 = arith.addf %434, %487 : vector<16x128xf32>
    %489 = vector.broadcast %84 : f32 to vector<16x128xf32>
    %490 = arith.mulf %476, %489 : vector<16x128xf32>
    %491 = arith.addf %437, %490 : vector<16x128xf32>
    %492 = vector.broadcast %85 : f32 to vector<16x128xf32>
    %493 = arith.mulf %476, %492 : vector<16x128xf32>
    %494 = arith.addf %440, %493 : vector<16x128xf32>
    %495 = vector.broadcast %86 : f32 to vector<16x128xf32>
    %496 = arith.mulf %476, %495 : vector<16x128xf32>
    %497 = arith.addf %443, %496 : vector<16x128xf32>
    %498 = vector.broadcast %87 : f32 to vector<16x128xf32>
    %499 = arith.mulf %476, %498 : vector<16x128xf32>
    %500 = arith.addf %446, %499 : vector<16x128xf32>
    %501 = vector.broadcast %88 : f32 to vector<16x128xf32>
    %502 = arith.mulf %476, %501 : vector<16x128xf32>
    %503 = arith.addf %449, %502 : vector<16x128xf32>
    %504 = vector.broadcast %89 : f32 to vector<16x128xf32>
    %505 = arith.mulf %476, %504 : vector<16x128xf32>
    %506 = arith.addf %452, %505 : vector<16x128xf32>
    %507 = vector.broadcast %90 : f32 to vector<16x128xf32>
    %508 = arith.mulf %476, %507 : vector<16x128xf32>
    %509 = arith.addf %455, %508 : vector<16x128xf32>
    %510 = vector.broadcast %91 : f32 to vector<16x128xf32>
    %511 = arith.mulf %476, %510 : vector<16x128xf32>
    %512 = arith.addf %458, %511 : vector<16x128xf32>
    %513 = vector.broadcast %92 : f32 to vector<16x128xf32>
    %514 = arith.mulf %476, %513 : vector<16x128xf32>
    %515 = arith.addf %461, %514 : vector<16x128xf32>
    %516 = vector.broadcast %93 : f32 to vector<16x128xf32>
    %517 = arith.mulf %476, %516 : vector<16x128xf32>
    %518 = arith.addf %464, %517 : vector<16x128xf32>
    %519 = vector.broadcast %94 : f32 to vector<16x128xf32>
    %520 = arith.mulf %476, %519 : vector<16x128xf32>
    %521 = arith.addf %467, %520 : vector<16x128xf32>
    %522 = vector.broadcast %95 : f32 to vector<16x128xf32>
    %523 = arith.mulf %476, %522 : vector<16x128xf32>
    %524 = arith.addf %470, %523 : vector<16x128xf32>
    %525 = vector.broadcast %4 : f32 to vector<16x128xf32>
    %526 = arith.mulf %324, %525 : vector<16x128xf32>
    %527 = vector.broadcast %20 : f32 to vector<16x128xf32>
    %528 = arith.addf %526, %527 : vector<16x128xf32>
    %cst_69 = arith.constant 0.000000e+00 : f32
    %529 = vector.broadcast %cst_69 : f32 to vector<16x128xf32>
    %530 = arith.maximumf %528, %529 : vector<16x128xf32>
    %531 = vector.broadcast %96 : f32 to vector<16x128xf32>
    %532 = arith.mulf %530, %531 : vector<16x128xf32>
    %533 = arith.addf %479, %532 : vector<16x128xf32>
    %534 = vector.broadcast %97 : f32 to vector<16x128xf32>
    %535 = arith.mulf %530, %534 : vector<16x128xf32>
    %536 = arith.addf %482, %535 : vector<16x128xf32>
    %537 = vector.broadcast %98 : f32 to vector<16x128xf32>
    %538 = arith.mulf %530, %537 : vector<16x128xf32>
    %539 = arith.addf %485, %538 : vector<16x128xf32>
    %540 = vector.broadcast %99 : f32 to vector<16x128xf32>
    %541 = arith.mulf %530, %540 : vector<16x128xf32>
    %542 = arith.addf %488, %541 : vector<16x128xf32>
    %543 = vector.broadcast %100 : f32 to vector<16x128xf32>
    %544 = arith.mulf %530, %543 : vector<16x128xf32>
    %545 = arith.addf %491, %544 : vector<16x128xf32>
    %546 = vector.broadcast %101 : f32 to vector<16x128xf32>
    %547 = arith.mulf %530, %546 : vector<16x128xf32>
    %548 = arith.addf %494, %547 : vector<16x128xf32>
    %549 = vector.broadcast %102 : f32 to vector<16x128xf32>
    %550 = arith.mulf %530, %549 : vector<16x128xf32>
    %551 = arith.addf %497, %550 : vector<16x128xf32>
    %552 = vector.broadcast %103 : f32 to vector<16x128xf32>
    %553 = arith.mulf %530, %552 : vector<16x128xf32>
    %554 = arith.addf %500, %553 : vector<16x128xf32>
    %555 = vector.broadcast %104 : f32 to vector<16x128xf32>
    %556 = arith.mulf %530, %555 : vector<16x128xf32>
    %557 = arith.addf %503, %556 : vector<16x128xf32>
    %558 = vector.broadcast %105 : f32 to vector<16x128xf32>
    %559 = arith.mulf %530, %558 : vector<16x128xf32>
    %560 = arith.addf %506, %559 : vector<16x128xf32>
    %561 = vector.broadcast %106 : f32 to vector<16x128xf32>
    %562 = arith.mulf %530, %561 : vector<16x128xf32>
    %563 = arith.addf %509, %562 : vector<16x128xf32>
    %564 = vector.broadcast %107 : f32 to vector<16x128xf32>
    %565 = arith.mulf %530, %564 : vector<16x128xf32>
    %566 = arith.addf %512, %565 : vector<16x128xf32>
    %567 = vector.broadcast %108 : f32 to vector<16x128xf32>
    %568 = arith.mulf %530, %567 : vector<16x128xf32>
    %569 = arith.addf %515, %568 : vector<16x128xf32>
    %570 = vector.broadcast %109 : f32 to vector<16x128xf32>
    %571 = arith.mulf %530, %570 : vector<16x128xf32>
    %572 = arith.addf %518, %571 : vector<16x128xf32>
    %573 = vector.broadcast %110 : f32 to vector<16x128xf32>
    %574 = arith.mulf %530, %573 : vector<16x128xf32>
    %575 = arith.addf %521, %574 : vector<16x128xf32>
    %576 = vector.broadcast %111 : f32 to vector<16x128xf32>
    %577 = arith.mulf %530, %576 : vector<16x128xf32>
    %578 = arith.addf %524, %577 : vector<16x128xf32>
    %579 = vector.broadcast %5 : f32 to vector<16x128xf32>
    %580 = arith.mulf %324, %579 : vector<16x128xf32>
    %581 = vector.broadcast %21 : f32 to vector<16x128xf32>
    %582 = arith.addf %580, %581 : vector<16x128xf32>
    %cst_70 = arith.constant 0.000000e+00 : f32
    %583 = vector.broadcast %cst_70 : f32 to vector<16x128xf32>
    %584 = arith.maximumf %582, %583 : vector<16x128xf32>
    %585 = vector.broadcast %112 : f32 to vector<16x128xf32>
    %586 = arith.mulf %584, %585 : vector<16x128xf32>
    %587 = arith.addf %533, %586 : vector<16x128xf32>
    %588 = vector.broadcast %113 : f32 to vector<16x128xf32>
    %589 = arith.mulf %584, %588 : vector<16x128xf32>
    %590 = arith.addf %536, %589 : vector<16x128xf32>
    %591 = vector.broadcast %114 : f32 to vector<16x128xf32>
    %592 = arith.mulf %584, %591 : vector<16x128xf32>
    %593 = arith.addf %539, %592 : vector<16x128xf32>
    %594 = vector.broadcast %115 : f32 to vector<16x128xf32>
    %595 = arith.mulf %584, %594 : vector<16x128xf32>
    %596 = arith.addf %542, %595 : vector<16x128xf32>
    %597 = vector.broadcast %116 : f32 to vector<16x128xf32>
    %598 = arith.mulf %584, %597 : vector<16x128xf32>
    %599 = arith.addf %545, %598 : vector<16x128xf32>
    %600 = vector.broadcast %117 : f32 to vector<16x128xf32>
    %601 = arith.mulf %584, %600 : vector<16x128xf32>
    %602 = arith.addf %548, %601 : vector<16x128xf32>
    %603 = vector.broadcast %118 : f32 to vector<16x128xf32>
    %604 = arith.mulf %584, %603 : vector<16x128xf32>
    %605 = arith.addf %551, %604 : vector<16x128xf32>
    %606 = vector.broadcast %119 : f32 to vector<16x128xf32>
    %607 = arith.mulf %584, %606 : vector<16x128xf32>
    %608 = arith.addf %554, %607 : vector<16x128xf32>
    %609 = vector.broadcast %120 : f32 to vector<16x128xf32>
    %610 = arith.mulf %584, %609 : vector<16x128xf32>
    %611 = arith.addf %557, %610 : vector<16x128xf32>
    %612 = vector.broadcast %121 : f32 to vector<16x128xf32>
    %613 = arith.mulf %584, %612 : vector<16x128xf32>
    %614 = arith.addf %560, %613 : vector<16x128xf32>
    %615 = vector.broadcast %122 : f32 to vector<16x128xf32>
    %616 = arith.mulf %584, %615 : vector<16x128xf32>
    %617 = arith.addf %563, %616 : vector<16x128xf32>
    %618 = vector.broadcast %123 : f32 to vector<16x128xf32>
    %619 = arith.mulf %584, %618 : vector<16x128xf32>
    %620 = arith.addf %566, %619 : vector<16x128xf32>
    %621 = vector.broadcast %124 : f32 to vector<16x128xf32>
    %622 = arith.mulf %584, %621 : vector<16x128xf32>
    %623 = arith.addf %569, %622 : vector<16x128xf32>
    %624 = vector.broadcast %125 : f32 to vector<16x128xf32>
    %625 = arith.mulf %584, %624 : vector<16x128xf32>
    %626 = arith.addf %572, %625 : vector<16x128xf32>
    %627 = vector.broadcast %126 : f32 to vector<16x128xf32>
    %628 = arith.mulf %584, %627 : vector<16x128xf32>
    %629 = arith.addf %575, %628 : vector<16x128xf32>
    %630 = vector.broadcast %127 : f32 to vector<16x128xf32>
    %631 = arith.mulf %584, %630 : vector<16x128xf32>
    %632 = arith.addf %578, %631 : vector<16x128xf32>
    %633 = vector.broadcast %6 : f32 to vector<16x128xf32>
    %634 = arith.mulf %324, %633 : vector<16x128xf32>
    %635 = vector.broadcast %22 : f32 to vector<16x128xf32>
    %636 = arith.addf %634, %635 : vector<16x128xf32>
    %cst_71 = arith.constant 0.000000e+00 : f32
    %637 = vector.broadcast %cst_71 : f32 to vector<16x128xf32>
    %638 = arith.maximumf %636, %637 : vector<16x128xf32>
    %639 = vector.broadcast %128 : f32 to vector<16x128xf32>
    %640 = arith.mulf %638, %639 : vector<16x128xf32>
    %641 = arith.addf %587, %640 : vector<16x128xf32>
    %642 = vector.broadcast %129 : f32 to vector<16x128xf32>
    %643 = arith.mulf %638, %642 : vector<16x128xf32>
    %644 = arith.addf %590, %643 : vector<16x128xf32>
    %645 = vector.broadcast %130 : f32 to vector<16x128xf32>
    %646 = arith.mulf %638, %645 : vector<16x128xf32>
    %647 = arith.addf %593, %646 : vector<16x128xf32>
    %648 = vector.broadcast %131 : f32 to vector<16x128xf32>
    %649 = arith.mulf %638, %648 : vector<16x128xf32>
    %650 = arith.addf %596, %649 : vector<16x128xf32>
    %651 = vector.broadcast %132 : f32 to vector<16x128xf32>
    %652 = arith.mulf %638, %651 : vector<16x128xf32>
    %653 = arith.addf %599, %652 : vector<16x128xf32>
    %654 = vector.broadcast %133 : f32 to vector<16x128xf32>
    %655 = arith.mulf %638, %654 : vector<16x128xf32>
    %656 = arith.addf %602, %655 : vector<16x128xf32>
    %657 = vector.broadcast %134 : f32 to vector<16x128xf32>
    %658 = arith.mulf %638, %657 : vector<16x128xf32>
    %659 = arith.addf %605, %658 : vector<16x128xf32>
    %660 = vector.broadcast %135 : f32 to vector<16x128xf32>
    %661 = arith.mulf %638, %660 : vector<16x128xf32>
    %662 = arith.addf %608, %661 : vector<16x128xf32>
    %663 = vector.broadcast %136 : f32 to vector<16x128xf32>
    %664 = arith.mulf %638, %663 : vector<16x128xf32>
    %665 = arith.addf %611, %664 : vector<16x128xf32>
    %666 = vector.broadcast %137 : f32 to vector<16x128xf32>
    %667 = arith.mulf %638, %666 : vector<16x128xf32>
    %668 = arith.addf %614, %667 : vector<16x128xf32>
    %669 = vector.broadcast %138 : f32 to vector<16x128xf32>
    %670 = arith.mulf %638, %669 : vector<16x128xf32>
    %671 = arith.addf %617, %670 : vector<16x128xf32>
    %672 = vector.broadcast %139 : f32 to vector<16x128xf32>
    %673 = arith.mulf %638, %672 : vector<16x128xf32>
    %674 = arith.addf %620, %673 : vector<16x128xf32>
    %675 = vector.broadcast %140 : f32 to vector<16x128xf32>
    %676 = arith.mulf %638, %675 : vector<16x128xf32>
    %677 = arith.addf %623, %676 : vector<16x128xf32>
    %678 = vector.broadcast %141 : f32 to vector<16x128xf32>
    %679 = arith.mulf %638, %678 : vector<16x128xf32>
    %680 = arith.addf %626, %679 : vector<16x128xf32>
    %681 = vector.broadcast %142 : f32 to vector<16x128xf32>
    %682 = arith.mulf %638, %681 : vector<16x128xf32>
    %683 = arith.addf %629, %682 : vector<16x128xf32>
    %684 = vector.broadcast %143 : f32 to vector<16x128xf32>
    %685 = arith.mulf %638, %684 : vector<16x128xf32>
    %686 = arith.addf %632, %685 : vector<16x128xf32>
    %687 = vector.broadcast %7 : f32 to vector<16x128xf32>
    %688 = arith.mulf %324, %687 : vector<16x128xf32>
    %689 = vector.broadcast %23 : f32 to vector<16x128xf32>
    %690 = arith.addf %688, %689 : vector<16x128xf32>
    %cst_72 = arith.constant 0.000000e+00 : f32
    %691 = vector.broadcast %cst_72 : f32 to vector<16x128xf32>
    %692 = arith.maximumf %690, %691 : vector<16x128xf32>
    %693 = vector.broadcast %144 : f32 to vector<16x128xf32>
    %694 = arith.mulf %692, %693 : vector<16x128xf32>
    %695 = arith.addf %641, %694 : vector<16x128xf32>
    %696 = vector.broadcast %145 : f32 to vector<16x128xf32>
    %697 = arith.mulf %692, %696 : vector<16x128xf32>
    %698 = arith.addf %644, %697 : vector<16x128xf32>
    %699 = vector.broadcast %146 : f32 to vector<16x128xf32>
    %700 = arith.mulf %692, %699 : vector<16x128xf32>
    %701 = arith.addf %647, %700 : vector<16x128xf32>
    %702 = vector.broadcast %147 : f32 to vector<16x128xf32>
    %703 = arith.mulf %692, %702 : vector<16x128xf32>
    %704 = arith.addf %650, %703 : vector<16x128xf32>
    %705 = vector.broadcast %148 : f32 to vector<16x128xf32>
    %706 = arith.mulf %692, %705 : vector<16x128xf32>
    %707 = arith.addf %653, %706 : vector<16x128xf32>
    %708 = vector.broadcast %149 : f32 to vector<16x128xf32>
    %709 = arith.mulf %692, %708 : vector<16x128xf32>
    %710 = arith.addf %656, %709 : vector<16x128xf32>
    %711 = vector.broadcast %150 : f32 to vector<16x128xf32>
    %712 = arith.mulf %692, %711 : vector<16x128xf32>
    %713 = arith.addf %659, %712 : vector<16x128xf32>
    %714 = vector.broadcast %151 : f32 to vector<16x128xf32>
    %715 = arith.mulf %692, %714 : vector<16x128xf32>
    %716 = arith.addf %662, %715 : vector<16x128xf32>
    %717 = vector.broadcast %152 : f32 to vector<16x128xf32>
    %718 = arith.mulf %692, %717 : vector<16x128xf32>
    %719 = arith.addf %665, %718 : vector<16x128xf32>
    %720 = vector.broadcast %153 : f32 to vector<16x128xf32>
    %721 = arith.mulf %692, %720 : vector<16x128xf32>
    %722 = arith.addf %668, %721 : vector<16x128xf32>
    %723 = vector.broadcast %154 : f32 to vector<16x128xf32>
    %724 = arith.mulf %692, %723 : vector<16x128xf32>
    %725 = arith.addf %671, %724 : vector<16x128xf32>
    %726 = vector.broadcast %155 : f32 to vector<16x128xf32>
    %727 = arith.mulf %692, %726 : vector<16x128xf32>
    %728 = arith.addf %674, %727 : vector<16x128xf32>
    %729 = vector.broadcast %156 : f32 to vector<16x128xf32>
    %730 = arith.mulf %692, %729 : vector<16x128xf32>
    %731 = arith.addf %677, %730 : vector<16x128xf32>
    %732 = vector.broadcast %157 : f32 to vector<16x128xf32>
    %733 = arith.mulf %692, %732 : vector<16x128xf32>
    %734 = arith.addf %680, %733 : vector<16x128xf32>
    %735 = vector.broadcast %158 : f32 to vector<16x128xf32>
    %736 = arith.mulf %692, %735 : vector<16x128xf32>
    %737 = arith.addf %683, %736 : vector<16x128xf32>
    %738 = vector.broadcast %159 : f32 to vector<16x128xf32>
    %739 = arith.mulf %692, %738 : vector<16x128xf32>
    %740 = arith.addf %686, %739 : vector<16x128xf32>
    %741 = vector.broadcast %8 : f32 to vector<16x128xf32>
    %742 = arith.mulf %324, %741 : vector<16x128xf32>
    %743 = vector.broadcast %24 : f32 to vector<16x128xf32>
    %744 = arith.addf %742, %743 : vector<16x128xf32>
    %cst_73 = arith.constant 0.000000e+00 : f32
    %745 = vector.broadcast %cst_73 : f32 to vector<16x128xf32>
    %746 = arith.maximumf %744, %745 : vector<16x128xf32>
    %747 = vector.broadcast %160 : f32 to vector<16x128xf32>
    %748 = arith.mulf %746, %747 : vector<16x128xf32>
    %749 = arith.addf %695, %748 : vector<16x128xf32>
    %750 = vector.broadcast %161 : f32 to vector<16x128xf32>
    %751 = arith.mulf %746, %750 : vector<16x128xf32>
    %752 = arith.addf %698, %751 : vector<16x128xf32>
    %753 = vector.broadcast %162 : f32 to vector<16x128xf32>
    %754 = arith.mulf %746, %753 : vector<16x128xf32>
    %755 = arith.addf %701, %754 : vector<16x128xf32>
    %756 = vector.broadcast %163 : f32 to vector<16x128xf32>
    %757 = arith.mulf %746, %756 : vector<16x128xf32>
    %758 = arith.addf %704, %757 : vector<16x128xf32>
    %759 = vector.broadcast %164 : f32 to vector<16x128xf32>
    %760 = arith.mulf %746, %759 : vector<16x128xf32>
    %761 = arith.addf %707, %760 : vector<16x128xf32>
    %762 = vector.broadcast %165 : f32 to vector<16x128xf32>
    %763 = arith.mulf %746, %762 : vector<16x128xf32>
    %764 = arith.addf %710, %763 : vector<16x128xf32>
    %765 = vector.broadcast %166 : f32 to vector<16x128xf32>
    %766 = arith.mulf %746, %765 : vector<16x128xf32>
    %767 = arith.addf %713, %766 : vector<16x128xf32>
    %768 = vector.broadcast %167 : f32 to vector<16x128xf32>
    %769 = arith.mulf %746, %768 : vector<16x128xf32>
    %770 = arith.addf %716, %769 : vector<16x128xf32>
    %771 = vector.broadcast %168 : f32 to vector<16x128xf32>
    %772 = arith.mulf %746, %771 : vector<16x128xf32>
    %773 = arith.addf %719, %772 : vector<16x128xf32>
    %774 = vector.broadcast %169 : f32 to vector<16x128xf32>
    %775 = arith.mulf %746, %774 : vector<16x128xf32>
    %776 = arith.addf %722, %775 : vector<16x128xf32>
    %777 = vector.broadcast %170 : f32 to vector<16x128xf32>
    %778 = arith.mulf %746, %777 : vector<16x128xf32>
    %779 = arith.addf %725, %778 : vector<16x128xf32>
    %780 = vector.broadcast %171 : f32 to vector<16x128xf32>
    %781 = arith.mulf %746, %780 : vector<16x128xf32>
    %782 = arith.addf %728, %781 : vector<16x128xf32>
    %783 = vector.broadcast %172 : f32 to vector<16x128xf32>
    %784 = arith.mulf %746, %783 : vector<16x128xf32>
    %785 = arith.addf %731, %784 : vector<16x128xf32>
    %786 = vector.broadcast %173 : f32 to vector<16x128xf32>
    %787 = arith.mulf %746, %786 : vector<16x128xf32>
    %788 = arith.addf %734, %787 : vector<16x128xf32>
    %789 = vector.broadcast %174 : f32 to vector<16x128xf32>
    %790 = arith.mulf %746, %789 : vector<16x128xf32>
    %791 = arith.addf %737, %790 : vector<16x128xf32>
    %792 = vector.broadcast %175 : f32 to vector<16x128xf32>
    %793 = arith.mulf %746, %792 : vector<16x128xf32>
    %794 = arith.addf %740, %793 : vector<16x128xf32>
    %795 = vector.broadcast %9 : f32 to vector<16x128xf32>
    %796 = arith.mulf %324, %795 : vector<16x128xf32>
    %797 = vector.broadcast %25 : f32 to vector<16x128xf32>
    %798 = arith.addf %796, %797 : vector<16x128xf32>
    %cst_74 = arith.constant 0.000000e+00 : f32
    %799 = vector.broadcast %cst_74 : f32 to vector<16x128xf32>
    %800 = arith.maximumf %798, %799 : vector<16x128xf32>
    %801 = vector.broadcast %176 : f32 to vector<16x128xf32>
    %802 = arith.mulf %800, %801 : vector<16x128xf32>
    %803 = arith.addf %749, %802 : vector<16x128xf32>
    %804 = vector.broadcast %177 : f32 to vector<16x128xf32>
    %805 = arith.mulf %800, %804 : vector<16x128xf32>
    %806 = arith.addf %752, %805 : vector<16x128xf32>
    %807 = vector.broadcast %178 : f32 to vector<16x128xf32>
    %808 = arith.mulf %800, %807 : vector<16x128xf32>
    %809 = arith.addf %755, %808 : vector<16x128xf32>
    %810 = vector.broadcast %179 : f32 to vector<16x128xf32>
    %811 = arith.mulf %800, %810 : vector<16x128xf32>
    %812 = arith.addf %758, %811 : vector<16x128xf32>
    %813 = vector.broadcast %180 : f32 to vector<16x128xf32>
    %814 = arith.mulf %800, %813 : vector<16x128xf32>
    %815 = arith.addf %761, %814 : vector<16x128xf32>
    %816 = vector.broadcast %181 : f32 to vector<16x128xf32>
    %817 = arith.mulf %800, %816 : vector<16x128xf32>
    %818 = arith.addf %764, %817 : vector<16x128xf32>
    %819 = vector.broadcast %182 : f32 to vector<16x128xf32>
    %820 = arith.mulf %800, %819 : vector<16x128xf32>
    %821 = arith.addf %767, %820 : vector<16x128xf32>
    %822 = vector.broadcast %183 : f32 to vector<16x128xf32>
    %823 = arith.mulf %800, %822 : vector<16x128xf32>
    %824 = arith.addf %770, %823 : vector<16x128xf32>
    %825 = vector.broadcast %184 : f32 to vector<16x128xf32>
    %826 = arith.mulf %800, %825 : vector<16x128xf32>
    %827 = arith.addf %773, %826 : vector<16x128xf32>
    %828 = vector.broadcast %185 : f32 to vector<16x128xf32>
    %829 = arith.mulf %800, %828 : vector<16x128xf32>
    %830 = arith.addf %776, %829 : vector<16x128xf32>
    %831 = vector.broadcast %186 : f32 to vector<16x128xf32>
    %832 = arith.mulf %800, %831 : vector<16x128xf32>
    %833 = arith.addf %779, %832 : vector<16x128xf32>
    %834 = vector.broadcast %187 : f32 to vector<16x128xf32>
    %835 = arith.mulf %800, %834 : vector<16x128xf32>
    %836 = arith.addf %782, %835 : vector<16x128xf32>
    %837 = vector.broadcast %188 : f32 to vector<16x128xf32>
    %838 = arith.mulf %800, %837 : vector<16x128xf32>
    %839 = arith.addf %785, %838 : vector<16x128xf32>
    %840 = vector.broadcast %189 : f32 to vector<16x128xf32>
    %841 = arith.mulf %800, %840 : vector<16x128xf32>
    %842 = arith.addf %788, %841 : vector<16x128xf32>
    %843 = vector.broadcast %190 : f32 to vector<16x128xf32>
    %844 = arith.mulf %800, %843 : vector<16x128xf32>
    %845 = arith.addf %791, %844 : vector<16x128xf32>
    %846 = vector.broadcast %191 : f32 to vector<16x128xf32>
    %847 = arith.mulf %800, %846 : vector<16x128xf32>
    %848 = arith.addf %794, %847 : vector<16x128xf32>
    %849 = vector.broadcast %10 : f32 to vector<16x128xf32>
    %850 = arith.mulf %324, %849 : vector<16x128xf32>
    %851 = vector.broadcast %26 : f32 to vector<16x128xf32>
    %852 = arith.addf %850, %851 : vector<16x128xf32>
    %cst_75 = arith.constant 0.000000e+00 : f32
    %853 = vector.broadcast %cst_75 : f32 to vector<16x128xf32>
    %854 = arith.maximumf %852, %853 : vector<16x128xf32>
    %855 = vector.broadcast %192 : f32 to vector<16x128xf32>
    %856 = arith.mulf %854, %855 : vector<16x128xf32>
    %857 = arith.addf %803, %856 : vector<16x128xf32>
    %858 = vector.broadcast %193 : f32 to vector<16x128xf32>
    %859 = arith.mulf %854, %858 : vector<16x128xf32>
    %860 = arith.addf %806, %859 : vector<16x128xf32>
    %861 = vector.broadcast %194 : f32 to vector<16x128xf32>
    %862 = arith.mulf %854, %861 : vector<16x128xf32>
    %863 = arith.addf %809, %862 : vector<16x128xf32>
    %864 = vector.broadcast %195 : f32 to vector<16x128xf32>
    %865 = arith.mulf %854, %864 : vector<16x128xf32>
    %866 = arith.addf %812, %865 : vector<16x128xf32>
    %867 = vector.broadcast %196 : f32 to vector<16x128xf32>
    %868 = arith.mulf %854, %867 : vector<16x128xf32>
    %869 = arith.addf %815, %868 : vector<16x128xf32>
    %870 = vector.broadcast %197 : f32 to vector<16x128xf32>
    %871 = arith.mulf %854, %870 : vector<16x128xf32>
    %872 = arith.addf %818, %871 : vector<16x128xf32>
    %873 = vector.broadcast %198 : f32 to vector<16x128xf32>
    %874 = arith.mulf %854, %873 : vector<16x128xf32>
    %875 = arith.addf %821, %874 : vector<16x128xf32>
    %876 = vector.broadcast %199 : f32 to vector<16x128xf32>
    %877 = arith.mulf %854, %876 : vector<16x128xf32>
    %878 = arith.addf %824, %877 : vector<16x128xf32>
    %879 = vector.broadcast %200 : f32 to vector<16x128xf32>
    %880 = arith.mulf %854, %879 : vector<16x128xf32>
    %881 = arith.addf %827, %880 : vector<16x128xf32>
    %882 = vector.broadcast %201 : f32 to vector<16x128xf32>
    %883 = arith.mulf %854, %882 : vector<16x128xf32>
    %884 = arith.addf %830, %883 : vector<16x128xf32>
    %885 = vector.broadcast %202 : f32 to vector<16x128xf32>
    %886 = arith.mulf %854, %885 : vector<16x128xf32>
    %887 = arith.addf %833, %886 : vector<16x128xf32>
    %888 = vector.broadcast %203 : f32 to vector<16x128xf32>
    %889 = arith.mulf %854, %888 : vector<16x128xf32>
    %890 = arith.addf %836, %889 : vector<16x128xf32>
    %891 = vector.broadcast %204 : f32 to vector<16x128xf32>
    %892 = arith.mulf %854, %891 : vector<16x128xf32>
    %893 = arith.addf %839, %892 : vector<16x128xf32>
    %894 = vector.broadcast %205 : f32 to vector<16x128xf32>
    %895 = arith.mulf %854, %894 : vector<16x128xf32>
    %896 = arith.addf %842, %895 : vector<16x128xf32>
    %897 = vector.broadcast %206 : f32 to vector<16x128xf32>
    %898 = arith.mulf %854, %897 : vector<16x128xf32>
    %899 = arith.addf %845, %898 : vector<16x128xf32>
    %900 = vector.broadcast %207 : f32 to vector<16x128xf32>
    %901 = arith.mulf %854, %900 : vector<16x128xf32>
    %902 = arith.addf %848, %901 : vector<16x128xf32>
    %903 = vector.broadcast %11 : f32 to vector<16x128xf32>
    %904 = arith.mulf %324, %903 : vector<16x128xf32>
    %905 = vector.broadcast %27 : f32 to vector<16x128xf32>
    %906 = arith.addf %904, %905 : vector<16x128xf32>
    %cst_76 = arith.constant 0.000000e+00 : f32
    %907 = vector.broadcast %cst_76 : f32 to vector<16x128xf32>
    %908 = arith.maximumf %906, %907 : vector<16x128xf32>
    %909 = vector.broadcast %208 : f32 to vector<16x128xf32>
    %910 = arith.mulf %908, %909 : vector<16x128xf32>
    %911 = arith.addf %857, %910 : vector<16x128xf32>
    %912 = vector.broadcast %209 : f32 to vector<16x128xf32>
    %913 = arith.mulf %908, %912 : vector<16x128xf32>
    %914 = arith.addf %860, %913 : vector<16x128xf32>
    %915 = vector.broadcast %210 : f32 to vector<16x128xf32>
    %916 = arith.mulf %908, %915 : vector<16x128xf32>
    %917 = arith.addf %863, %916 : vector<16x128xf32>
    %918 = vector.broadcast %211 : f32 to vector<16x128xf32>
    %919 = arith.mulf %908, %918 : vector<16x128xf32>
    %920 = arith.addf %866, %919 : vector<16x128xf32>
    %921 = vector.broadcast %212 : f32 to vector<16x128xf32>
    %922 = arith.mulf %908, %921 : vector<16x128xf32>
    %923 = arith.addf %869, %922 : vector<16x128xf32>
    %924 = vector.broadcast %213 : f32 to vector<16x128xf32>
    %925 = arith.mulf %908, %924 : vector<16x128xf32>
    %926 = arith.addf %872, %925 : vector<16x128xf32>
    %927 = vector.broadcast %214 : f32 to vector<16x128xf32>
    %928 = arith.mulf %908, %927 : vector<16x128xf32>
    %929 = arith.addf %875, %928 : vector<16x128xf32>
    %930 = vector.broadcast %215 : f32 to vector<16x128xf32>
    %931 = arith.mulf %908, %930 : vector<16x128xf32>
    %932 = arith.addf %878, %931 : vector<16x128xf32>
    %933 = vector.broadcast %216 : f32 to vector<16x128xf32>
    %934 = arith.mulf %908, %933 : vector<16x128xf32>
    %935 = arith.addf %881, %934 : vector<16x128xf32>
    %936 = vector.broadcast %217 : f32 to vector<16x128xf32>
    %937 = arith.mulf %908, %936 : vector<16x128xf32>
    %938 = arith.addf %884, %937 : vector<16x128xf32>
    %939 = vector.broadcast %218 : f32 to vector<16x128xf32>
    %940 = arith.mulf %908, %939 : vector<16x128xf32>
    %941 = arith.addf %887, %940 : vector<16x128xf32>
    %942 = vector.broadcast %219 : f32 to vector<16x128xf32>
    %943 = arith.mulf %908, %942 : vector<16x128xf32>
    %944 = arith.addf %890, %943 : vector<16x128xf32>
    %945 = vector.broadcast %220 : f32 to vector<16x128xf32>
    %946 = arith.mulf %908, %945 : vector<16x128xf32>
    %947 = arith.addf %893, %946 : vector<16x128xf32>
    %948 = vector.broadcast %221 : f32 to vector<16x128xf32>
    %949 = arith.mulf %908, %948 : vector<16x128xf32>
    %950 = arith.addf %896, %949 : vector<16x128xf32>
    %951 = vector.broadcast %222 : f32 to vector<16x128xf32>
    %952 = arith.mulf %908, %951 : vector<16x128xf32>
    %953 = arith.addf %899, %952 : vector<16x128xf32>
    %954 = vector.broadcast %223 : f32 to vector<16x128xf32>
    %955 = arith.mulf %908, %954 : vector<16x128xf32>
    %956 = arith.addf %902, %955 : vector<16x128xf32>
    %957 = vector.broadcast %12 : f32 to vector<16x128xf32>
    %958 = arith.mulf %324, %957 : vector<16x128xf32>
    %959 = vector.broadcast %28 : f32 to vector<16x128xf32>
    %960 = arith.addf %958, %959 : vector<16x128xf32>
    %cst_77 = arith.constant 0.000000e+00 : f32
    %961 = vector.broadcast %cst_77 : f32 to vector<16x128xf32>
    %962 = arith.maximumf %960, %961 : vector<16x128xf32>
    %963 = vector.broadcast %224 : f32 to vector<16x128xf32>
    %964 = arith.mulf %962, %963 : vector<16x128xf32>
    %965 = arith.addf %911, %964 : vector<16x128xf32>
    %966 = vector.broadcast %225 : f32 to vector<16x128xf32>
    %967 = arith.mulf %962, %966 : vector<16x128xf32>
    %968 = arith.addf %914, %967 : vector<16x128xf32>
    %969 = vector.broadcast %226 : f32 to vector<16x128xf32>
    %970 = arith.mulf %962, %969 : vector<16x128xf32>
    %971 = arith.addf %917, %970 : vector<16x128xf32>
    %972 = vector.broadcast %227 : f32 to vector<16x128xf32>
    %973 = arith.mulf %962, %972 : vector<16x128xf32>
    %974 = arith.addf %920, %973 : vector<16x128xf32>
    %975 = vector.broadcast %228 : f32 to vector<16x128xf32>
    %976 = arith.mulf %962, %975 : vector<16x128xf32>
    %977 = arith.addf %923, %976 : vector<16x128xf32>
    %978 = vector.broadcast %229 : f32 to vector<16x128xf32>
    %979 = arith.mulf %962, %978 : vector<16x128xf32>
    %980 = arith.addf %926, %979 : vector<16x128xf32>
    %981 = vector.broadcast %230 : f32 to vector<16x128xf32>
    %982 = arith.mulf %962, %981 : vector<16x128xf32>
    %983 = arith.addf %929, %982 : vector<16x128xf32>
    %984 = vector.broadcast %231 : f32 to vector<16x128xf32>
    %985 = arith.mulf %962, %984 : vector<16x128xf32>
    %986 = arith.addf %932, %985 : vector<16x128xf32>
    %987 = vector.broadcast %232 : f32 to vector<16x128xf32>
    %988 = arith.mulf %962, %987 : vector<16x128xf32>
    %989 = arith.addf %935, %988 : vector<16x128xf32>
    %990 = vector.broadcast %233 : f32 to vector<16x128xf32>
    %991 = arith.mulf %962, %990 : vector<16x128xf32>
    %992 = arith.addf %938, %991 : vector<16x128xf32>
    %993 = vector.broadcast %234 : f32 to vector<16x128xf32>
    %994 = arith.mulf %962, %993 : vector<16x128xf32>
    %995 = arith.addf %941, %994 : vector<16x128xf32>
    %996 = vector.broadcast %235 : f32 to vector<16x128xf32>
    %997 = arith.mulf %962, %996 : vector<16x128xf32>
    %998 = arith.addf %944, %997 : vector<16x128xf32>
    %999 = vector.broadcast %236 : f32 to vector<16x128xf32>
    %1000 = arith.mulf %962, %999 : vector<16x128xf32>
    %1001 = arith.addf %947, %1000 : vector<16x128xf32>
    %1002 = vector.broadcast %237 : f32 to vector<16x128xf32>
    %1003 = arith.mulf %962, %1002 : vector<16x128xf32>
    %1004 = arith.addf %950, %1003 : vector<16x128xf32>
    %1005 = vector.broadcast %238 : f32 to vector<16x128xf32>
    %1006 = arith.mulf %962, %1005 : vector<16x128xf32>
    %1007 = arith.addf %953, %1006 : vector<16x128xf32>
    %1008 = vector.broadcast %239 : f32 to vector<16x128xf32>
    %1009 = arith.mulf %962, %1008 : vector<16x128xf32>
    %1010 = arith.addf %956, %1009 : vector<16x128xf32>
    %1011 = vector.broadcast %13 : f32 to vector<16x128xf32>
    %1012 = arith.mulf %324, %1011 : vector<16x128xf32>
    %1013 = vector.broadcast %29 : f32 to vector<16x128xf32>
    %1014 = arith.addf %1012, %1013 : vector<16x128xf32>
    %cst_78 = arith.constant 0.000000e+00 : f32
    %1015 = vector.broadcast %cst_78 : f32 to vector<16x128xf32>
    %1016 = arith.maximumf %1014, %1015 : vector<16x128xf32>
    %1017 = vector.broadcast %240 : f32 to vector<16x128xf32>
    %1018 = arith.mulf %1016, %1017 : vector<16x128xf32>
    %1019 = arith.addf %965, %1018 : vector<16x128xf32>
    %1020 = vector.broadcast %241 : f32 to vector<16x128xf32>
    %1021 = arith.mulf %1016, %1020 : vector<16x128xf32>
    %1022 = arith.addf %968, %1021 : vector<16x128xf32>
    %1023 = vector.broadcast %242 : f32 to vector<16x128xf32>
    %1024 = arith.mulf %1016, %1023 : vector<16x128xf32>
    %1025 = arith.addf %971, %1024 : vector<16x128xf32>
    %1026 = vector.broadcast %243 : f32 to vector<16x128xf32>
    %1027 = arith.mulf %1016, %1026 : vector<16x128xf32>
    %1028 = arith.addf %974, %1027 : vector<16x128xf32>
    %1029 = vector.broadcast %244 : f32 to vector<16x128xf32>
    %1030 = arith.mulf %1016, %1029 : vector<16x128xf32>
    %1031 = arith.addf %977, %1030 : vector<16x128xf32>
    %1032 = vector.broadcast %245 : f32 to vector<16x128xf32>
    %1033 = arith.mulf %1016, %1032 : vector<16x128xf32>
    %1034 = arith.addf %980, %1033 : vector<16x128xf32>
    %1035 = vector.broadcast %246 : f32 to vector<16x128xf32>
    %1036 = arith.mulf %1016, %1035 : vector<16x128xf32>
    %1037 = arith.addf %983, %1036 : vector<16x128xf32>
    %1038 = vector.broadcast %247 : f32 to vector<16x128xf32>
    %1039 = arith.mulf %1016, %1038 : vector<16x128xf32>
    %1040 = arith.addf %986, %1039 : vector<16x128xf32>
    %1041 = vector.broadcast %248 : f32 to vector<16x128xf32>
    %1042 = arith.mulf %1016, %1041 : vector<16x128xf32>
    %1043 = arith.addf %989, %1042 : vector<16x128xf32>
    %1044 = vector.broadcast %249 : f32 to vector<16x128xf32>
    %1045 = arith.mulf %1016, %1044 : vector<16x128xf32>
    %1046 = arith.addf %992, %1045 : vector<16x128xf32>
    %1047 = vector.broadcast %250 : f32 to vector<16x128xf32>
    %1048 = arith.mulf %1016, %1047 : vector<16x128xf32>
    %1049 = arith.addf %995, %1048 : vector<16x128xf32>
    %1050 = vector.broadcast %251 : f32 to vector<16x128xf32>
    %1051 = arith.mulf %1016, %1050 : vector<16x128xf32>
    %1052 = arith.addf %998, %1051 : vector<16x128xf32>
    %1053 = vector.broadcast %252 : f32 to vector<16x128xf32>
    %1054 = arith.mulf %1016, %1053 : vector<16x128xf32>
    %1055 = arith.addf %1001, %1054 : vector<16x128xf32>
    %1056 = vector.broadcast %253 : f32 to vector<16x128xf32>
    %1057 = arith.mulf %1016, %1056 : vector<16x128xf32>
    %1058 = arith.addf %1004, %1057 : vector<16x128xf32>
    %1059 = vector.broadcast %254 : f32 to vector<16x128xf32>
    %1060 = arith.mulf %1016, %1059 : vector<16x128xf32>
    %1061 = arith.addf %1007, %1060 : vector<16x128xf32>
    %1062 = vector.broadcast %255 : f32 to vector<16x128xf32>
    %1063 = arith.mulf %1016, %1062 : vector<16x128xf32>
    %1064 = arith.addf %1010, %1063 : vector<16x128xf32>
    %1065 = vector.broadcast %14 : f32 to vector<16x128xf32>
    %1066 = arith.mulf %324, %1065 : vector<16x128xf32>
    %1067 = vector.broadcast %30 : f32 to vector<16x128xf32>
    %1068 = arith.addf %1066, %1067 : vector<16x128xf32>
    %cst_79 = arith.constant 0.000000e+00 : f32
    %1069 = vector.broadcast %cst_79 : f32 to vector<16x128xf32>
    %1070 = arith.maximumf %1068, %1069 : vector<16x128xf32>
    %1071 = vector.broadcast %256 : f32 to vector<16x128xf32>
    %1072 = arith.mulf %1070, %1071 : vector<16x128xf32>
    %1073 = arith.addf %1019, %1072 : vector<16x128xf32>
    %1074 = vector.broadcast %257 : f32 to vector<16x128xf32>
    %1075 = arith.mulf %1070, %1074 : vector<16x128xf32>
    %1076 = arith.addf %1022, %1075 : vector<16x128xf32>
    %1077 = vector.broadcast %258 : f32 to vector<16x128xf32>
    %1078 = arith.mulf %1070, %1077 : vector<16x128xf32>
    %1079 = arith.addf %1025, %1078 : vector<16x128xf32>
    %1080 = vector.broadcast %259 : f32 to vector<16x128xf32>
    %1081 = arith.mulf %1070, %1080 : vector<16x128xf32>
    %1082 = arith.addf %1028, %1081 : vector<16x128xf32>
    %1083 = vector.broadcast %260 : f32 to vector<16x128xf32>
    %1084 = arith.mulf %1070, %1083 : vector<16x128xf32>
    %1085 = arith.addf %1031, %1084 : vector<16x128xf32>
    %1086 = vector.broadcast %261 : f32 to vector<16x128xf32>
    %1087 = arith.mulf %1070, %1086 : vector<16x128xf32>
    %1088 = arith.addf %1034, %1087 : vector<16x128xf32>
    %1089 = vector.broadcast %262 : f32 to vector<16x128xf32>
    %1090 = arith.mulf %1070, %1089 : vector<16x128xf32>
    %1091 = arith.addf %1037, %1090 : vector<16x128xf32>
    %1092 = vector.broadcast %263 : f32 to vector<16x128xf32>
    %1093 = arith.mulf %1070, %1092 : vector<16x128xf32>
    %1094 = arith.addf %1040, %1093 : vector<16x128xf32>
    %1095 = vector.broadcast %264 : f32 to vector<16x128xf32>
    %1096 = arith.mulf %1070, %1095 : vector<16x128xf32>
    %1097 = arith.addf %1043, %1096 : vector<16x128xf32>
    %1098 = vector.broadcast %265 : f32 to vector<16x128xf32>
    %1099 = arith.mulf %1070, %1098 : vector<16x128xf32>
    %1100 = arith.addf %1046, %1099 : vector<16x128xf32>
    %1101 = vector.broadcast %266 : f32 to vector<16x128xf32>
    %1102 = arith.mulf %1070, %1101 : vector<16x128xf32>
    %1103 = arith.addf %1049, %1102 : vector<16x128xf32>
    %1104 = vector.broadcast %267 : f32 to vector<16x128xf32>
    %1105 = arith.mulf %1070, %1104 : vector<16x128xf32>
    %1106 = arith.addf %1052, %1105 : vector<16x128xf32>
    %1107 = vector.broadcast %268 : f32 to vector<16x128xf32>
    %1108 = arith.mulf %1070, %1107 : vector<16x128xf32>
    %1109 = arith.addf %1055, %1108 : vector<16x128xf32>
    %1110 = vector.broadcast %269 : f32 to vector<16x128xf32>
    %1111 = arith.mulf %1070, %1110 : vector<16x128xf32>
    %1112 = arith.addf %1058, %1111 : vector<16x128xf32>
    %1113 = vector.broadcast %270 : f32 to vector<16x128xf32>
    %1114 = arith.mulf %1070, %1113 : vector<16x128xf32>
    %1115 = arith.addf %1061, %1114 : vector<16x128xf32>
    %1116 = vector.broadcast %271 : f32 to vector<16x128xf32>
    %1117 = arith.mulf %1070, %1116 : vector<16x128xf32>
    %1118 = arith.addf %1064, %1117 : vector<16x128xf32>
    %1119 = vector.broadcast %15 : f32 to vector<16x128xf32>
    %1120 = arith.mulf %324, %1119 : vector<16x128xf32>
    %1121 = vector.broadcast %31 : f32 to vector<16x128xf32>
    %1122 = arith.addf %1120, %1121 : vector<16x128xf32>
    %cst_80 = arith.constant 0.000000e+00 : f32
    %1123 = vector.broadcast %cst_80 : f32 to vector<16x128xf32>
    %1124 = arith.maximumf %1122, %1123 : vector<16x128xf32>
    %1125 = vector.broadcast %272 : f32 to vector<16x128xf32>
    %1126 = arith.mulf %1124, %1125 : vector<16x128xf32>
    %1127 = arith.addf %1073, %1126 : vector<16x128xf32>
    %1128 = vector.broadcast %273 : f32 to vector<16x128xf32>
    %1129 = arith.mulf %1124, %1128 : vector<16x128xf32>
    %1130 = arith.addf %1076, %1129 : vector<16x128xf32>
    %1131 = vector.broadcast %274 : f32 to vector<16x128xf32>
    %1132 = arith.mulf %1124, %1131 : vector<16x128xf32>
    %1133 = arith.addf %1079, %1132 : vector<16x128xf32>
    %1134 = vector.broadcast %275 : f32 to vector<16x128xf32>
    %1135 = arith.mulf %1124, %1134 : vector<16x128xf32>
    %1136 = arith.addf %1082, %1135 : vector<16x128xf32>
    %1137 = vector.broadcast %276 : f32 to vector<16x128xf32>
    %1138 = arith.mulf %1124, %1137 : vector<16x128xf32>
    %1139 = arith.addf %1085, %1138 : vector<16x128xf32>
    %1140 = vector.broadcast %277 : f32 to vector<16x128xf32>
    %1141 = arith.mulf %1124, %1140 : vector<16x128xf32>
    %1142 = arith.addf %1088, %1141 : vector<16x128xf32>
    %1143 = vector.broadcast %278 : f32 to vector<16x128xf32>
    %1144 = arith.mulf %1124, %1143 : vector<16x128xf32>
    %1145 = arith.addf %1091, %1144 : vector<16x128xf32>
    %1146 = vector.broadcast %279 : f32 to vector<16x128xf32>
    %1147 = arith.mulf %1124, %1146 : vector<16x128xf32>
    %1148 = arith.addf %1094, %1147 : vector<16x128xf32>
    %1149 = vector.broadcast %280 : f32 to vector<16x128xf32>
    %1150 = arith.mulf %1124, %1149 : vector<16x128xf32>
    %1151 = arith.addf %1097, %1150 : vector<16x128xf32>
    %1152 = vector.broadcast %281 : f32 to vector<16x128xf32>
    %1153 = arith.mulf %1124, %1152 : vector<16x128xf32>
    %1154 = arith.addf %1100, %1153 : vector<16x128xf32>
    %1155 = vector.broadcast %282 : f32 to vector<16x128xf32>
    %1156 = arith.mulf %1124, %1155 : vector<16x128xf32>
    %1157 = arith.addf %1103, %1156 : vector<16x128xf32>
    %1158 = vector.broadcast %283 : f32 to vector<16x128xf32>
    %1159 = arith.mulf %1124, %1158 : vector<16x128xf32>
    %1160 = arith.addf %1106, %1159 : vector<16x128xf32>
    %1161 = vector.broadcast %284 : f32 to vector<16x128xf32>
    %1162 = arith.mulf %1124, %1161 : vector<16x128xf32>
    %1163 = arith.addf %1109, %1162 : vector<16x128xf32>
    %1164 = vector.broadcast %285 : f32 to vector<16x128xf32>
    %1165 = arith.mulf %1124, %1164 : vector<16x128xf32>
    %1166 = arith.addf %1112, %1165 : vector<16x128xf32>
    %1167 = vector.broadcast %286 : f32 to vector<16x128xf32>
    %1168 = arith.mulf %1124, %1167 : vector<16x128xf32>
    %1169 = arith.addf %1115, %1168 : vector<16x128xf32>
    %1170 = vector.broadcast %287 : f32 to vector<16x128xf32>
    %1171 = arith.mulf %1124, %1170 : vector<16x128xf32>
    %1172 = arith.addf %1118, %1171 : vector<16x128xf32>
    %1173 = vector.broadcast %288 : f32 to vector<16x128xf32>
    %1174 = arith.addf %1127, %1173 : vector<16x128xf32>
    %cst_81 = arith.constant 0.000000e+00 : f32
    %1175 = vector.broadcast %cst_81 : f32 to vector<16x128xf32>
    %1176 = arith.maximumf %1174, %1175 : vector<16x128xf32>
    %1177 = vector.broadcast %304 : f32 to vector<16x128xf32>
    %1178 = arith.mulf %1176, %1177 : vector<16x128xf32>
    %1179 = vector.broadcast %289 : f32 to vector<16x128xf32>
    %1180 = arith.addf %1130, %1179 : vector<16x128xf32>
    %cst_82 = arith.constant 0.000000e+00 : f32
    %1181 = vector.broadcast %cst_82 : f32 to vector<16x128xf32>
    %1182 = arith.maximumf %1180, %1181 : vector<16x128xf32>
    %1183 = vector.broadcast %305 : f32 to vector<16x128xf32>
    %1184 = arith.mulf %1182, %1183 : vector<16x128xf32>
    %1185 = arith.addf %1178, %1184 : vector<16x128xf32>
    %1186 = vector.broadcast %290 : f32 to vector<16x128xf32>
    %1187 = arith.addf %1133, %1186 : vector<16x128xf32>
    %cst_83 = arith.constant 0.000000e+00 : f32
    %1188 = vector.broadcast %cst_83 : f32 to vector<16x128xf32>
    %1189 = arith.maximumf %1187, %1188 : vector<16x128xf32>
    %1190 = vector.broadcast %306 : f32 to vector<16x128xf32>
    %1191 = arith.mulf %1189, %1190 : vector<16x128xf32>
    %1192 = arith.addf %1185, %1191 : vector<16x128xf32>
    %1193 = vector.broadcast %291 : f32 to vector<16x128xf32>
    %1194 = arith.addf %1136, %1193 : vector<16x128xf32>
    %cst_84 = arith.constant 0.000000e+00 : f32
    %1195 = vector.broadcast %cst_84 : f32 to vector<16x128xf32>
    %1196 = arith.maximumf %1194, %1195 : vector<16x128xf32>
    %1197 = vector.broadcast %307 : f32 to vector<16x128xf32>
    %1198 = arith.mulf %1196, %1197 : vector<16x128xf32>
    %1199 = arith.addf %1192, %1198 : vector<16x128xf32>
    %1200 = vector.broadcast %292 : f32 to vector<16x128xf32>
    %1201 = arith.addf %1139, %1200 : vector<16x128xf32>
    %cst_85 = arith.constant 0.000000e+00 : f32
    %1202 = vector.broadcast %cst_85 : f32 to vector<16x128xf32>
    %1203 = arith.maximumf %1201, %1202 : vector<16x128xf32>
    %1204 = vector.broadcast %308 : f32 to vector<16x128xf32>
    %1205 = arith.mulf %1203, %1204 : vector<16x128xf32>
    %1206 = arith.addf %1199, %1205 : vector<16x128xf32>
    %1207 = vector.broadcast %293 : f32 to vector<16x128xf32>
    %1208 = arith.addf %1142, %1207 : vector<16x128xf32>
    %cst_86 = arith.constant 0.000000e+00 : f32
    %1209 = vector.broadcast %cst_86 : f32 to vector<16x128xf32>
    %1210 = arith.maximumf %1208, %1209 : vector<16x128xf32>
    %1211 = vector.broadcast %309 : f32 to vector<16x128xf32>
    %1212 = arith.mulf %1210, %1211 : vector<16x128xf32>
    %1213 = arith.addf %1206, %1212 : vector<16x128xf32>
    %1214 = vector.broadcast %294 : f32 to vector<16x128xf32>
    %1215 = arith.addf %1145, %1214 : vector<16x128xf32>
    %cst_87 = arith.constant 0.000000e+00 : f32
    %1216 = vector.broadcast %cst_87 : f32 to vector<16x128xf32>
    %1217 = arith.maximumf %1215, %1216 : vector<16x128xf32>
    %1218 = vector.broadcast %310 : f32 to vector<16x128xf32>
    %1219 = arith.mulf %1217, %1218 : vector<16x128xf32>
    %1220 = arith.addf %1213, %1219 : vector<16x128xf32>
    %1221 = vector.broadcast %295 : f32 to vector<16x128xf32>
    %1222 = arith.addf %1148, %1221 : vector<16x128xf32>
    %cst_88 = arith.constant 0.000000e+00 : f32
    %1223 = vector.broadcast %cst_88 : f32 to vector<16x128xf32>
    %1224 = arith.maximumf %1222, %1223 : vector<16x128xf32>
    %1225 = vector.broadcast %311 : f32 to vector<16x128xf32>
    %1226 = arith.mulf %1224, %1225 : vector<16x128xf32>
    %1227 = arith.addf %1220, %1226 : vector<16x128xf32>
    %1228 = vector.broadcast %296 : f32 to vector<16x128xf32>
    %1229 = arith.addf %1151, %1228 : vector<16x128xf32>
    %cst_89 = arith.constant 0.000000e+00 : f32
    %1230 = vector.broadcast %cst_89 : f32 to vector<16x128xf32>
    %1231 = arith.maximumf %1229, %1230 : vector<16x128xf32>
    %1232 = vector.broadcast %312 : f32 to vector<16x128xf32>
    %1233 = arith.mulf %1231, %1232 : vector<16x128xf32>
    %1234 = arith.addf %1227, %1233 : vector<16x128xf32>
    %1235 = vector.broadcast %297 : f32 to vector<16x128xf32>
    %1236 = arith.addf %1154, %1235 : vector<16x128xf32>
    %cst_90 = arith.constant 0.000000e+00 : f32
    %1237 = vector.broadcast %cst_90 : f32 to vector<16x128xf32>
    %1238 = arith.maximumf %1236, %1237 : vector<16x128xf32>
    %1239 = vector.broadcast %313 : f32 to vector<16x128xf32>
    %1240 = arith.mulf %1238, %1239 : vector<16x128xf32>
    %1241 = arith.addf %1234, %1240 : vector<16x128xf32>
    %1242 = vector.broadcast %298 : f32 to vector<16x128xf32>
    %1243 = arith.addf %1157, %1242 : vector<16x128xf32>
    %cst_91 = arith.constant 0.000000e+00 : f32
    %1244 = vector.broadcast %cst_91 : f32 to vector<16x128xf32>
    %1245 = arith.maximumf %1243, %1244 : vector<16x128xf32>
    %1246 = vector.broadcast %314 : f32 to vector<16x128xf32>
    %1247 = arith.mulf %1245, %1246 : vector<16x128xf32>
    %1248 = arith.addf %1241, %1247 : vector<16x128xf32>
    %1249 = vector.broadcast %299 : f32 to vector<16x128xf32>
    %1250 = arith.addf %1160, %1249 : vector<16x128xf32>
    %cst_92 = arith.constant 0.000000e+00 : f32
    %1251 = vector.broadcast %cst_92 : f32 to vector<16x128xf32>
    %1252 = arith.maximumf %1250, %1251 : vector<16x128xf32>
    %1253 = vector.broadcast %315 : f32 to vector<16x128xf32>
    %1254 = arith.mulf %1252, %1253 : vector<16x128xf32>
    %1255 = arith.addf %1248, %1254 : vector<16x128xf32>
    %1256 = vector.broadcast %300 : f32 to vector<16x128xf32>
    %1257 = arith.addf %1163, %1256 : vector<16x128xf32>
    %cst_93 = arith.constant 0.000000e+00 : f32
    %1258 = vector.broadcast %cst_93 : f32 to vector<16x128xf32>
    %1259 = arith.maximumf %1257, %1258 : vector<16x128xf32>
    %1260 = vector.broadcast %316 : f32 to vector<16x128xf32>
    %1261 = arith.mulf %1259, %1260 : vector<16x128xf32>
    %1262 = arith.addf %1255, %1261 : vector<16x128xf32>
    %1263 = vector.broadcast %301 : f32 to vector<16x128xf32>
    %1264 = arith.addf %1166, %1263 : vector<16x128xf32>
    %cst_94 = arith.constant 0.000000e+00 : f32
    %1265 = vector.broadcast %cst_94 : f32 to vector<16x128xf32>
    %1266 = arith.maximumf %1264, %1265 : vector<16x128xf32>
    %1267 = vector.broadcast %317 : f32 to vector<16x128xf32>
    %1268 = arith.mulf %1266, %1267 : vector<16x128xf32>
    %1269 = arith.addf %1262, %1268 : vector<16x128xf32>
    %1270 = vector.broadcast %302 : f32 to vector<16x128xf32>
    %1271 = arith.addf %1169, %1270 : vector<16x128xf32>
    %cst_95 = arith.constant 0.000000e+00 : f32
    %1272 = vector.broadcast %cst_95 : f32 to vector<16x128xf32>
    %1273 = arith.maximumf %1271, %1272 : vector<16x128xf32>
    %1274 = vector.broadcast %318 : f32 to vector<16x128xf32>
    %1275 = arith.mulf %1273, %1274 : vector<16x128xf32>
    %1276 = arith.addf %1269, %1275 : vector<16x128xf32>
    %1277 = vector.broadcast %303 : f32 to vector<16x128xf32>
    %1278 = arith.addf %1172, %1277 : vector<16x128xf32>
    %cst_96 = arith.constant 0.000000e+00 : f32
    %1279 = vector.broadcast %cst_96 : f32 to vector<16x128xf32>
    %1280 = arith.maximumf %1278, %1279 : vector<16x128xf32>
    %1281 = vector.broadcast %319 : f32 to vector<16x128xf32>
    %1282 = arith.mulf %1280, %1281 : vector<16x128xf32>
    %1283 = arith.addf %1276, %1282 : vector<16x128xf32>
    %1284 = vector.broadcast %320 : f32 to vector<16x128xf32>
    %1285 = arith.addf %1283, %1284 : vector<16x128xf32>
    %1286 = arith.index_cast %322 : i32 to index
    %c0_97 = arith.constant 0 : index
    %1287 = vector.load %arg8[%1286, %c0_97] : memref<16x128xf32, #tpu.memory_space<vmem>>, vector<16x128xf32>
    tpu.vector_store %arg8[%1286, %c0_97], %1285 {strides = array<i32>} : memref<16x128xf32, #tpu.memory_space<vmem>>, vector<16x128xf32>,
    %c1_i32 = arith.constant 1 : i32
    return
  }
  func.func @transform_0(%arg0: i32) -> (i32, i32) {
    %c0_i32 = arith.constant 0 : i32
    %c0_i32_0 = arith.constant 0 : i32
    return %arg0, %c0_i32 : i32, i32
  }
  func.func @transform_1(%arg0: i32) -> i32 {
    %c0_i32 = arith.constant 0 : i32
    %c0_i32_0 = arith.constant 0 : i32
    return %c0_i32 : i32
  }
  func.func @transform_2(%arg0: i32) -> i32 {
    %c0_i32 = arith.constant 0 : i32
    %c0_i32_0 = arith.constant 0 : i32
    return %c0_i32 : i32
  }
  func.func @transform_3(%arg0: i32) -> i32 {
    %c0_i32 = arith.constant 0 : i32
    %c0_i32_0 = arith.constant 0 : i32
    return %c0_i32 : i32
  }
  func.func @transform_4(%arg0: i32) -> i32 {
    %c0_i32 = arith.constant 0 : i32
    %c0_i32_0 = arith.constant 0 : i32
    return %c0_i32 : i32
  }
  func.func @transform_5(%arg0: i32) -> i32 {
    %c0_i32 = arith.constant 0 : i32
    %c0_i32_0 = arith.constant 0 : i32
    return %c0_i32 : i32
  }
  func.func @transform_6(%arg0: i32) -> i32 {
    %c0_i32 = arith.constant 0 : i32
    %c0_i32_0 = arith.constant 0 : i32
    return %c0_i32 : i32
  }
  func.func @transform_7(%arg0: i32) -> (i32, i32) {
    %c0_i32 = arith.constant 0 : i32
    %c0_i32_0 = arith.constant 0 : i32
    return %arg0, %c0_i32 : i32, i32
  }
}

</mosaic_0001>

<bundles_post_ra>
// kernel: tpu_custom_call.1
= control target key start
LH: loop header
LB: loop body
LE: loop exit
PB: predicated region body
PF: predicated region fallthrough
CT: control target
= control target key end

     0   :  { %13 = vsyncpa [#allocation4], 0  ;;  %s5661_s0 = inlined_call_operand.hbm [shape: f32[16,128], index: 0, kind: input, shape index: {}]   ;;  %s5662_s1 = inlined_call_operand.vmem [shape: f32[16], index: 1, kind: input, shape index: {}]   ;;  %s5663_s2 = inlined_call_operand.vmem [shape: f32[16], index: 2, kind: input, shape index: {}]   ;;  %s5664_s3 = inlined_call_operand.vmem [shape: f32[256], index: 3, kind: input, shape index: {}]   ;;  %s5665_s4 = inlined_call_operand.vmem [shape: f32[16], index: 4, kind: input, shape index: {}]   ;;  %s5666_s5 = inlined_call_operand.vmem [shape: f32[16], index: 5, kind: input, shape index: {}]   ;;  %s5667_s6 = inlined_call_operand.<no memory space> [shape: f32[1], index: 6, kind: input, shape index: {}]   ;;  %s5668_s7 = inlined_call_operand.hbm [shape: f32[16,128], index: 7, kind: output, shape index: {}]  }
   0x1   :  { %14 = vsyncpa [#allocation6], 0 }
   0x2   :  { %15 = vsyncpa [#allocation9], 0 }
   0x3   :  { %16 = vsyncpa [#allocation12], 0  ;;  %s46_s26 = sshll.u32 %s5663_s2, 4  ;;  %s47_s26 = int_to_ptr.vmem [resolvable:$true] %s46_s26 }
   0x4   :  { %17 = vsyncpa [#allocation5], 0  ;;  %s66_s29 = sshll.u32 %s5665_s4, 4  ;;  %s2311_s30 = scalar_lea.vmem %s47_s26, 16  ;;  %s67_s29 = int_to_ptr.vmem [resolvable:$true] %s66_s29 }
   0x5   :  { %p2312_p0 = scmp.ne.s32.totalorder %s47_s26, %s2311_s30  ;;  %p2316_p1 = scmp.lt.s32.totalorder %s47_s26, %s47_s26 }
   0x6   :  { %p2317_p2 = scmp.lt.s32.totalorder %s2311_s30, %s2311_s30 }
   0x8   :  { %p2318_p3 = por %p2317_p2, %p2316_p1 }
   0xa   :  { %p2319_p4 = pnand %p2318_p3, %p2312_p0 }
   0xc   :  { %2322 = shalt.err (!%p2319_p4)
}
   0xd   :  { %s2425_s8 = smov [#allocation8]   ;;  %s2323_s9 = scalar_lea.vmem %s67_s29, 16 }
   0xe   :  { %49 = dma.vmem_to_smem %s47_s26, 16, %s2425_s8, [#allocation9]  }
   0xf   :  { %p2324_p5 = scmp.ne.s32.totalorder %s67_s29, %s2323_s9  ;;  %p2328_p6 = scmp.lt.s32.totalorder %s67_s29, %s67_s29 }
  0x10   :  { %p2329_p7 = scmp.lt.s32.totalorder %s2323_s9, %s2323_s9 }
  0x12   :  { %p2330_p8 = por %p2329_p7, %p2328_p6 }
  0x14   :  { %p2331_p9 = pnand %p2330_p8, %p2324_p5 }
  0x16   :  { %2334 = shalt.err (!%p2331_p9)
}
  0x17   :  { %s2426_s2 = smov [#allocation11]   ;;  %s2427_s4 = smov [#allocation3]  }
  0x18   :  { %69 = dma.vmem_to_smem %s67_s29, 16, %s2426_s2, [#allocation12]  }
  0x19   :  { %s23_s10 = sshll.u32 %s2427_s4, 4  ;;  %s36_s13 = sshll.u32 %s5662_s1, 4  ;;  %s24_s10 = int_to_ptr.vmem [resolvable:$true] %s23_s10  ;;  %s37_s13 = int_to_ptr.vmem [resolvable:$true] %s36_s13 }
  0x1a   :  { %s2335_s16 = scalar_lea.hbm %s5661_s0, 256 }
  0x1b   :  { %p2336_p10 = scmp.ne.s32.totalorder %s5661_s0, %s2335_s16  ;;  %p2339_p11 = scmp.lt.u32.totalorder %s2335_s16, %s5661_s0 }
  0x1d   :  { %p2341_p12 = pnand %p2339_p11, %p2336_p10 }
  0x1f   :  { %2344 = shalt.err (!%p2341_p12)
}
  0x20   :  { %s2345_s21 = scalar_lea.vmem %s24_s10, 256  ;;  %p2350_p0 = scmp.lt.s32.totalorder %s24_s10, %s24_s10 }
  0x21   :  { %p2346_p13 = scmp.ne.s32.totalorder %s24_s10, %s2345_s21  ;;  %p2351_p1 = scmp.lt.s32.totalorder %s2345_s21, %s2345_s21 }
  0x23   :  { %p2352_p2 = por %p2351_p1, %p2350_p0 }
  0x25   :  { %p2353_p3 = pnand %p2352_p2, %p2346_p13 }
  0x27   :  { %2356 = shalt.err (!%p2353_p3)
}
  0x28   :  { %s2428_s1 = smov 128   ;;  %s2429_s22 = smov 8  }
  0x29   :  { %29 = dma.hbm_to_vmem [thread:$0]  %s5661_s0, 256, %s24_s10, [#allocation4], %s2428_s1, %s2428_s1, %s2429_s22  }
  0x2a   :  { %s2357_s25 = scalar_lea.vmem %s37_s13, 16  ;;  %p2362_p5 = scmp.lt.s32.totalorder %s37_s13, %s37_s13 }
  0x2b   :  { %p2358_p4 = scmp.ne.s32.totalorder %s37_s13, %s2357_s25  ;;  %p2363_p6 = scmp.lt.s32.totalorder %s2357_s25, %s2357_s25 }
  0x2d   :  { %p2364_p7 = por %p2363_p6, %p2362_p5 }
  0x2f   :  { %p2365_p8 = pnand %p2364_p7, %p2358_p4 }
  0x31   :  { %2368 = shalt.err (!%p2365_p8)
}
  0x32   :  { %s2430_s26 = smov [#allocation7]   ;;  %s56_s29 = sshll.u32 %s5664_s3, 4  ;;  %s57_s29 = int_to_ptr.vmem [resolvable:$true] %s56_s29 }
  0x33   :  { %39 = dma.vmem_to_smem %s37_s13, 16, %s2430_s26, [#allocation6]  }
  0x34   :  { %s76_s9 = sshll.u32 %s5666_s5, 4  ;;  %s2369_s0 = scalar_lea.vmem %s57_s29, 32  ;;  %s77_s9 = int_to_ptr.vmem [resolvable:$true] %s76_s9 }
  0x35   :  { %p2370_p9 = scmp.ne.s32.totalorder %s57_s29, %s2369_s0  ;;  %p2374_p10 = scmp.lt.s32.totalorder %s57_s29, %s57_s29 }
  0x36   :  { %p2375_p11 = scmp.lt.s32.totalorder %s2369_s0, %s2369_s0 }
  0x38   :  { %p2376_p12 = por %p2375_p11, %p2374_p10 }
  0x3a   :  { %p2377_p13 = pnand %p2376_p12, %p2370_p9 }
  0x3c   :  { %2380 = shalt.err (!%p2377_p13)
}
  0x3d   :  { %s2431_s2 = smov [#allocation10]   ;;  %s2381_s4 = scalar_lea.vmem %s77_s9, 16 }
  0x3e   :  { %59 = dma.vmem_to_smem %s57_s29, 32, %s2431_s2, [#allocation9]  }
  0x3f   :  { %p2382_p0 = scmp.ne.s32.totalorder %s77_s9, %s2381_s4  ;;  %p2386_p1 = scmp.lt.s32.totalorder %s77_s9, %s77_s9 }
  0x40   :  { %p2387_p2 = scmp.lt.s32.totalorder %s2381_s4, %s2381_s4 }
  0x42   :  { %p2388_p3 = por %p2387_p2, %p2386_p1 }
  0x44   :  { %p2389_p4 = pnand %p2388_p3, %p2382_p0 }
  0x46   :  { %2392 = shalt.err (!%p2389_p4)
}
  0x47   :  { %s2432_s3 = smov [#allocation13]  }
  0x48   :  { %79 = dma.vmem_to_smem %s77_s9, 16, %s2432_s3, [#allocation12]  }
  0x49   :  { %2415 = dma.done.wait [#allocation4], 256  }
  0x4a   :  { %2416 = vsyncadd [#allocation4], 4294967040 }
  0x4b   :  { %2417 = dma.done.wait [#allocation6], 16  }
  0x4c   :  { %2418 = vsyncadd [#allocation6], 4294967280 }
  0x4d   :  { %2419 = dma.done.wait [#allocation9], 48  }
  0x4e   :  { %2420 = vsyncadd [#allocation9], 4294967248 }
  0x4f   :  { %2421 = dma.done.wait [#allocation12], 32  }
  0x50   :  { %2422 = vsyncadd [#allocation12], 4294967264 }
  0x51   :  { %100 = sfence }
  0x52   :  { %s101_s5 = sld [smem:[#allocation7]]  ;;  %s1983_s10 = sld [smem:[#allocation7 + $0x1]]  ;;  %v422_v0 = vld [vmem:[#allocation3] sm:$0xff]  ;;  %v2510_v1 = vld [vmem:[#allocation3 + $0x8] sm:$0xff] }
  0x53   :  { %s1984_s11 = sld [smem:[#allocation7 + $0x2]]  ;;  %s1985_s12 = sld [smem:[#allocation7 + $0x3]] }
  0x54   :  { %s1986_s13 = sld [smem:[#allocation7 + $0x4]]  ;;  %s2504_s14 = sld [smem:[#allocation7 + $0x5]] }
  0x55   :  { %s2506_s15 = sld [smem:[#allocation7 + $0x6]]  ;;  %s2508_s16 = sld [smem:[#allocation7 + $0x7]] }
  0x56   :  { %s2512_s17 = sld [smem:[#allocation8]]  ;;  %s2514_s18 = sld [smem:[#allocation8 + $0x1]] }
  0x57   :  { %s2516_s19 = sld [smem:[#allocation8 + $0x2]]  ;;  %s2518_s20 = sld [smem:[#allocation8 + $0x3]] }
  0x58   :  { %v424_v2 = vstv %s101_s5  ;;  %v480_v3 = vstv %s1983_s10  ;;  %s2520_s21 = sld [smem:[#allocation8 + $0x4]]  ;;  %s2522_s23 = sld [smem:[#allocation8 + $0x5]] }
  0x59   :  { %v568_v4 = vstv %s1984_s11  ;;  %v656_v5 = vstv %s1985_s12  ;;  %v425_v7 = vmul.f32 %v424_v2, %v422_v0  ;;  %v426_v8 = vmul.f32 %v424_v2, %v2510_v1  ;;  %s2531_s24 = sld [smem:[#allocation8 + $0x6]]  ;;  %s2537_s25 = sld [smem:[#allocation8 + $0x7]] }
  0x5a   :  { %v744_v6 = vstv %s1986_s13  ;;  %v481_v9 = vmul.f32 %v480_v3, %v422_v0  ;;  %v832_v10 = vstv %s2504_s14  ;;  %v482_v11 = vmul.f32 %v480_v3, %v2510_v1  ;;  %s2546_s26 = sld [smem:[#allocation10]]  ;;  %s2548_s27 = sld [smem:[#allocation10 + $0x1]] }
  0x5b   :  { %v569_v12 = vmul.f32 %v568_v4, %v422_v0  ;;  %v920_v13 = vstv %s2506_s15  ;;  %v1008_v14 = vstv %s2508_s16  ;;  %v570_v15 = vmul.f32 %v568_v4, %v2510_v1  ;;  %s2554_s28 = sld [smem:[#allocation10 + $0x2]]  ;;  %s2556_s29 = sld [smem:[#allocation10 + $0x3]] }
  0x5c   :  { %v657_v16 = vmul.f32 %v656_v5, %v422_v0  ;;  %v658_v17 = vmul.f32 %v656_v5, %v2510_v1  ;;  %v745_v18 = vmul.f32 %v744_v6, %v422_v0  ;;  %v746_v19 = vmul.f32 %v744_v6, %v2510_v1  ;;  %s2562_s30 = sld [smem:[#allocation10 + $0x4]]  ;;  %s2564_s8 = sld [smem:[#allocation10 + $0x5]] }
  0x5d   :  { %v833_v20 = vmul.f32 %v832_v10, %v422_v0  ;;  %v834_v21 = vmul.f32 %v832_v10, %v2510_v1  ;;  %v2535_v22 = vmul.f32 %v920_v13, %v422_v0  ;;  %v427_v23 = vstv %s2512_s17  ;;  %s2570_s9 = sld [smem:[#allocation10 + $0x6]]  ;;  %s2572_s0 = sld [smem:[#allocation10 + $0x7]] }
  0x5e   :  { %v483_v24 = vstv %s2514_s18  ;;  %v2542_v25 = vmul.f32 %v920_v13, %v2510_v1  ;;  %v2544_v26 = vmul.f32 %v1008_v14, %v422_v0  ;;  %v428_v27 = vadd.f32 %v427_v23, %v425_v7  ;;  %s2578_s2 = sld [smem:[#allocation10 + $0x8]]  ;;  %s2580_s4 = sld [smem:[#allocation10 + $0x9]] }
  0x5f   :  { %v429_v28 = vadd.f32 %v427_v23, %v426_v8  ;;  %v484_v29 = vadd.f32 %v483_v24, %v481_v9  ;;  %v485_v30 = vadd.f32 %v483_v24, %v482_v11  ;;  %v571_v31 = vstv %s2516_s19  ;;  %s2586_s3 = sld [smem:[#allocation10 + $0xa]]  ;;  %s2588_s5 = sld [smem:[#allocation10 + $0xb]] }
  0x60   :  { %v659_v32 = vstv %s2518_s20  ;;  %v747_v33 = vstv %s2520_s21  ;;  %v835_v34 = vstv %s2522_s23  ;;  %v2558_v35 = vmax.f32 %v428_v27, 0.0  ;;  %s2598_s10 = sld [smem:[#allocation10 + $0xc]]  ;;  %s2600_s11 = sld [smem:[#allocation10 + $0xd]] }
  0x61   :  { %v2560_v36 = vmax.f32 %v429_v28, 0.0  ;;  %v572_v37 = vadd.f32 %v571_v31, %v569_v12  ;;  %v573_v38 = vadd.f32 %v571_v31, %v570_v15  ;;  %v2566_v39 = vmax.f32 %v484_v29, 0.0  ;;  %s2618_s12 = sld [smem:[#allocation10 + $0xe]]  ;;  %s2620_s13 = sld [smem:[#allocation10 + $0xf]] }
  0x62   :  { %v2568_v40 = vmax.f32 %v485_v30, 0.0  ;;  %v660_v41 = vadd.f32 %v659_v32, %v657_v16  ;;  %v661_v42 = vadd.f32 %v659_v32, %v658_v17  ;;  %v748_v45 = vadd.f32 %v747_v33, %v745_v18  ;;  %s2626_s14 = sld [smem:[#allocation10 + $0x10]]  ;;  %s2628_s15 = sld [smem:[#allocation10 + $0x11]] }
  0x63   :  { %v2574_v43 = vmax.f32 %v572_v37, 0.0  ;;  %v2576_v44 = vmax.f32 %v573_v38, 0.0  ;;  %v749_v46 = vadd.f32 %v747_v33, %v746_v19  ;;  %v836_v49 = vadd.f32 %v835_v34, %v833_v20  ;;  %s2654_s16 = sld [smem:[#allocation10 + $0x12]]  ;;  %s2656_s17 = sld [smem:[#allocation10 + $0x13]] }
  0x64   :  { %v2582_v47 = vmax.f32 %v660_v41, 0.0  ;;  %v2584_v48 = vmax.f32 %v661_v42, 0.0  ;;  %v837_v50 = vadd.f32 %v835_v34, %v834_v21  ;;  %v2590_v51 = vmax.f32 %v748_v45, 0.0  ;;  %s2662_s18 = sld [smem:[#allocation10 + $0x14]]  ;;  %s2664_s19 = sld [smem:[#allocation10 + $0x15]] }
  0x65   :  { %v2592_v52 = vmax.f32 %v749_v46, 0.0  ;;  %v923_v53 = vstv %s2531_s24  ;;  %v2596_v54 = vmul.f32 %v1008_v14, %v2510_v1  ;;  %v432_v55 = vstv %s2546_s26  ;;  %s2718_s20 = sld [smem:[#allocation10 + $0x16]]  ;;  %s2720_s21 = sld [smem:[#allocation10 + $0x17]] }
  0x66   :  { %v435_v56 = vstv %s2548_s27  ;;  %v2604_v57 = vmax.f32 %v836_v49, 0.0  ;;  %v1011_v58 = vstv %s2537_s25  ;;  %v2608_v59 = vmul.f32 %v432_v55, %v2558_v35  ;;  %s2726_s23 = sld [smem:[#allocation10 + $0x18]]  ;;  %s2728_s26 = sld [smem:[#allocation10 + $0x19]] }
  0x67   :  { %v2611_v60 = vmul.f32 %v432_v55, %v2560_v36  ;;  %v2614_v61 = vmul.f32 %v435_v56, %v2558_v35  ;;  %v2616_v62 = vmax.f32 %v837_v50, 0.0  ;;  %v438_v63 = vstv %s2554_s28  ;;  %s2762_s27 = sld [smem:[#allocation10 + $0x1a]]  ;;  %s2764_s28 = sld [smem:[#allocation10 + $0x1b]] }
  0x68   :  { %v441_v0 = vstv %s2556_s29  ;;  %v444_v1 = vstv %s2562_s30  ;;  %v447_v2 = vstv %s2564_s8  ;;  %v2631_v3 = vmul.f32 %v435_v56, %v2560_v36  ;;  %s2770_s29 = sld [smem:[#allocation10 + $0x1c]]  ;;  %s2772_s30 = sld [smem:[#allocation10 + $0x1d]] }
  0x69   :  { %v2634_v4 = vmul.f32 %v438_v63, %v2558_v35  ;;  %v2637_v5 = vmul.f32 %v438_v63, %v2560_v36  ;;  %v2640_v6 = vmul.f32 %v441_v0, %v2558_v35  ;;  %v2643_v7 = vmul.f32 %v441_v0, %v2560_v36  ;;  %s2806_s8 = sld [smem:[#allocation10 + $0x1e]]  ;;  %s3616_s24 = sld [smem:[#allocation10 + $0x68]] }
  0x6a   :  { %v2646_v8 = vmul.f32 %v444_v1, %v2558_v35  ;;  %v2649_v9 = vmul.f32 %v444_v1, %v2560_v36  ;;  %v2652_v10 = vmul.f32 %v447_v2, %v2558_v35  ;;  %v450_v11 = vstv %s2570_s9  ;;  %s2808_s9 = sld [smem:[#allocation10 + $0x1f]]  ;;  %s3802_s25 = sld [smem:[#allocation10 + $0x78]] }
  0x6b   :  { %v453_v12 = vstv %s2572_s0  ;;  %v456_v13 = vstv %s2578_s2  ;;  %v459_v14 = vstv %s2580_s4  ;;  %v2667_v15 = vmul.f32 %v447_v2, %v2560_v36  ;;  %s2814_s0 = sld [smem:[#allocation10 + $0x20]]  ;;  %s2816_s2 = sld [smem:[#allocation10 + $0x21]] }
  0x6c   :  { %v2670_v16 = vmul.f32 %v450_v11, %v2558_v35  ;;  %v2673_v17 = vmul.f32 %v450_v11, %v2560_v36  ;;  %v2676_v18 = vmul.f32 %v453_v12, %v2558_v35  ;;  %v2679_v19 = vmul.f32 %v453_v12, %v2560_v36  ;;  %s2850_s4 = sld [smem:[#allocation10 + $0x22]] }
  0x6d   :  { %v2682_v20 = vmul.f32 %v456_v13, %v2558_v35  ;;  %v2685_v21 = vmul.f32 %v456_v13, %v2560_v36  ;;  %v2688_v23 = vmul.f32 %v459_v14, %v2558_v35  ;;  %v462_v24 = vstv %s2586_s3  ;;  %s2852_s3 = sld [smem:[#allocation10 + $0x23]] }
  0x6e   :  { %v465_v27 = vstv %s2588_s5  ;;  %v468_v28 = vstv %s2598_s10  ;;  %v471_v29 = vstv %s2600_s11  ;;  %v2695_v30 = vmul.f32 %v459_v14, %v2560_v36  ;;  %s2858_s5 = sld [smem:[#allocation10 + $0x24]]  ;;  %s2860_s10 = sld [smem:[#allocation10 + $0x25]] }
  0x6f   :  { %v2698_v31 = vmul.f32 %v462_v24, %v2558_v35  ;;  %v2701_v32 = vmul.f32 %v462_v24, %v2560_v36  ;;  %v2704_v33 = vmul.f32 %v465_v27, %v2558_v35  ;;  %v2707_v34 = vmul.f32 %v465_v27, %v2560_v36  ;;  %s2894_s11 = sld [smem:[#allocation10 + $0x26]] }
  0x70   :  { %v2710_v37 = vmul.f32 %v468_v28, %v2558_v35  ;;  %v2713_v38 = vmul.f32 %v468_v28, %v2560_v36  ;;  %v2716_v41 = vmul.f32 %v471_v29, %v2558_v35  ;;  %v474_v42 = vstv %s2618_s12  ;;  %s2896_s12 = sld [smem:[#allocation10 + $0x27]] }
  0x71   :  { %v477_v45 = vstv %s2620_s13  ;;  %v488_v46 = vstv %s2626_s14  ;;  %v493_v49 = vstv %s2628_s15  ;;  %v2731_v50 = vmul.f32 %v471_v29, %v2560_v36  ;;  %s2902_s13 = sld [smem:[#allocation10 + $0x28]]  ;;  %s2904_s14 = sld [smem:[#allocation10 + $0x29]] }
  0x72   :  { %v2734_v55 = vmul.f32 %v474_v42, %v2558_v35  ;;  %v2737_v56 = vmul.f32 %v474_v42, %v2560_v36  ;;  %v2740_v63 = vmul.f32 %v477_v45, %v2558_v35  ;;  %v489_v0 = vmul.f32 %v488_v46, %v2566_v39  ;;  %s2938_s15 = sld [smem:[#allocation10 + $0x2a]] }
  0x73   :  { %v490_v1 = vmul.f32 %v488_v46, %v2568_v40  ;;  %v494_v2 = vmul.f32 %v493_v49, %v2566_v39  ;;  %v495_v11 = vmul.f32 %v493_v49, %v2568_v40  ;;  %v498_v12 = vstv %s2654_s16  ;;  %s2940_s16 = sld [smem:[#allocation10 + $0x2b]] }
  0x74   :  { %v503_v13 = vstv %s2656_s17  ;;  %v508_v14 = vstv %s2662_s18  ;;  %v513_v24 = vstv %s2664_s19  ;;  %v2751_v27 = vmul.f32 %v477_v45, %v2560_v36  ;;  %s2946_s17 = sld [smem:[#allocation10 + $0x2c]]  ;;  %s2948_s18 = sld [smem:[#allocation10 + $0x2d]] }
  0x75   :  { %v2754_v28 = vadd.f32 %v489_v0, %v2608_v59  ;;  %v2757_v35 = vadd.f32 %v490_v1, %v2611_v60  ;;  %v2760_v29 = vadd.f32 %v494_v2, %v2614_v61  ;;  %v499_v42 = vmul.f32 %v498_v12, %v2566_v39  ;;  %s2982_s19 = sld [smem:[#allocation10 + $0x2e]] }
  0x76   :  { %v500_v46 = vmul.f32 %v498_v12, %v2568_v40  ;;  %v504_v36 = vmul.f32 %v503_v13, %v2566_v39  ;;  %v505_v59 = vmul.f32 %v503_v13, %v2568_v40  ;;  %v2775_v60 = vadd.f32 %v495_v11, %v2631_v3 }
  0x77   :  { %v509_v61 = vmul.f32 %v508_v14, %v2566_v39  ;;  %v510_v45 = vmul.f32 %v508_v14, %v2568_v40  ;;  %v514_v49 = vmul.f32 %v513_v24, %v2566_v39  ;;  %v2781_v0 = vadd.f32 %v499_v42, %v2634_v4 }
  0x78   :  { %v2784_v1 = vadd.f32 %v500_v46, %v2637_v5  ;;  %v2787_v2 = vadd.f32 %v504_v36, %v2640_v6  ;;  %v515_v12 = vmul.f32 %v513_v24, %v2568_v40  ;;  %v2791_v3 = vadd.f32 %v505_v59, %v2643_v7 }
  0x79   :  { %v2794_v11 = vadd.f32 %v509_v61, %v2646_v8  ;;  %v2797_v13 = vadd.f32 %v510_v45, %v2649_v9  ;;  %v2800_v4 = vadd.f32 %v514_v49, %v2652_v10  ;;  %v518_v14 = vstv %s2718_s20  ;;  %s2984_s20 = sld [smem:[#allocation10 + $0x2f]] }
  0x7a   :  { %v523_v5 = vstv %s2720_s21  ;;  %v528_v42 = vstv %s2726_s23  ;;  %v533_v46 = vstv %s2728_s26  ;;  %v519_v6 = vmul.f32 %v518_v14, %v2566_v39  ;;  %s2990_s21 = sld [smem:[#allocation10 + $0x30]]  ;;  %s2992_s23 = sld [smem:[#allocation10 + $0x31]] }
  0x7b   :  { %v520_v7 = vmul.f32 %v518_v14, %v2568_v40  ;;  %v524_v8 = vmul.f32 %v523_v5, %v2566_v39  ;;  %v525_v9 = vmul.f32 %v523_v5, %v2568_v40  ;;  %v2819_v10 = vadd.f32 %v515_v12, %v2667_v15  ;;  %s3026_s26 = sld [smem:[#allocation10 + $0x32]] }
  0x7c   :  { %v529_v24 = vmul.f32 %v528_v42, %v2566_v39  ;;  %v530_v36 = vmul.f32 %v528_v42, %v2568_v40  ;;  %v534_v59 = vmul.f32 %v533_v46, %v2566_v39  ;;  %v2825_v61 = vadd.f32 %v519_v6, %v2670_v16 }
  0x7d   :  { %v2828_v45 = vadd.f32 %v520_v7, %v2673_v17  ;;  %v2831_v49 = vadd.f32 %v524_v8, %v2676_v18  ;;  %v535_v14 = vmul.f32 %v533_v46, %v2568_v40  ;;  %v2835_v15 = vadd.f32 %v525_v9, %v2679_v19 }
  0x7e   :  { %v2838_v12 = vadd.f32 %v529_v24, %v2682_v20  ;;  %v2841_v5 = vadd.f32 %v530_v36, %v2685_v21  ;;  %v2844_v16 = vadd.f32 %v534_v59, %v2688_v23  ;;  %v538_v42 = vstv %s2762_s27  ;;  %s3028_s27 = sld [smem:[#allocation10 + $0x33]] }
  0x7f   :  { %v543_v17 = vstv %s2764_s28  ;;  %v548_v6 = vstv %s2770_s29  ;;  %v553_v7 = vstv %s2772_s30  ;;  %v539_v18 = vmul.f32 %v538_v42, %v2566_v39  ;;  %s3034_s28 = sld [smem:[#allocation10 + $0x34]]  ;;  %s3036_s29 = sld [smem:[#allocation10 + $0x35]] }
  0x80   :  { %v540_v19 = vmul.f32 %v538_v42, %v2568_v40  ;;  %v544_v20 = vmul.f32 %v543_v17, %v2566_v39  ;;  %v545_v21 = vmul.f32 %v543_v17, %v2568_v40  ;;  %v2863_v23 = vadd.f32 %v535_v14, %v2695_v30  ;;  %s3070_s30 = sld [smem:[#allocation10 + $0x36]] }
  0x81   :  { %v549_v46 = vmul.f32 %v548_v6, %v2566_v39  ;;  %v550_v8 = vmul.f32 %v548_v6, %v2568_v40  ;;  %v554_v9 = vmul.f32 %v553_v7, %v2566_v39  ;;  %v2869_v24 = vadd.f32 %v539_v18, %v2698_v31 }
  0x82   :  { %v2872_v36 = vadd.f32 %v540_v19, %v2701_v32  ;;  %v2875_v59 = vadd.f32 %v544_v20, %v2704_v33  ;;  %v555_v42 = vmul.f32 %v553_v7, %v2568_v40  ;;  %v2879_v30 = vadd.f32 %v545_v21, %v2707_v34 }
  0x83   :  { %v2882_v14 = vadd.f32 %v549_v46, %v2710_v37  ;;  %v2885_v17 = vadd.f32 %v550_v8, %v2713_v38  ;;  %v2888_v31 = vadd.f32 %v554_v9, %v2716_v41  ;;  %v558_v6 = vstv %s2806_s8  ;;  %s3072_s8 = sld [smem:[#allocation10 + $0x37]] }
  0x84   :  { %v563_v32 = vstv %s2808_s9  ;;  %v576_v18 = vstv %s2814_s0  ;;  %v581_v19 = vstv %s2816_s2  ;;  %v559_v33 = vmul.f32 %v558_v6, %v2566_v39  ;;  %s3078_s9 = sld [smem:[#allocation10 + $0x38]]  ;;  %s3080_s0 = sld [smem:[#allocation10 + $0x39]] }
  0x85   :  { %v560_v34 = vmul.f32 %v558_v6, %v2568_v40  ;;  %v564_v37 = vmul.f32 %v563_v32, %v2566_v39  ;;  %v565_v38 = vmul.f32 %v563_v32, %v2568_v40  ;;  %v2907_v41 = vadd.f32 %v555_v42, %v2731_v50  ;;  %s3114_s2 = sld [smem:[#allocation10 + $0x3a]] }
  0x86   :  { %v577_v7 = vmul.f32 %v576_v18, %v2574_v43  ;;  %v578_v20 = vmul.f32 %v576_v18, %v2576_v44  ;;  %v582_v21 = vmul.f32 %v581_v19, %v2574_v43  ;;  %v2913_v39 = vadd.f32 %v559_v33, %v2734_v55 }
  0x87   :  { %v2916_v40 = vadd.f32 %v560_v34, %v2737_v56  ;;  %v2919_v46 = vadd.f32 %v564_v37, %v2740_v63  ;;  %v583_v8 = vmul.f32 %v581_v19, %v2576_v44  ;;  %v2923_v50 = vadd.f32 %v565_v38, %v2751_v27 }
  0x88   :  { %v2926_v9 = vadd.f32 %v577_v7, %v2754_v28  ;;  %v2929_v42 = vadd.f32 %v578_v20, %v2757_v35  ;;  %v2932_v55 = vadd.f32 %v582_v21, %v2760_v29  ;;  %v586_v6 = vstv %s2850_s4  ;;  %s3116_s4 = sld [smem:[#allocation10 + $0x3b]] }
  0x89   :  { %v591_v56 = vstv %s2852_s3  ;;  %v596_v32 = vstv %s2858_s5  ;;  %v601_v18 = vstv %s2860_s10  ;;  %v587_v63 = vmul.f32 %v586_v6, %v2574_v43  ;;  %s3122_s3 = sld [smem:[#allocation10 + $0x3c]]  ;;  %s3124_s5 = sld [smem:[#allocation10 + $0x3d]] }
  0x8a   :  { %v588_v27 = vmul.f32 %v586_v6, %v2576_v44  ;;  %v592_v28 = vmul.f32 %v591_v56, %v2574_v43  ;;  %v593_v35 = vmul.f32 %v591_v56, %v2576_v44  ;;  %v2951_v29 = vadd.f32 %v583_v8, %v2775_v60  ;;  %s3158_s10 = sld [smem:[#allocation10 + $0x3e]] }
  0x8b   :  { %v597_v19 = vmul.f32 %v596_v32, %v2574_v43  ;;  %v598_v33 = vmul.f32 %v596_v32, %v2576_v44  ;;  %v602_v34 = vmul.f32 %v601_v18, %v2574_v43  ;;  %v2957_v37 = vadd.f32 %v587_v63, %v2781_v0 }
  0x8c   :  { %v2960_v38 = vadd.f32 %v588_v27, %v2784_v1  ;;  %v2963_v7 = vadd.f32 %v592_v28, %v2787_v2  ;;  %v603_v20 = vmul.f32 %v601_v18, %v2576_v44  ;;  %v2967_v60 = vadd.f32 %v593_v35, %v2791_v3 }
  0x8d   :  { %v2970_v21 = vadd.f32 %v597_v19, %v2794_v11  ;;  %v2973_v8 = vadd.f32 %v598_v33, %v2797_v13  ;;  %v2976_v0 = vadd.f32 %v602_v34, %v2800_v4  ;;  %v606_v6 = vstv %s2894_s11  ;;  %s3160_s11 = sld [smem:[#allocation10 + $0x3f]] }
  0x8e   :  { %v611_v1 = vstv %s2896_s12  ;;  %v616_v56 = vstv %s2902_s13  ;;  %v621_v32 = vstv %s2904_s14  ;;  %v607_v2 = vmul.f32 %v606_v6, %v2574_v43  ;;  %s3166_s12 = sld [smem:[#allocation10 + $0x40]]  ;;  %s3168_s13 = sld [smem:[#allocation10 + $0x41]] }
  0x8f   :  { %v608_v3 = vmul.f32 %v606_v6, %v2576_v44  ;;  %v612_v11 = vmul.f32 %v611_v1, %v2574_v43  ;;  %v613_v13 = vmul.f32 %v611_v1, %v2576_v44  ;;  %v2995_v4 = vadd.f32 %v603_v20, %v2819_v10  ;;  %s3202_s14 = sld [smem:[#allocation10 + $0x42]] }
  0x90   :  { %v617_v18 = vmul.f32 %v616_v56, %v2574_v43  ;;  %v618_v63 = vmul.f32 %v616_v56, %v2576_v44  ;;  %v622_v27 = vmul.f32 %v621_v32, %v2574_v43  ;;  %v3001_v28 = vadd.f32 %v607_v2, %v2825_v61 }
  0x91   :  { %v3004_v35 = vadd.f32 %v608_v3, %v2828_v45  ;;  %v3007_v19 = vadd.f32 %v612_v11, %v2831_v49  ;;  %v623_v33 = vmul.f32 %v621_v32, %v2576_v44  ;;  %v3011_v10 = vadd.f32 %v613_v13, %v2835_v15 }
  0x92   :  { %v3014_v34 = vadd.f32 %v617_v18, %v2838_v12  ;;  %v3017_v20 = vadd.f32 %v618_v63, %v2841_v5  ;;  %v3020_v61 = vadd.f32 %v622_v27, %v2844_v16  ;;  %v626_v6 = vstv %s2938_s15  ;;  %s3204_s15 = sld [smem:[#allocation10 + $0x43]] }
  0x93   :  { %v631_v45 = vstv %s2940_s16  ;;  %v636_v1 = vstv %s2946_s17  ;;  %v641_v56 = vstv %s2948_s18  ;;  %v627_v49 = vmul.f32 %v626_v6, %v2574_v43  ;;  %s3210_s16 = sld [smem:[#allocation10 + $0x44]]  ;;  %s3212_s17 = sld [smem:[#allocation10 + $0x45]] }
  0x94   :  { %v628_v15 = vmul.f32 %v626_v6, %v2576_v44  ;;  %v632_v12 = vmul.f32 %v631_v45, %v2574_v43  ;;  %v633_v5 = vmul.f32 %v631_v45, %v2576_v44  ;;  %v3039_v16 = vadd.f32 %v623_v33, %v2863_v23  ;;  %s3246_s18 = sld [smem:[#allocation10 + $0x46]] }
  0x95   :  { %v637_v32 = vmul.f32 %v636_v1, %v2574_v43  ;;  %v638_v2 = vmul.f32 %v636_v1, %v2576_v44  ;;  %v642_v3 = vmul.f32 %v641_v56, %v2574_v43  ;;  %v3045_v11 = vadd.f32 %v627_v49, %v2869_v24 }
  0x96   :  { %v3048_v13 = vadd.f32 %v628_v15, %v2872_v36  ;;  %v3051_v18 = vadd.f32 %v632_v12, %v2875_v59  ;;  %v643_v63 = vmul.f32 %v641_v56, %v2576_v44  ;;  %v3055_v23 = vadd.f32 %v633_v5, %v2879_v30 }
  0x97   :  { %v3058_v27 = vadd.f32 %v637_v32, %v2882_v14  ;;  %v3061_v33 = vadd.f32 %v638_v2, %v2885_v17  ;;  %v3064_v24 = vadd.f32 %v642_v3, %v2888_v31  ;;  %v646_v6 = vstv %s2982_s19  ;;  %s3248_s19 = sld [smem:[#allocation10 + $0x47]] }
  0x98   :  { %v651_v36 = vstv %s2984_s20  ;;  %v664_v45 = vstv %s2990_s21  ;;  %v669_v1 = vstv %s2992_s23  ;;  %v647_v59 = vmul.f32 %v646_v6, %v2574_v43  ;;  %s3254_s20 = sld [smem:[#allocation10 + $0x48]]  ;;  %s3256_s21 = sld [smem:[#allocation10 + $0x49]] }
  0x99   :  { %v648_v30 = vmul.f32 %v646_v6, %v2576_v44  ;;  %v652_v14 = vmul.f32 %v651_v36, %v2574_v43  ;;  %v653_v17 = vmul.f32 %v651_v36, %v2576_v44  ;;  %v3083_v31 = vadd.f32 %v643_v63, %v2907_v41  ;;  %s3290_s23 = sld [smem:[#allocation10 + $0x4a]] }
  0x9a   :  { %v665_v56 = vmul.f32 %v664_v45, %v2582_v47  ;;  %v666_v49 = vmul.f32 %v664_v45, %v2584_v48  ;;  %v670_v15 = vmul.f32 %v669_v1, %v2582_v47  ;;  %v3089_v43 = vadd.f32 %v647_v59, %v2913_v39 }
  0x9b   :  { %v3092_v44 = vadd.f32 %v648_v30, %v2916_v40  ;;  %v3095_v12 = vadd.f32 %v652_v14, %v2919_v46  ;;  %v671_v5 = vmul.f32 %v669_v1, %v2584_v48  ;;  %v3099_v41 = vadd.f32 %v653_v17, %v2923_v50 }
  0x9c   :  { %v3102_v32 = vadd.f32 %v665_v56, %v2926_v9  ;;  %v3105_v2 = vadd.f32 %v666_v49, %v2929_v42  ;;  %v3108_v39 = vadd.f32 %v670_v15, %v2932_v55  ;;  %v674_v3 = vstv %s3026_s26  ;;  %s3292_s26 = sld [smem:[#allocation10 + $0x4b]] }
  0x9d   :  { %v679_v40 = vstv %s3028_s27  ;;  %v684_v63 = vstv %s3034_s28  ;;  %v689_v6 = vstv %s3036_s29  ;;  %v675_v46 = vmul.f32 %v674_v3, %v2582_v47  ;;  %s3298_s27 = sld [smem:[#allocation10 + $0x4c]]  ;;  %s3300_s28 = sld [smem:[#allocation10 + $0x4d]] }
  0x9e   :  { %v676_v50 = vmul.f32 %v674_v3, %v2584_v48  ;;  %v680_v9 = vmul.f32 %v679_v40, %v2582_v47  ;;  %v681_v42 = vmul.f32 %v679_v40, %v2584_v48  ;;  %v3127_v55 = vadd.f32 %v671_v5, %v2951_v29  ;;  %s3334_s29 = sld [smem:[#allocation10 + $0x4e]] }
  0x9f   :  { %v685_v36 = vmul.f32 %v684_v63, %v2582_v47  ;;  %v686_v45 = vmul.f32 %v684_v63, %v2584_v48  ;;  %v690_v1 = vmul.f32 %v689_v6, %v2582_v47  ;;  %v3133_v59 = vadd.f32 %v675_v46, %v2957_v37 }
  0xa0   :  { %v3136_v30 = vadd.f32 %v676_v50, %v2960_v38  ;;  %v3139_v14 = vadd.f32 %v680_v9, %v2963_v7  ;;  %v691_v17 = vmul.f32 %v689_v6, %v2584_v48  ;;  %v3143_v29 = vadd.f32 %v681_v42, %v2967_v60 }
  0xa1   :  { %v3146_v56 = vadd.f32 %v685_v36, %v2970_v21  ;;  %v3149_v49 = vadd.f32 %v686_v45, %v2973_v8  ;;  %v3152_v37 = vadd.f32 %v690_v1, %v2976_v0  ;;  %v694_v15 = vstv %s3070_s30  ;;  %s3336_s30 = sld [smem:[#allocation10 + $0x4f]] }
  0xa2   :  { %v699_v38 = vstv %s3072_s8  ;;  %v704_v5 = vstv %s3078_s9  ;;  %v709_v3 = vstv %s3080_s0  ;;  %v695_v7 = vmul.f32 %v694_v15, %v2582_v47  ;;  %s3342_s8 = sld [smem:[#allocation10 + $0x50]]  ;;  %s3344_s9 = sld [smem:[#allocation10 + $0x51]] }
  0xa3   :  { %v696_v60 = vmul.f32 %v694_v15, %v2584_v48  ;;  %v700_v21 = vmul.f32 %v699_v38, %v2582_v47  ;;  %v701_v8 = vmul.f32 %v699_v38, %v2584_v48  ;;  %v3171_v0 = vadd.f32 %v691_v17, %v2995_v4  ;;  %s3378_s0 = sld [smem:[#allocation10 + $0x52]] }
  0xa4   :  { %v705_v40 = vmul.f32 %v704_v5, %v2582_v47  ;;  %v706_v63 = vmul.f32 %v704_v5, %v2584_v48  ;;  %v710_v6 = vmul.f32 %v709_v3, %v2582_v47  ;;  %v3177_v46 = vadd.f32 %v695_v7, %v3001_v28 }
  0xa5   :  { %v3180_v50 = vadd.f32 %v696_v60, %v3004_v35  ;;  %v3183_v9 = vadd.f32 %v700_v21, %v3007_v19  ;;  %v711_v42 = vmul.f32 %v709_v3, %v2584_v48  ;;  %v3187_v4 = vadd.f32 %v701_v8, %v3011_v10 }
  0xa6   :  { %v3190_v36 = vadd.f32 %v705_v40, %v3014_v34  ;;  %v3193_v45 = vadd.f32 %v706_v63, %v3017_v20  ;;  %v3196_v28 = vadd.f32 %v710_v6, %v3020_v61  ;;  %v714_v1 = vstv %s3114_s2  ;;  %s3380_s2 = sld [smem:[#allocation10 + $0x53]] }
  0xa7   :  { %v719_v35 = vstv %s3116_s4  ;;  %v724_v17 = vstv %s3122_s3  ;;  %v729_v15 = vstv %s3124_s5  ;;  %v715_v19 = vmul.f32 %v714_v1, %v2582_v47  ;;  %s3386_s4 = sld [smem:[#allocation10 + $0x54]]  ;;  %s3388_s3 = sld [smem:[#allocation10 + $0x55]] }
  0xa8   :  { %v716_v10 = vmul.f32 %v714_v1, %v2584_v48  ;;  %v720_v34 = vmul.f32 %v719_v35, %v2582_v47  ;;  %v721_v20 = vmul.f32 %v719_v35, %v2584_v48  ;;  %v3215_v61 = vadd.f32 %v711_v42, %v3039_v16  ;;  %s3422_s5 = sld [smem:[#allocation10 + $0x56]] }
  0xa9   :  { %v725_v38 = vmul.f32 %v724_v17, %v2582_v47  ;;  %v726_v5 = vmul.f32 %v724_v17, %v2584_v48  ;;  %v730_v3 = vmul.f32 %v729_v15, %v2582_v47  ;;  %v3221_v7 = vadd.f32 %v715_v19, %v3045_v11 }
  0xaa   :  { %v3224_v60 = vadd.f32 %v716_v10, %v3048_v13  ;;  %v3227_v21 = vadd.f32 %v720_v34, %v3051_v18  ;;  %v731_v8 = vmul.f32 %v729_v15, %v2584_v48  ;;  %v3231_v16 = vadd.f32 %v721_v20, %v3055_v23 }
  0xab   :  { %v3234_v40 = vadd.f32 %v725_v38, %v3058_v27  ;;  %v3237_v63 = vadd.f32 %v726_v5, %v3061_v33  ;;  %v3240_v11 = vadd.f32 %v730_v3, %v3064_v24  ;;  %v734_v6 = vstv %s3158_s10  ;;  %s3424_s10 = sld [smem:[#allocation10 + $0x57]] }
  0xac   :  { %v739_v13 = vstv %s3160_s11  ;;  %v752_v42 = vstv %s3166_s12  ;;  %v757_v1 = vstv %s3168_s13  ;;  %v735_v18 = vmul.f32 %v734_v6, %v2582_v47  ;;  %s3430_s11 = sld [smem:[#allocation10 + $0x58]]  ;;  %s3432_s12 = sld [smem:[#allocation10 + $0x59]] }
  0xad   :  { %v736_v23 = vmul.f32 %v734_v6, %v2584_v48  ;;  %v740_v27 = vmul.f32 %v739_v13, %v2582_v47  ;;  %v741_v33 = vmul.f32 %v739_v13, %v2584_v48  ;;  %v3259_v24 = vadd.f32 %v731_v8, %v3083_v31  ;;  %s3466_s13 = sld [smem:[#allocation10 + $0x5a]] }
  0xae   :  { %v753_v35 = vmul.f32 %v752_v42, %v2590_v51  ;;  %v754_v17 = vmul.f32 %v752_v42, %v2592_v52  ;;  %v758_v15 = vmul.f32 %v757_v1, %v2590_v51  ;;  %v3265_v47 = vadd.f32 %v735_v18, %v3089_v43 }
  0xaf   :  { %v3268_v48 = vadd.f32 %v736_v23, %v3092_v44  ;;  %v3271_v19 = vadd.f32 %v740_v27, %v3095_v12  ;;  %v759_v10 = vmul.f32 %v757_v1, %v2592_v52  ;;  %v3275_v31 = vadd.f32 %v741_v33, %v3099_v41 }
  0xb0   :  { %v3278_v34 = vadd.f32 %v753_v35, %v3102_v32  ;;  %v3281_v20 = vadd.f32 %v754_v17, %v3105_v2  ;;  %v3284_v43 = vadd.f32 %v758_v15, %v3108_v39  ;;  %v762_v38 = vstv %s3202_s14  ;;  %s3468_s14 = sld [smem:[#allocation10 + $0x5b]] }
  0xb1   :  { %v767_v44 = vstv %s3204_s15  ;;  %v772_v5 = vstv %s3210_s16  ;;  %v777_v3 = vstv %s3212_s17  ;;  %v763_v12 = vmul.f32 %v762_v38, %v2590_v51  ;;  %s3474_s15 = sld [smem:[#allocation10 + $0x5c]]  ;;  %s3476_s16 = sld [smem:[#allocation10 + $0x5d]] }
  0xb2   :  { %v764_v41 = vmul.f32 %v762_v38, %v2592_v52  ;;  %v768_v32 = vmul.f32 %v767_v44, %v2590_v51  ;;  %v769_v2 = vmul.f32 %v767_v44, %v2592_v52  ;;  %v3303_v39 = vadd.f32 %v759_v10, %v3127_v55  ;;  %s3514_s17 = sld [smem:[#allocation10 + $0x5e]] }
  0xb3   :  { %v773_v8 = vmul.f32 %v772_v5, %v2590_v51  ;;  %v774_v6 = vmul.f32 %v772_v5, %v2592_v52  ;;  %v778_v13 = vmul.f32 %v777_v3, %v2590_v51  ;;  %v3309_v42 = vadd.f32 %v763_v12, %v3133_v59 }
  0xb4   :  { %v3312_v1 = vadd.f32 %v764_v41, %v3136_v30  ;;  %v3315_v18 = vadd.f32 %v768_v32, %v3139_v14  ;;  %v779_v23 = vmul.f32 %v777_v3, %v2592_v52  ;;  %v3319_v55 = vadd.f32 %v769_v2, %v3143_v29 }
  0xb5   :  { %v3322_v27 = vadd.f32 %v773_v8, %v3146_v56  ;;  %v3325_v33 = vadd.f32 %v774_v6, %v3149_v49  ;;  %v3328_v59 = vadd.f32 %v778_v13, %v3152_v37  ;;  %v782_v35 = vstv %s3246_s18  ;;  %s3516_s18 = sld [smem:[#allocation10 + $0x5f]] }
  0xb6   :  { %v787_v30 = vstv %s3248_s19  ;;  %v792_v17 = vstv %s3254_s20  ;;  %v797_v15 = vstv %s3256_s21  ;;  %v783_v14 = vmul.f32 %v782_v35, %v2590_v51  ;;  %s3534_s19 = sld [smem:[#allocation10 + $0x60]]  ;;  %s3536_s20 = sld [smem:[#allocation10 + $0x61]] }
  0xb7   :  { %v784_v29 = vmul.f32 %v782_v35, %v2592_v52  ;;  %v788_v56 = vmul.f32 %v787_v30, %v2590_v51  ;;  %v789_v49 = vmul.f32 %v787_v30, %v2592_v52  ;;  %v3347_v37 = vadd.f32 %v779_v23, %v3171_v0  ;;  %s3554_s21 = sld [smem:[#allocation10 + $0x62]] }
  0xb8   :  { %v793_v10 = vmul.f32 %v792_v17, %v2590_v51  ;;  %v794_v38 = vmul.f32 %v792_v17, %v2592_v52  ;;  %v798_v44 = vmul.f32 %v797_v15, %v2590_v51  ;;  %v3353_v5 = vadd.f32 %v783_v14, %v3177_v46 }
  0xb9   :  { %v3356_v3 = vadd.f32 %v784_v29, %v3180_v50  ;;  %v3359_v12 = vadd.f32 %v788_v56, %v3183_v9  ;;  %v799_v41 = vmul.f32 %v797_v15, %v2592_v52  ;;  %v3363_v0 = vadd.f32 %v789_v49, %v3187_v4 }
  0xba   :  { %v3366_v32 = vadd.f32 %v793_v10, %v3190_v36  ;;  %v3369_v2 = vadd.f32 %v794_v38, %v3193_v45  ;;  %v3372_v46 = vadd.f32 %v798_v44, %v3196_v28  ;;  %v802_v8 = vstv %s3290_s23  ;;  %s3556_s23 = sld [smem:[#allocation10 + $0x63]] }
  0xbb   :  { %v807_v50 = vstv %s3292_s26  ;;  %v812_v6 = vstv %s3298_s27  ;;  %v817_v13 = vstv %s3300_s28  ;;  %v803_v9 = vmul.f32 %v802_v8, %v2590_v51  ;;  %s3562_s26 = sld [smem:[#allocation10 + $0x64]]  ;;  %s3564_s27 = sld [smem:[#allocation10 + $0x65]] }
  0xbc   :  { %v804_v4 = vmul.f32 %v802_v8, %v2592_v52  ;;  %v808_v36 = vmul.f32 %v807_v50, %v2590_v51  ;;  %v809_v45 = vmul.f32 %v807_v50, %v2592_v52  ;;  %v3391_v28 = vadd.f32 %v799_v41, %v3215_v61  ;;  %s3606_s28 = sld [smem:[#allocation10 + $0x66]] }
  0xbd   :  { %v813_v23 = vmul.f32 %v812_v6, %v2590_v51  ;;  %v814_v35 = vmul.f32 %v812_v6, %v2592_v52  ;;  %v818_v30 = vmul.f32 %v817_v13, %v2590_v51  ;;  %v3397_v17 = vadd.f32 %v803_v9, %v3221_v7 }
  0xbe   :  { %v3400_v15 = vadd.f32 %v804_v4, %v3224_v60  ;;  %v3403_v14 = vadd.f32 %v808_v36, %v3227_v21  ;;  %v819_v29 = vmul.f32 %v817_v13, %v2592_v52  ;;  %v3407_v61 = vadd.f32 %v809_v45, %v3231_v16 }
  0xbf   :  { %v3410_v56 = vadd.f32 %v813_v23, %v3234_v40  ;;  %v3413_v49 = vadd.f32 %v814_v35, %v3237_v63  ;;  %v3416_v7 = vadd.f32 %v818_v30, %v3240_v11  ;;  %v822_v10 = vstv %s3334_s29  ;;  %s3608_s29 = sld [smem:[#allocation10 + $0x67]] }
  0xc0   :  { %v827_v60 = vstv %s3336_s30  ;;  %v840_v38 = vstv %s3342_s8  ;;  %v845_v44 = vstv %s3344_s9  ;;  %v823_v21 = vmul.f32 %v822_v10, %v2590_v51  ;;  %s3618_s30 = sld [smem:[#allocation10 + $0x69]]  ;;  %s3652_s8 = sld [smem:[#allocation10 + $0x6a]] }
  0xc1   :  { %v824_v16 = vmul.f32 %v822_v10, %v2592_v52  ;;  %v828_v40 = vmul.f32 %v827_v60, %v2590_v51  ;;  %v829_v63 = vmul.f32 %v827_v60, %v2592_v52  ;;  %v3435_v11 = vadd.f32 %v819_v29, %v3259_v24  ;;  %s3654_s9 = sld [smem:[#allocation10 + $0x6b]] }
  0xc2   :  { %v841_v41 = vmul.f32 %v840_v38, %v2604_v57  ;;  %v842_v8 = vmul.f32 %v840_v38, %v2616_v62  ;;  %v846_v50 = vmul.f32 %v845_v44, %v2604_v57  ;;  %v3441_v51 = vadd.f32 %v823_v21, %v3265_v47 }
  0xc3   :  { %v3444_v52 = vadd.f32 %v824_v16, %v3268_v48  ;;  %v3447_v6 = vadd.f32 %v828_v40, %v3271_v19  ;;  %v847_v13 = vmul.f32 %v845_v44, %v2616_v62  ;;  %v3451_v24 = vadd.f32 %v829_v63, %v3275_v31 }
  0xc4   :  { %v3454_v9 = vadd.f32 %v841_v41, %v3278_v34  ;;  %v3457_v4 = vadd.f32 %v842_v8, %v3281_v20  ;;  %v3460_v47 = vadd.f32 %v846_v50, %v3284_v43  ;;  %v850_v36 = vstv %s3378_s0  ;;  %s3660_s0 = sld [smem:[#allocation10 + $0x6c]] }
  0xc5   :  { %v855_v48 = vstv %s3380_s2  ;;  %v860_v45 = vstv %s3386_s4  ;;  %v865_v23 = vstv %s3388_s3  ;;  %v851_v19 = vmul.f32 %v850_v36, %v2604_v57  ;;  %s3662_s2 = sld [smem:[#allocation10 + $0x6d]]  ;;  %s3700_s4 = sld [smem:[#allocation10 + $0x6e]] }
  0xc6   :  { %v852_v31 = vmul.f32 %v850_v36, %v2616_v62  ;;  %v856_v34 = vmul.f32 %v855_v48, %v2604_v57  ;;  %v857_v20 = vmul.f32 %v855_v48, %v2616_v62  ;;  %v3479_v43 = vadd.f32 %v847_v13, %v3303_v39  ;;  %s3702_s3 = sld [smem:[#allocation10 + $0x6f]] }
  0xc7   :  { %v861_v35 = vmul.f32 %v860_v45, %v2604_v57  ;;  %v862_v30 = vmul.f32 %v860_v45, %v2616_v62  ;;  %v866_v29 = vmul.f32 %v865_v23, %v2604_v57  ;;  %v3485_v10 = vadd.f32 %v851_v19, %v3309_v42 }
  0xc8   :  { %v3488_v60 = vadd.f32 %v852_v31, %v3312_v1  ;;  %v3491_v38 = vadd.f32 %v856_v34, %v3315_v18  ;;  %v867_v44 = vmul.f32 %v865_v23, %v2616_v62  ;;  %v3495_v39 = vadd.f32 %v857_v20, %v3319_v55 }
  0xc9   :  { %v3498_v21 = vadd.f32 %v861_v35, %v3322_v27  ;;  %v3501_v16 = vadd.f32 %v862_v30, %v3325_v33  ;;  %v3504_v42 = vadd.f32 %v866_v29, %v3328_v59  ;;  %v870_v40 = vstv %s3422_s5  ;;  %s3720_s5 = sld [smem:[#allocation10 + $0x70]] }
  0xca   :  { %v875_v1 = vstv %s3424_s10  ;;  %v880_v63 = vstv %s3430_s11  ;;  %v885_v41 = vstv %s3432_s12  ;;  %v871_v18 = vmul.f32 %v870_v40, %v2604_v57  ;;  %s3722_s10 = sld [smem:[#allocation10 + $0x71]]  ;;  %s3740_s11 = sld [smem:[#allocation10 + $0x72]] }
  0xcb   :  { %v872_v8 = vmul.f32 %v870_v40, %v2616_v62  ;;  %v876_v55 = vmul.f32 %v875_v1, %v2604_v57  ;;  %v877_v50 = vmul.f32 %v875_v1, %v2616_v62  ;;  %v3519_v27 = vadd.f32 %v867_v44, %v3347_v37  ;;  %s3742_s12 = sld [smem:[#allocation10 + $0x73]] }
  0xcc   :  { %v881_v33 = vmul.f32 %v880_v63, %v2604_v57  ;;  %v882_v59 = vmul.f32 %v880_v63, %v2616_v62  ;;  %v886_v13 = vmul.f32 %v885_v41, %v2604_v57  ;;  %v3525_v36 = vadd.f32 %v871_v18, %v3353_v5 }
  0xcd   :  { %v3528_v48 = vadd.f32 %v872_v8, %v3356_v3  ;;  %v3531_v45 = vadd.f32 %v876_v55, %v3359_v12  ;;  %v887_v37 = vmul.f32 %v885_v41, %v2616_v62  ;;  %v3539_v23 = vadd.f32 %v877_v50, %v3363_v0 }
  0xce   :  { %v3542_v19 = vadd.f32 %v881_v33, %v3366_v32  ;;  %v3545_v5 = vadd.f32 %v882_v59, %v3369_v2  ;;  %v3548_v3 = vadd.f32 %v886_v13, %v3372_v46  ;;  %v890_v12 = vstv %s3466_s13  ;;  %s3748_s13 = sld [smem:[#allocation10 + $0x74]] }
  0xcf   :  { %v895_v31 = vstv %s3468_s14  ;;  %v900_v34 = vstv %s3474_s15  ;;  %v905_v20 = vstv %s3476_s16  ;;  %v891_v0 = vmul.f32 %v890_v12, %v2604_v57  ;;  %s3750_s14 = sld [smem:[#allocation10 + $0x75]]  ;;  %s3792_s15 = sld [smem:[#allocation10 + $0x76]] }
  0xd0   :  { %v892_v35 = vmul.f32 %v890_v12, %v2616_v62  ;;  %v896_v32 = vmul.f32 %v895_v31, %v2604_v57  ;;  %v897_v2 = vmul.f32 %v895_v31, %v2616_v62  ;;  %v3567_v46 = vadd.f32 %v887_v37, %v3391_v28  ;;  %s3794_s16 = sld [smem:[#allocation10 + $0x77]] }
  0xd1   :  { %v901_v30 = vmul.f32 %v900_v34, %v2604_v57  ;;  %v902_v29 = vmul.f32 %v900_v34, %v2616_v62  ;;  %v906_v44 = vmul.f32 %v905_v20, %v2604_v57  ;;  %v3573_v40 = vadd.f32 %v891_v0, %v3397_v17 }
  0xd2   :  { %v3576_v1 = vadd.f32 %v892_v35, %v3400_v15  ;;  %v3579_v63 = vadd.f32 %v896_v32, %v3403_v14  ;;  %v907_v41 = vmul.f32 %v905_v20, %v2616_v62  ;;  %v3583_v28 = vadd.f32 %v897_v2, %v3407_v61 }
  0xd3   :  { %v3586_v18 = vadd.f32 %v901_v30, %v3410_v56  ;;  %v3589_v8 = vadd.f32 %v902_v29, %v3413_v49  ;;  %v3592_v17 = vadd.f32 %v906_v44, %v3416_v7  ;;  %v910_v15 = vstv %s3514_s17  ;;  %s3804_s17 = sld [smem:[#allocation10 + $0x79]] }
  0xd4   :  { %v915_v55 = vstv %s3516_s18  ;;  %v924_v14 = vadd.f32 %v923_v53, %v2535_v22  ;;  %v925_v61 = vadd.f32 %v923_v53, %v2542_v25  ;;  %v911_v50 = vmul.f32 %v910_v15, %v2604_v57  ;;  %s3838_s18 = sld [smem:[#allocation10 + $0x7a]] }
  0xd5   :  { %v912_v56 = vmul.f32 %v910_v15, %v2616_v62  ;;  %v916_v33 = vmul.f32 %v915_v55, %v2604_v57  ;;  %v917_v49 = vmul.f32 %v915_v55, %v2616_v62  ;;  %v928_v25 = vstv %s3534_s19  ;;  %s3840_s19 = sld [smem:[#allocation10 + $0x7b]] }
  0xd6   :  { %v3610_v7 = vmax.f32 %v924_v14, 0.0  ;;  %v3612_v22 = vmax.f32 %v925_v61, 0.0  ;;  %v933_v53 = vstv %s3536_s20  ;;  %v3621_v57 = vadd.f32 %v907_v41, %v3435_v11  ;;  %s3846_s20 = sld [smem:[#allocation10 + $0x7c]] }
  0xd7   :  { %v3624_v62 = vadd.f32 %v911_v50, %v3441_v51  ;;  %v3627_v59 = vadd.f32 %v912_v56, %v3444_v52  ;;  %v3630_v13 = vadd.f32 %v916_v33, %v3447_v6  ;;  %v938_v20 = vstv %s3554_s21  ;;  %s3848_s21 = sld [smem:[#allocation10 + $0x7d]] }
  0xd8   :  { %v929_v37 = vmul.f32 %v928_v25, %v3610_v7  ;;  %v930_v12 = vmul.f32 %v928_v25, %v3612_v22  ;;  %v934_v31 = vmul.f32 %v933_v53, %v3610_v7  ;;  %v935_v34 = vmul.f32 %v933_v53, %v3612_v22 }
  0xd9   :  { %v943_v11 = vstv %s3556_s23  ;;  %v948_v0 = vstv %s3562_s26  ;;  %v953_v35 = vstv %s3564_s27  ;;  %v3641_v51 = vadd.f32 %v917_v49, %v3451_v24  ;;  %s3882_s23 = sld [smem:[#allocation7 + $0x8]]  ;;  %s3890_s27 = sld [smem:[#allocation10 + $0x7e]] }
  0xda   :  { %v3644_v52 = vadd.f32 %v929_v37, %v3454_v9  ;;  %v3647_v6 = vadd.f32 %v930_v12, %v3457_v4  ;;  %v3650_v32 = vadd.f32 %v934_v31, %v3460_v47  ;;  %v939_v2 = vmul.f32 %v938_v20, %v3610_v7  ;;  %s3884_s26 = sld [smem:[#allocation8 + $0x8]] }
  0xdb   :  { %v940_v30 = vmul.f32 %v938_v20, %v3612_v22  ;;  %v944_v24 = vmul.f32 %v943_v11, %v3610_v7  ;;  %v945_v9 = vmul.f32 %v943_v11, %v3612_v22  ;;  %v3665_v4 = vadd.f32 %v935_v34, %v3479_v43 }
  0xdc   :  { %v949_v47 = vmul.f32 %v948_v0, %v3610_v7  ;;  %v950_v29 = vmul.f32 %v948_v0, %v3612_v22  ;;  %v954_v44 = vmul.f32 %v953_v35, %v3610_v7  ;;  %v3671_v41 = vadd.f32 %v939_v2, %v3485_v10 }
  0xdd   :  { %v3674_v15 = vadd.f32 %v940_v30, %v3488_v60  ;;  %v3677_v55 = vadd.f32 %v944_v24, %v3491_v38  ;;  %v955_v14 = vmul.f32 %v953_v35, %v3612_v22  ;;  %v3681_v43 = vadd.f32 %v945_v9, %v3495_v39 }
  0xde   :  { %v3684_v61 = vadd.f32 %v949_v47, %v3498_v21  ;;  %v3687_v50 = vadd.f32 %v950_v29, %v3501_v16  ;;  %v3690_v10 = vadd.f32 %v954_v44, %v3504_v42  ;;  %v958_v56 = vstv %s3606_s28  ;;  %s3892_s28 = sld [smem:[#allocation10 + $0x7f]] }
  0xdf   :  { %v963_v60 = vstv %s3608_s29  ;;  %v968_v33 = vstv %s3616_s24  ;;  %v973_v49 = vstv %s3618_s30  ;;  %v959_v38 = vmul.f32 %v958_v56, %v3610_v7  ;;  %s3900_s29 = sld [smem:[#allocation10 + $0x80]]  ;;  %s3912_s24 = sld [smem:[#allocation10 + $0x81]] }
  0xe0   :  { %v960_v25 = vmul.f32 %v958_v56, %v3612_v22  ;;  %v964_v39 = vmul.f32 %v963_v60, %v3610_v7  ;;  %v965_v53 = vmul.f32 %v963_v60, %v3612_v22  ;;  %v3705_v21 = vadd.f32 %v955_v14, %v3519_v27  ;;  %s3914_s30 = sld [smem:[#allocation10 + $0x82]] }
  0xe1   :  { %v969_v16 = vmul.f32 %v968_v33, %v3610_v7  ;;  %v970_v42 = vmul.f32 %v968_v33, %v3612_v22  ;;  %v974_v37 = vmul.f32 %v973_v49, %v3610_v7  ;;  %v3711_v12 = vadd.f32 %v959_v38, %v3525_v36 }
  0xe2   :  { %v3714_v31 = vadd.f32 %v960_v25, %v3528_v48  ;;  %v3717_v34 = vadd.f32 %v964_v39, %v3531_v45  ;;  %v975_v27 = vmul.f32 %v973_v49, %v3612_v22  ;;  %v3725_v20 = vadd.f32 %v965_v53, %v3539_v23 }
  0xe3   :  { %v3728_v11 = vadd.f32 %v969_v16, %v3542_v19  ;;  %v3731_v36 = vadd.f32 %v970_v42, %v3545_v5  ;;  %v3734_v48 = vadd.f32 %v974_v37, %v3548_v3  ;;  %v978_v45 = vstv %s3652_s8  ;;  %s3928_s8 = sld [smem:[#allocation10 + $0x83]] }
  0xe4   :  { %v983_v0 = vstv %s3654_s9  ;;  %v988_v35 = vstv %s3660_s0  ;;  %v993_v2 = vstv %s3662_s2  ;;  %v979_v23 = vmul.f32 %v978_v45, %v3610_v7  ;;  %s3930_s9 = sld [smem:[#allocation10 + $0x84]]  ;;  %s3936_s0 = sld [smem:[#allocation10 + $0x85]] }
  0xe5   :  { %v980_v30 = vmul.f32 %v978_v45, %v3612_v22  ;;  %v984_v19 = vmul.f32 %v983_v0, %v3610_v7  ;;  %v985_v5 = vmul.f32 %v983_v0, %v3612_v22  ;;  %v3753_v3 = vadd.f32 %v975_v27, %v3567_v46  ;;  %s3938_s2 = sld [smem:[#allocation10 + $0x86]] }
  0xe6   :  { %v989_v24 = vmul.f32 %v988_v35, %v3610_v7  ;;  %v990_v9 = vmul.f32 %v988_v35, %v3612_v22  ;;  %v994_v47 = vmul.f32 %v993_v2, %v3610_v7  ;;  %v3759_v29 = vadd.f32 %v979_v23, %v3573_v40 }
  0xe7   :  { %v3762_v44 = vadd.f32 %v980_v30, %v3576_v1  ;;  %v3765_v14 = vadd.f32 %v984_v19, %v3579_v63  ;;  %v995_v56 = vmul.f32 %v993_v2, %v3612_v22  ;;  %v3769_v46 = vadd.f32 %v985_v5, %v3583_v28 }
  0xe8   :  { %v3772_v60 = vadd.f32 %v989_v24, %v3586_v18  ;;  %v3775_v33 = vadd.f32 %v990_v9, %v3589_v8  ;;  %v3778_v40 = vadd.f32 %v994_v47, %v3592_v17  ;;  %v998_v1 = vstv %s3700_s4  ;;  %s3944_s4 = sld [smem:[#allocation10 + $0x87]] }
  0xe9   :  { %v1003_v49 = vstv %s3702_s3  ;;  %v1012_v63 = vadd.f32 %v1011_v58, %v2544_v26  ;;  %v1013_v28 = vadd.f32 %v1011_v58, %v2596_v54  ;;  %v999_v38 = vmul.f32 %v998_v1, %v3610_v7  ;;  %s3946_s3 = sld [smem:[#allocation10 + $0x88]] }
  0xea   :  { %v1000_v18 = vmul.f32 %v998_v1, %v3612_v22  ;;  %v1004_v25 = vmul.f32 %v1003_v49, %v3610_v7  ;;  %v1005_v8 = vmul.f32 %v1003_v49, %v3612_v22  ;;  %v1016_v54 = vstv %s3720_s5  ;;  %s3954_s5 = sld [smem:[#allocation10 + $0x89]] }
  0xeb   :  { %v3796_v17 = vmax.f32 %v1012_v63, 0.0  ;;  %v3798_v26 = vmax.f32 %v1013_v28, 0.0  ;;  %v1021_v58 = vstv %s3722_s10  ;;  %v3807_v7 = vadd.f32 %v995_v56, %v3621_v57  ;;  %s3956_s10 = sld [smem:[#allocation10 + $0x8a]] }
  0xec   :  { %v3810_v22 = vadd.f32 %v999_v38, %v3624_v62  ;;  %v3813_v39 = vadd.f32 %v1000_v18, %v3627_v59  ;;  %v3816_v53 = vadd.f32 %v1004_v25, %v3630_v13  ;;  %v1026_v45 = vstv %s3740_s11  ;;  %s3968_s11 = sld [smem:[#allocation10 + $0x8b]] }
  0xed   :  { %v1017_v16 = vmul.f32 %v1016_v54, %v3796_v17  ;;  %v1018_v42 = vmul.f32 %v1016_v54, %v3798_v26  ;;  %v1022_v37 = vmul.f32 %v1021_v58, %v3796_v17  ;;  %v1023_v27 = vmul.f32 %v1021_v58, %v3798_v26 }
  0xee   :  { %v1031_v57 = vstv %s3742_s12  ;;  %v1036_v0 = vstv %s3748_s13  ;;  %v1041_v35 = vstv %s3750_s14  ;;  %v3827_v62 = vadd.f32 %v1005_v8, %v3641_v51  ;;  %s3970_s12 = sld [smem:[#allocation10 + $0x8c]]  ;;  %s3992_s13 = sld [smem:[#allocation10 + $0x8d]] }
  0xef   :  { %v3830_v59 = vadd.f32 %v1017_v16, %v3644_v52  ;;  %v3833_v13 = vadd.f32 %v1018_v42, %v3647_v6  ;;  %v3836_v2 = vadd.f32 %v1022_v37, %v3650_v32  ;;  %v1027_v23 = vmul.f32 %v1026_v45, %v3796_v17  ;;  %s4062_s14 = sld [smem:[#allocation7 + $0x9]] }
  0xf0   :  { %v1028_v30 = vmul.f32 %v1026_v45, %v3798_v26  ;;  %v1032_v51 = vmul.f32 %v1031_v57, %v3796_v17  ;;  %v1033_v52 = vmul.f32 %v1031_v57, %v3798_v26  ;;  %v3851_v6 = vadd.f32 %v1023_v27, %v3665_v4 }
  0xf1   :  { %v1037_v32 = vmul.f32 %v1036_v0, %v3796_v17  ;;  %v1038_v19 = vmul.f32 %v1036_v0, %v3798_v26  ;;  %v1042_v5 = vmul.f32 %v1041_v35, %v3796_v17  ;;  %v3857_v24 = vadd.f32 %v1027_v23, %v3671_v41 }
  0xf2   :  { %v3860_v9 = vadd.f32 %v1028_v30, %v3674_v15  ;;  %v3863_v47 = vadd.f32 %v1032_v51, %v3677_v55  ;;  %v1043_v56 = vmul.f32 %v1041_v35, %v3798_v26  ;;  %v3867_v4 = vadd.f32 %v1033_v52, %v3681_v43 }
  0xf3   :  { %v3870_v1 = vadd.f32 %v1037_v32, %v3684_v61  ;;  %v3873_v49 = vadd.f32 %v1038_v19, %v3687_v50  ;;  %v3876_v41 = vadd.f32 %v1042_v5, %v3690_v10  ;;  %v1046_v63 = vstv %s3792_s15  ;;  %s4068_s15 = sld [smem:[#allocation10 + $0x8e]] }
  0xf4   :  { %v1051_v15 = vstv %s3794_s16  ;;  %v1056_v28 = vstv %s3802_s25  ;;  %v1061_v38 = vstv %s3804_s17  ;;  %v1047_v55 = vmul.f32 %v1046_v63, %v3796_v17  ;;  %s4070_s16 = sld [smem:[#allocation10 + $0x8f]]  ;;  %s4078_s25 = sld [smem:[#allocation8 + $0x9]] }
  0xf5   :  { %v1048_v43 = vmul.f32 %v1046_v63, %v3798_v26  ;;  %v1052_v61 = vmul.f32 %v1051_v15, %v3796_v17  ;;  %v1053_v50 = vmul.f32 %v1051_v15, %v3798_v26  ;;  %v3895_v10 = vadd.f32 %v1043_v56, %v3705_v21  ;;  %s4090_s17 = sld [smem:[#allocation10 + $0x90]] }
  0xf6   :  { %v1057_v18 = vmul.f32 %v1056_v28, %v3796_v17  ;;  %v1058_v25 = vmul.f32 %v1056_v28, %v3798_v26  ;;  %v1062_v8 = vmul.f32 %v1061_v38, %v3796_v17  ;;  %v3903_v54 = vadd.f32 %v1047_v55, %v3711_v12 }
  0xf7   :  { %v3906_v58 = vadd.f32 %v1048_v43, %v3714_v31  ;;  %v3909_v21 = vadd.f32 %v1052_v61, %v3717_v34  ;;  %v1063_v16 = vmul.f32 %v1061_v38, %v3798_v26  ;;  %v3917_v42 = vadd.f32 %v1053_v50, %v3725_v20  ;;  %v4000_v43 = vld [vmem:[#allocation3 + $0x8] sm:$0xff] }
  0xf8   :  { %v3920_v37 = vadd.f32 %v1057_v18, %v3728_v11  ;;  %v3923_v12 = vadd.f32 %v1058_v25, %v3731_v36  ;;  %v3926_v31 = vadd.f32 %v1062_v8, %v3734_v48  ;;  %v1066_v34 = vstv %s3838_s18  ;;  %s4104_s18 = sld [smem:[#allocation10 + $0x91]] }
  0xf9   :  { %v1071_v27 = vstv %s3840_s19  ;;  %v1076_v45 = vstv %s3846_s20  ;;  %v1081_v57 = vstv %s3848_s21  ;;  %v1067_v20 = vmul.f32 %v1066_v34, %v3796_v17  ;;  %s4106_s19 = sld [smem:[#allocation10 + $0x92]]  ;;  %s4112_s20 = sld [smem:[#allocation10 + $0x93]] }
  0xfa   :  { %v1068_v11 = vmul.f32 %v1066_v34, %v3798_v26  ;;  %v1072_v36 = vmul.f32 %v1071_v27, %v3796_v17  ;;  %v1073_v48 = vmul.f32 %v1071_v27, %v3798_v26  ;;  %v3949_v0 = vadd.f32 %v1063_v16, %v3753_v3  ;;  %s4114_s21 = sld [smem:[#allocation10 + $0x94]] }
  0xfb   :  { %v1077_v35 = vmul.f32 %v1076_v45, %v3796_v17  ;;  %v1078_v23 = vmul.f32 %v1076_v45, %v3798_v26  ;;  %v1082_v30 = vmul.f32 %v1081_v57, %v3796_v17  ;;  %v3959_v51 = vadd.f32 %v1067_v20, %v3759_v29 }
  0xfc   :  { %v3962_v3 = vadd.f32 %v1068_v11, %v3762_v44  ;;  %v3965_v52 = vadd.f32 %v1072_v36, %v3765_v14  ;;  %v1083_v32 = vmul.f32 %v1081_v57, %v3798_v26  ;;  %v3973_v19 = vadd.f32 %v1073_v48, %v3769_v46 }
  0xfd   :  { %v3976_v5 = vadd.f32 %v1077_v35, %v3772_v60  ;;  %v3979_v29 = vadd.f32 %v1078_v23, %v3775_v33  ;;  %v3982_v44 = vadd.f32 %v1082_v30, %v3778_v40  ;;  %v1086_v14 = vstv %s3890_s27  ;;  %v3997_v40 = vld [vmem:[#allocation3] sm:$0xff]  ;;  %s4136_s27 = sld [smem:[#allocation10 + $0x97]] }
  0xfe   :  { %v1091_v56 = vstv %s3892_s28  ;;  %v1096_v63 = vstv %s3882_s23  ;;  %v1099_v15 = vstv %s3884_s26  ;;  %v1087_v28 = vmul.f32 %v1086_v14, %v3796_v17  ;;  %s4120_s23 = sld [smem:[#allocation10 + $0x95]]  ;;  %s4122_s26 = sld [smem:[#allocation10 + $0x96]] }
  0xff   :  { %v1088_v46 = vmul.f32 %v1086_v14, %v3798_v26  ;;  %v1092_v38 = vmul.f32 %v1091_v56, %v3796_v17  ;;  %v1093_v60 = vmul.f32 %v1091_v56, %v3798_v26  ;;  %v3995_v33 = vadd.f32 %v1083_v32, %v3807_v7  ;;  %s4138_s28 = sld [smem:[#allocation10 + $0x98]] }
 0x100   :  { %v1097_v55 = vmul.f32 %v3997_v40, %v1096_v63  ;;  %v1098_v17 = vmul.f32 %v4000_v43, %v1096_v63  ;;  %v1104_v61 = vstv %s3900_s29  ;;  %v4005_v26 = vadd.f32 %v1087_v28, %v3810_v22  ;;  %s4152_s29 = sld [smem:[#allocation10 + $0x99]] }
 0x101   :  { %v4008_v7 = vadd.f32 %v1088_v46, %v3813_v39  ;;  %v4011_v50 = vadd.f32 %v1092_v38, %v3816_v53  ;;  %v1109_v18 = vstv %s3912_s24  ;;  %v4015_v25 = vadd.f32 %v1093_v60, %v3827_v62  ;;  %s4154_s24 = sld [smem:[#allocation10 + $0x9a]] }
 0x102   :  { %v1100_v8 = vadd.f32 %v1099_v15, %v1097_v55  ;;  %v1101_v16 = vadd.f32 %v1099_v15, %v1098_v17  ;;  %v1114_v34 = vstv %s3914_s30  ;;  %v1119_v27 = vstv %s3928_s8  ;;  %s4164_s30 = sld [smem:[#allocation10 + $0x9b]]  ;;  %s4166_s8 = sld [smem:[#allocation10 + $0x9c]] }
 0x103   :  { %v1124_v22 = vstv %s3930_s9  ;;  %v1129_v45 = vstv %s3936_s0  ;;  %v1134_v57 = vstv %s3938_s2  ;;  %v1139_v11 = vstv %s3944_s4  ;;  %s4188_s9 = sld [smem:[#allocation10 + $0x9d]]  ;;  %s4254_s0 = sld [smem:[#allocation7 + $0xa]] }
 0x104   :  { %v4022_v20 = vmax.f32 %v1100_v8, 0.0  ;;  %v4024_v39 = vmax.f32 %v1101_v16, 0.0  ;;  %v1144_v53 = vstv %s3946_s3  ;;  %v1149_v36 = vstv %s3954_s5  ;;  %s4260_s2 = sld [smem:[#allocation10 + $0x9e]]  ;;  %s4262_s4 = sld [smem:[#allocation10 + $0x9f]] }
 0x105   :  { %v1154_v48 = vstv %s3956_s10  ;;  %v1159_v35 = vstv %s3968_s11  ;;  %v1164_v23 = vstv %s3970_s12  ;;  %v1169_v55 = vstv %s3992_s13  ;;  %s4270_s3 = sld [smem:[#allocation8 + $0xa]]  ;;  %s4282_s5 = sld [smem:[#allocation10 + $0xa0]] }
 0x106   :  { %v1105_v62 = vmul.f32 %v1104_v61, %v4022_v20  ;;  %v1106_v30 = vmul.f32 %v1104_v61, %v4024_v39  ;;  %v1110_v32 = vmul.f32 %v1109_v18, %v4022_v20  ;;  %v1111_v14 = vmul.f32 %v1109_v18, %v4024_v39  ;;  %s4296_s10 = sld [smem:[#allocation10 + $0xa1]]  ;;  %s4298_s11 = sld [smem:[#allocation10 + $0xa2]] }
 0x107   :  { %v1115_v56 = vmul.f32 %v1114_v34, %v4022_v20  ;;  %v1116_v63 = vmul.f32 %v1114_v34, %v4024_v39  ;;  %v1120_v15 = vmul.f32 %v1119_v27, %v4022_v20  ;;  %v1121_v28 = vmul.f32 %v1119_v27, %v4024_v39  ;;  %s4304_s12 = sld [smem:[#allocation10 + $0xa3]]  ;;  %s4306_s13 = sld [smem:[#allocation10 + $0xa4]] }
 0x108   :  { %v4041_v46 = vadd.f32 %v1105_v62, %v3830_v59  ;;  %v4044_v38 = vadd.f32 %v1106_v30, %v3833_v13  ;;  %v4047_v60 = vadd.f32 %v1110_v32, %v3836_v2  ;;  %v4051_v17 = vadd.f32 %v1111_v14, %v3851_v6 }
 0x109   :  { %v4054_v61 = vadd.f32 %v1115_v56, %v3857_v24  ;;  %v4057_v18 = vadd.f32 %v1116_v63, %v3860_v9  ;;  %v4060_v8 = vadd.f32 %v1120_v15, %v3863_v47  ;;  %v1125_v59 = vmul.f32 %v1124_v22, %v4022_v20 }
 0x10a   :  { %v1126_v13 = vmul.f32 %v1124_v22, %v4024_v39  ;;  %v1130_v2 = vmul.f32 %v1129_v45, %v4022_v20  ;;  %v1131_v6 = vmul.f32 %v1129_v45, %v4024_v39  ;;  %v4073_v24 = vadd.f32 %v1121_v28, %v3867_v4 }
 0x10b   :  { %v1135_v9 = vmul.f32 %v1134_v57, %v4022_v20  ;;  %v1136_v47 = vmul.f32 %v1134_v57, %v4024_v39  ;;  %v1140_v16 = vmul.f32 %v1139_v11, %v4022_v20  ;;  %v4081_v34 = vadd.f32 %v1125_v59, %v3870_v1 }
 0x10c   :  { %v4084_v27 = vadd.f32 %v1126_v13, %v3873_v49  ;;  %v4087_v22 = vadd.f32 %v1130_v2, %v3876_v41  ;;  %v1141_v4 = vmul.f32 %v1139_v11, %v4024_v39  ;;  %v4093_v45 = vadd.f32 %v1131_v6, %v3895_v10 }
 0x10d   :  { %v4096_v57 = vadd.f32 %v1135_v9, %v3903_v54  ;;  %v4099_v62 = vadd.f32 %v1136_v47, %v3906_v58  ;;  %v4102_v1 = vadd.f32 %v1140_v16, %v3909_v21  ;;  %v1145_v49 = vmul.f32 %v1144_v53, %v4022_v20 }
 0x10e   :  { %v1146_v41 = vmul.f32 %v1144_v53, %v4024_v39  ;;  %v1150_v10 = vmul.f32 %v1149_v36, %v4022_v20  ;;  %v1151_v11 = vmul.f32 %v1149_v36, %v4024_v39  ;;  %v1155_v54 = vmul.f32 %v1154_v48, %v4022_v20 }
 0x10f   :  { %v1156_v58 = vmul.f32 %v1154_v48, %v4024_v39  ;;  %v1160_v21 = vmul.f32 %v1159_v35, %v4022_v20  ;;  %v1161_v30 = vmul.f32 %v1159_v35, %v4024_v39  ;;  %v4125_v53 = vadd.f32 %v1141_v4, %v3917_v42 }
 0x110   :  { %v4128_v36 = vadd.f32 %v1145_v49, %v3920_v37  ;;  %v4131_v32 = vadd.f32 %v1146_v41, %v3923_v12  ;;  %v4134_v48 = vadd.f32 %v1150_v10, %v3926_v31  ;;  %v4141_v35 = vadd.f32 %v1151_v11, %v3949_v0 }
 0x111   :  { %v4144_v42 = vadd.f32 %v1155_v54, %v3959_v51  ;;  %v4147_v37 = vadd.f32 %v1156_v58, %v3962_v3  ;;  %v4150_v12 = vadd.f32 %v1160_v21, %v3965_v52  ;;  %v1165_v31 = vmul.f32 %v1164_v23, %v4022_v20 }
 0x112   :  { %v1166_v0 = vmul.f32 %v1164_v23, %v4024_v39  ;;  %v1170_v51 = vmul.f32 %v1169_v55, %v4022_v20  ;;  %v1171_v14 = vmul.f32 %v1169_v55, %v4024_v39  ;;  %v4169_v3 = vadd.f32 %v1161_v30, %v3973_v19 }
 0x113   :  { %v1174_v52 = vstv %s4068_s15  ;;  %v1179_v56 = vstv %s4070_s16  ;;  %v1184_v63 = vstv %s4062_s14  ;;  %v4175_v15 = vadd.f32 %v1165_v31, %v3976_v5  ;;  %s4312_s14 = sld [smem:[#allocation10 + $0xa5]]  ;;  %s4314_s15 = sld [smem:[#allocation10 + $0xa6]] }
 0x114   :  { %v4178_v23 = vadd.f32 %v1166_v0, %v3979_v29  ;;  %v4181_v28 = vadd.f32 %v1170_v51, %v3982_v44  ;;  %v1187_v55 = vstv %s4078_s25  ;;  %v1175_v59 = vmul.f32 %v1174_v52, %v4022_v20  ;;  %s4328_s16 = sld [smem:[#allocation10 + $0xa7]]  ;;  %s4330_s25 = sld [smem:[#allocation10 + $0xa8]] }
 0x115   :  { %v1176_v19 = vmul.f32 %v1174_v52, %v4024_v39  ;;  %v1180_v13 = vmul.f32 %v1179_v56, %v4022_v20  ;;  %v1181_v5 = vmul.f32 %v1179_v56, %v4024_v39  ;;  %v4191_v29 = vadd.f32 %v1171_v14, %v3995_v33 }
 0x116   :  { %v1185_v44 = vmul.f32 %v3997_v40, %v1184_v63  ;;  %v1186_v2 = vmul.f32 %v4000_v43, %v1184_v63  ;;  %v1192_v6 = vstv %s4090_s17  ;;  %v4197_v9 = vadd.f32 %v1175_v59, %v4005_v26  ;;  %s4344_s17 = sld [smem:[#allocation10 + $0xa9]] }
 0x117   :  { %v4200_v20 = vadd.f32 %v1176_v19, %v4008_v7  ;;  %v4203_v39 = vadd.f32 %v1180_v13, %v4011_v50  ;;  %v1197_v33 = vstv %s4104_s18  ;;  %v4207_v47 = vadd.f32 %v1181_v5, %v4015_v25  ;;  %s4346_s18 = sld [smem:[#allocation10 + $0xaa]] }
 0x118   :  { %v1188_v16 = vadd.f32 %v1187_v55, %v1185_v44  ;;  %v1189_v4 = vadd.f32 %v1187_v55, %v1186_v2  ;;  %v1202_v49 = vstv %s4106_s19  ;;  %v1207_v41 = vstv %s4112_s20  ;;  %s4356_s19 = sld [smem:[#allocation10 + $0xab]]  ;;  %s4358_s20 = sld [smem:[#allocation10 + $0xac]] }
 0x119   :  { %v1212_v26 = vstv %s4114_s21  ;;  %v1217_v10 = vstv %s4120_s23  ;;  %v1222_v11 = vstv %s4122_s26  ;;  %v1227_v58 = vstv %s4136_s27  ;;  %s4380_s21 = sld [smem:[#allocation10 + $0xad]]  ;;  %s4446_s23 = sld [smem:[#allocation7 + $0xb]] }
 0x11a   :  { %v4214_v54 = vmax.f32 %v1188_v16, 0.0  ;;  %v4216_v7 = vmax.f32 %v1189_v4, 0.0  ;;  %v1232_v50 = vstv %s4138_s28  ;;  %v1237_v21 = vstv %s4152_s29  ;;  %s4452_s26 = sld [smem:[#allocation10 + $0xae]]  ;;  %s4454_s27 = sld [smem:[#allocation10 + $0xaf]] }
 0x11b   :  { %v1242_v30 = vstv %s4154_s24  ;;  %v1247_v31 = vstv %s4164_s30  ;;  %v1252_v0 = vstv %s4166_s8  ;;  %v1257_v44 = vstv %s4188_s9  ;;  %s4462_s28 = sld [smem:[#allocation8 + $0xb]]  ;;  %s4474_s29 = sld [smem:[#allocation10 + $0xb0]] }
 0x11c   :  { %v1193_v25 = vmul.f32 %v1192_v6, %v4214_v54  ;;  %v1194_v51 = vmul.f32 %v1192_v6, %v4216_v7  ;;  %v1198_v14 = vmul.f32 %v1197_v33, %v4214_v54  ;;  %v1199_v52 = vmul.f32 %v1197_v33, %v4216_v7  ;;  %s4488_s24 = sld [smem:[#allocation10 + $0xb1]]  ;;  %s4490_s30 = sld [smem:[#allocation10 + $0xb2]] }
 0x11d   :  { %v1203_v56 = vmul.f32 %v1202_v49, %v4214_v54  ;;  %v1204_v63 = vmul.f32 %v1202_v49, %v4216_v7  ;;  %v1208_v55 = vmul.f32 %v1207_v41, %v4214_v54  ;;  %v1209_v59 = vmul.f32 %v1207_v41, %v4216_v7  ;;  %s4496_s8 = sld [smem:[#allocation10 + $0xb3]]  ;;  %s4498_s9 = sld [smem:[#allocation10 + $0xb4]] }
 0x11e   :  { %v4233_v19 = vadd.f32 %v1193_v25, %v4041_v46  ;;  %v4236_v13 = vadd.f32 %v1194_v51, %v4044_v38  ;;  %v4239_v5 = vadd.f32 %v1198_v14, %v4047_v60  ;;  %v4243_v2 = vadd.f32 %v1199_v52, %v4051_v17 }
 0x11f   :  { %v4246_v6 = vadd.f32 %v1203_v56, %v4054_v61  ;;  %v4249_v33 = vadd.f32 %v1204_v63, %v4057_v18  ;;  %v4252_v16 = vadd.f32 %v1208_v55, %v4060_v8  ;;  %v1213_v46 = vmul.f32 %v1212_v26, %v4214_v54 }
 0x120   :  { %v1214_v38 = vmul.f32 %v1212_v26, %v4216_v7  ;;  %v1218_v60 = vmul.f32 %v1217_v10, %v4214_v54  ;;  %v1219_v17 = vmul.f32 %v1217_v10, %v4216_v7  ;;  %v4265_v61 = vadd.f32 %v1209_v59, %v4073_v24 }
 0x121   :  { %v1223_v18 = vmul.f32 %v1222_v11, %v4214_v54  ;;  %v1224_v8 = vmul.f32 %v1222_v11, %v4216_v7  ;;  %v1228_v4 = vmul.f32 %v1227_v58, %v4214_v54  ;;  %v4273_v49 = vadd.f32 %v1213_v46, %v4081_v34 }
 0x122   :  { %v4276_v41 = vadd.f32 %v1214_v38, %v4084_v27  ;;  %v4279_v26 = vadd.f32 %v1218_v60, %v4087_v22  ;;  %v1229_v24 = vmul.f32 %v1227_v58, %v4216_v7  ;;  %v4285_v10 = vadd.f32 %v1219_v17, %v4093_v45 }
 0x123   :  { %v4288_v11 = vadd.f32 %v1223_v18, %v4096_v57  ;;  %v4291_v25 = vadd.f32 %v1224_v8, %v4099_v62  ;;  %v4294_v34 = vadd.f32 %v1228_v4, %v4102_v1  ;;  %v1233_v27 = vmul.f32 %v1232_v50, %v4214_v54 }
 0x124   :  { %v1234_v22 = vmul.f32 %v1232_v50, %v4216_v7  ;;  %v1238_v45 = vmul.f32 %v1237_v21, %v4214_v54  ;;  %v1239_v58 = vmul.f32 %v1237_v21, %v4216_v7  ;;  %v1243_v57 = vmul.f32 %v1242_v30, %v4214_v54 }
 0x125   :  { %v1244_v62 = vmul.f32 %v1242_v30, %v4216_v7  ;;  %v1248_v1 = vmul.f32 %v1247_v31, %v4214_v54  ;;  %v1249_v51 = vmul.f32 %v1247_v31, %v4216_v7  ;;  %v4317_v50 = vadd.f32 %v1229_v24, %v4125_v53 }
 0x126   :  { %v4320_v21 = vadd.f32 %v1233_v27, %v4128_v36  ;;  %v4323_v14 = vadd.f32 %v1234_v22, %v4131_v32  ;;  %v4326_v30 = vadd.f32 %v1238_v45, %v4134_v48  ;;  %v4333_v31 = vadd.f32 %v1239_v58, %v4141_v35 }
 0x127   :  { %v4336_v53 = vadd.f32 %v1243_v57, %v4144_v42  ;;  %v4339_v36 = vadd.f32 %v1244_v62, %v4147_v37  ;;  %v4342_v32 = vadd.f32 %v1248_v1, %v4150_v12  ;;  %v1253_v48 = vmul.f32 %v1252_v0, %v4214_v54 }
 0x128   :  { %v1254_v35 = vmul.f32 %v1252_v0, %v4216_v7  ;;  %v1258_v42 = vmul.f32 %v1257_v44, %v4214_v54  ;;  %v1259_v52 = vmul.f32 %v1257_v44, %v4216_v7  ;;  %v4361_v37 = vadd.f32 %v1249_v51, %v4169_v3 }
 0x129   :  { %v1262_v12 = vstv %s4260_s2  ;;  %v1267_v56 = vstv %s4262_s4  ;;  %v1272_v63 = vstv %s4254_s0  ;;  %v4367_v55 = vadd.f32 %v1253_v48, %v4175_v15  ;;  %s4504_s0 = sld [smem:[#allocation10 + $0xb5]]  ;;  %s4506_s2 = sld [smem:[#allocation10 + $0xb6]] }
 0x12a   :  { %v4370_v0 = vadd.f32 %v1254_v35, %v4178_v23  ;;  %v4373_v59 = vadd.f32 %v1258_v42, %v4181_v28  ;;  %v1275_v44 = vstv %s4270_s3  ;;  %v1263_v46 = vmul.f32 %v1262_v12, %v4214_v54  ;;  %s4520_s4 = sld [smem:[#allocation10 + $0xb7]]  ;;  %s4522_s3 = sld [smem:[#allocation10 + $0xb8]] }
 0x12b   :  { %v1264_v3 = vmul.f32 %v1262_v12, %v4216_v7  ;;  %v1268_v38 = vmul.f32 %v1267_v56, %v4214_v54  ;;  %v1269_v15 = vmul.f32 %v1267_v56, %v4216_v7  ;;  %v4383_v23 = vadd.f32 %v1259_v52, %v4191_v29 }
 0x12c   :  { %v1273_v28 = vmul.f32 %v3997_v40, %v1272_v63  ;;  %v1274_v60 = vmul.f32 %v4000_v43, %v1272_v63  ;;  %v1280_v17 = vstv %s4282_s5  ;;  %v4389_v18 = vadd.f32 %v1263_v46, %v4197_v9  ;;  %s4536_s5 = sld [smem:[#allocation10 + $0xb9]] }
 0x12d   :  { %v4392_v54 = vadd.f32 %v1264_v3, %v4200_v20  ;;  %v4395_v7 = vadd.f32 %v1268_v38, %v4203_v39  ;;  %v1285_v29 = vstv %s4296_s10  ;;  %v4399_v8 = vadd.f32 %v1269_v15, %v4207_v47  ;;  %s4538_s10 = sld [smem:[#allocation10 + $0xba]] }
 0x12e   :  { %v1276_v4 = vadd.f32 %v1275_v44, %v1273_v28  ;;  %v1277_v24 = vadd.f32 %v1275_v44, %v1274_v60  ;;  %v1290_v27 = vstv %s4298_s11  ;;  %v1295_v22 = vstv %s4304_s12  ;;  %s4548_s11 = sld [smem:[#allocation10 + $0xbb]]  ;;  %s4550_s12 = sld [smem:[#allocation10 + $0xbc]] }
 0x12f   :  { %v1300_v9 = vstv %s4306_s13  ;;  %v1305_v45 = vstv %s4312_s14  ;;  %v1310_v58 = vstv %s4314_s15  ;;  %v1315_v62 = vstv %s4328_s16  ;;  %s4572_s13 = sld [smem:[#allocation10 + $0xbd]]  ;;  %s4638_s14 = sld [smem:[#allocation7 + $0xc]] }
 0x130   :  { %v4406_v57 = vmax.f32 %v1276_v4, 0.0  ;;  %v4408_v20 = vmax.f32 %v1277_v24, 0.0  ;;  %v1320_v39 = vstv %s4330_s25  ;;  %v1325_v1 = vstv %s4344_s17  ;;  %s4644_s15 = sld [smem:[#allocation10 + $0xbe]]  ;;  %s4646_s16 = sld [smem:[#allocation10 + $0xbf]] }
 0x131   :  { %v1330_v51 = vstv %s4346_s18  ;;  %v1335_v48 = vstv %s4356_s19  ;;  %v1340_v35 = vstv %s4358_s20  ;;  %v1345_v28 = vstv %s4380_s21  ;;  %s4654_s25 = sld [smem:[#allocation8 + $0xc]]  ;;  %s4666_s17 = sld [smem:[#allocation10 + $0xc0]] }
 0x132   :  { %v1281_v47 = vmul.f32 %v1280_v17, %v4406_v57  ;;  %v1282_v42 = vmul.f32 %v1280_v17, %v4408_v20  ;;  %v1286_v52 = vmul.f32 %v1285_v29, %v4406_v57  ;;  %v1287_v12 = vmul.f32 %v1285_v29, %v4408_v20  ;;  %s4680_s18 = sld [smem:[#allocation10 + $0xc1]]  ;;  %s4682_s19 = sld [smem:[#allocation10 + $0xc2]] }
 0x133   :  { %v1291_v56 = vmul.f32 %v1290_v27, %v4406_v57  ;;  %v1292_v63 = vmul.f32 %v1290_v27, %v4408_v20  ;;  %v1296_v44 = vmul.f32 %v1295_v22, %v4406_v57  ;;  %v1297_v46 = vmul.f32 %v1295_v22, %v4408_v20  ;;  %s4688_s20 = sld [smem:[#allocation10 + $0xc3]]  ;;  %s4690_s21 = sld [smem:[#allocation10 + $0xc4]] }
 0x134   :  { %v4425_v3 = vadd.f32 %v1281_v47, %v4233_v19  ;;  %v4428_v38 = vadd.f32 %v1282_v42, %v4236_v13  ;;  %v4431_v15 = vadd.f32 %v1286_v52, %v4239_v5  ;;  %v4435_v60 = vadd.f32 %v1287_v12, %v4243_v2 }
 0x135   :  { %v4438_v17 = vadd.f32 %v1291_v56, %v4246_v6  ;;  %v4441_v29 = vadd.f32 %v1292_v63, %v4249_v33  ;;  %v4444_v4 = vadd.f32 %v1296_v44, %v4252_v16  ;;  %v1301_v19 = vmul.f32 %v1300_v9, %v4406_v57 }
 0x136   :  { %v1302_v13 = vmul.f32 %v1300_v9, %v4408_v20  ;;  %v1306_v5 = vmul.f32 %v1305_v45, %v4406_v57  ;;  %v1307_v2 = vmul.f32 %v1305_v45, %v4408_v20  ;;  %v4457_v6 = vadd.f32 %v1297_v46, %v4265_v61 }
 0x137   :  { %v1311_v33 = vmul.f32 %v1310_v58, %v4406_v57  ;;  %v1312_v16 = vmul.f32 %v1310_v58, %v4408_v20  ;;  %v1316_v24 = vmul.f32 %v1315_v62, %v4406_v57  ;;  %v4465_v27 = vadd.f32 %v1301_v19, %v4273_v49 }
 0x138   :  { %v4468_v22 = vadd.f32 %v1302_v13, %v4276_v41  ;;  %v4471_v9 = vadd.f32 %v1306_v5, %v4279_v26  ;;  %v1317_v61 = vmul.f32 %v1315_v62, %v4408_v20  ;;  %v4477_v45 = vadd.f32 %v1307_v2, %v4285_v10 }
 0x139   :  { %v4480_v58 = vadd.f32 %v1311_v33, %v4288_v11  ;;  %v4483_v47 = vadd.f32 %v1312_v16, %v4291_v25  ;;  %v4486_v49 = vadd.f32 %v1316_v24, %v4294_v34  ;;  %v1321_v41 = vmul.f32 %v1320_v39, %v4406_v57 }
 0x13a   :  { %v1322_v26 = vmul.f32 %v1320_v39, %v4408_v20  ;;  %v1326_v10 = vmul.f32 %v1325_v1, %v4406_v57  ;;  %v1327_v62 = vmul.f32 %v1325_v1, %v4408_v20  ;;  %v1331_v11 = vmul.f32 %v1330_v51, %v4406_v57 }
 0x13b   :  { %v1332_v25 = vmul.f32 %v1330_v51, %v4408_v20  ;;  %v1336_v34 = vmul.f32 %v1335_v48, %v4406_v57  ;;  %v1337_v42 = vmul.f32 %v1335_v48, %v4408_v20  ;;  %v4509_v39 = vadd.f32 %v1317_v61, %v4317_v50 }
 0x13c   :  { %v4512_v1 = vadd.f32 %v1321_v41, %v4320_v21  ;;  %v4515_v52 = vadd.f32 %v1322_v26, %v4323_v14  ;;  %v4518_v51 = vadd.f32 %v1326_v10, %v4326_v30  ;;  %v4525_v48 = vadd.f32 %v1327_v62, %v4333_v31 }
 0x13d   :  { %v4528_v50 = vadd.f32 %v1331_v11, %v4336_v53  ;;  %v4531_v21 = vadd.f32 %v1332_v25, %v4339_v36  ;;  %v4534_v14 = vadd.f32 %v1336_v34, %v4342_v32  ;;  %v1341_v30 = vmul.f32 %v1340_v35, %v4406_v57 }
 0x13e   :  { %v1342_v31 = vmul.f32 %v1340_v35, %v4408_v20  ;;  %v1346_v53 = vmul.f32 %v1345_v28, %v4406_v57  ;;  %v1347_v12 = vmul.f32 %v1345_v28, %v4408_v20  ;;  %v4553_v36 = vadd.f32 %v1337_v42, %v4361_v37 }
 0x13f   :  { %v1350_v32 = vstv %s4452_s26  ;;  %v1355_v56 = vstv %s4454_s27  ;;  %v1360_v63 = vstv %s4446_s23  ;;  %v4559_v44 = vadd.f32 %v1341_v30, %v4367_v55  ;;  %s4696_s23 = sld [smem:[#allocation10 + $0xc5]]  ;;  %s4698_s26 = sld [smem:[#allocation10 + $0xc6]] }
 0x140   :  { %v4562_v35 = vadd.f32 %v1342_v31, %v4370_v0  ;;  %v4565_v46 = vadd.f32 %v1346_v53, %v4373_v59  ;;  %v1363_v28 = vstv %s4462_s28  ;;  %v1351_v19 = vmul.f32 %v1350_v32, %v4406_v57  ;;  %s4712_s27 = sld [smem:[#allocation10 + $0xc7]]  ;;  %s4714_s28 = sld [smem:[#allocation10 + $0xc8]] }
 0x141   :  { %v1352_v37 = vmul.f32 %v1350_v32, %v4408_v20  ;;  %v1356_v13 = vmul.f32 %v1355_v56, %v4406_v57  ;;  %v1357_v55 = vmul.f32 %v1355_v56, %v4408_v20  ;;  %v4575_v0 = vadd.f32 %v1347_v12, %v4383_v23 }
 0x142   :  { %v1361_v59 = vmul.f32 %v3997_v40, %v1360_v63  ;;  %v1362_v5 = vmul.f32 %v4000_v43, %v1360_v63  ;;  %v1368_v2 = vstv %s4474_s29  ;;  %v4581_v33 = vadd.f32 %v1351_v19, %v4389_v18  ;;  %s4728_s29 = sld [smem:[#allocation10 + $0xc9]] }
 0x143   :  { %v4584_v57 = vadd.f32 %v1352_v37, %v4392_v54  ;;  %v4587_v20 = vadd.f32 %v1356_v13, %v4395_v7  ;;  %v1373_v23 = vstv %s4488_s24  ;;  %v4591_v16 = vadd.f32 %v1357_v55, %v4399_v8  ;;  %s4730_s24 = sld [smem:[#allocation10 + $0xca]] }
 0x144   :  { %v1364_v24 = vadd.f32 %v1363_v28, %v1361_v59  ;;  %v1365_v61 = vadd.f32 %v1363_v28, %v1362_v5  ;;  %v1378_v41 = vstv %s4490_s30  ;;  %v1383_v26 = vstv %s4496_s8  ;;  %s4740_s30 = sld [smem:[#allocation10 + $0xcb]]  ;;  %s4742_s8 = sld [smem:[#allocation10 + $0xcc]] }
 0x145   :  { %v1388_v18 = vstv %s4498_s9  ;;  %v1393_v10 = vstv %s4504_s0  ;;  %v1398_v62 = vstv %s4506_s2  ;;  %v1403_v25 = vstv %s4520_s4  ;;  %s4764_s9 = sld [smem:[#allocation10 + $0xcd]]  ;;  %s4836_s2 = sld [smem:[#allocation10 + $0xce]] }
 0x146   :  { %v4598_v11 = vmax.f32 %v1364_v24, 0.0  ;;  %v4600_v54 = vmax.f32 %v1365_v61, 0.0  ;;  %v1408_v7 = vstv %s4522_s3  ;;  %v1413_v34 = vstv %s4536_s5  ;;  %s4830_s0 = sld [smem:[#allocation7 + $0xd]]  ;;  %s4838_s4 = sld [smem:[#allocation10 + $0xcf]] }
 0x147   :  { %v1418_v42 = vstv %s4538_s10  ;;  %v1423_v30 = vstv %s4548_s11  ;;  %v1428_v31 = vstv %s4550_s12  ;;  %v1433_v59 = vstv %s4572_s13  ;;  %s4846_s3 = sld [smem:[#allocation8 + $0xd]]  ;;  %s4858_s5 = sld [smem:[#allocation10 + $0xd0]] }
 0x148   :  { %v1369_v8 = vmul.f32 %v1368_v2, %v4598_v11  ;;  %v1370_v53 = vmul.f32 %v1368_v2, %v4600_v54  ;;  %v1374_v12 = vmul.f32 %v1373_v23, %v4598_v11  ;;  %v1375_v32 = vmul.f32 %v1373_v23, %v4600_v54  ;;  %s4872_s10 = sld [smem:[#allocation10 + $0xd1]]  ;;  %s4874_s11 = sld [smem:[#allocation10 + $0xd2]] }
 0x149   :  { %v1379_v56 = vmul.f32 %v1378_v41, %v4598_v11  ;;  %v1380_v63 = vmul.f32 %v1378_v41, %v4600_v54  ;;  %v1384_v28 = vmul.f32 %v1383_v26, %v4598_v11  ;;  %v1385_v19 = vmul.f32 %v1383_v26, %v4600_v54  ;;  %s4880_s12 = sld [smem:[#allocation10 + $0xd3]]  ;;  %s4882_s13 = sld [smem:[#allocation10 + $0xd4]] }
 0x14a   :  { %v4617_v37 = vadd.f32 %v1369_v8, %v4425_v3  ;;  %v4620_v13 = vadd.f32 %v1370_v53, %v4428_v38  ;;  %v4623_v55 = vadd.f32 %v1374_v12, %v4431_v15  ;;  %v4627_v5 = vadd.f32 %v1375_v32, %v4435_v60 }
 0x14b   :  { %v4630_v2 = vadd.f32 %v1379_v56, %v4438_v17  ;;  %v4633_v23 = vadd.f32 %v1380_v63, %v4441_v29  ;;  %v4636_v24 = vadd.f32 %v1384_v28, %v4444_v4  ;;  %v1389_v3 = vmul.f32 %v1388_v18, %v4598_v11 }
 0x14c   :  { %v1390_v38 = vmul.f32 %v1388_v18, %v4600_v54  ;;  %v1394_v15 = vmul.f32 %v1393_v10, %v4598_v11  ;;  %v1395_v60 = vmul.f32 %v1393_v10, %v4600_v54  ;;  %v4649_v17 = vadd.f32 %v1385_v19, %v4457_v6 }
 0x14d   :  { %v1399_v29 = vmul.f32 %v1398_v62, %v4598_v11  ;;  %v1400_v4 = vmul.f32 %v1398_v62, %v4600_v54  ;;  %v1404_v61 = vmul.f32 %v1403_v25, %v4598_v11  ;;  %v4657_v41 = vadd.f32 %v1389_v3, %v4465_v27 }
 0x14e   :  { %v4660_v26 = vadd.f32 %v1390_v38, %v4468_v22  ;;  %v4663_v18 = vadd.f32 %v1394_v15, %v4471_v9  ;;  %v1405_v6 = vmul.f32 %v1403_v25, %v4600_v54  ;;  %v4669_v10 = vadd.f32 %v1395_v60, %v4477_v45 }
 0x14f   :  { %v4672_v62 = vadd.f32 %v1399_v29, %v4480_v58  ;;  %v4675_v8 = vadd.f32 %v1400_v4, %v4483_v47  ;;  %v4678_v27 = vadd.f32 %v1404_v61, %v4486_v49  ;;  %v1409_v22 = vmul.f32 %v1408_v7, %v4598_v11 }
 0x150   :  { %v1410_v9 = vmul.f32 %v1408_v7, %v4600_v54  ;;  %v1414_v45 = vmul.f32 %v1413_v34, %v4598_v11  ;;  %v1415_v25 = vmul.f32 %v1413_v34, %v4600_v54  ;;  %v1419_v58 = vmul.f32 %v1418_v42, %v4598_v11 }
 0x151   :  { %v1420_v47 = vmul.f32 %v1418_v42, %v4600_v54  ;;  %v1424_v49 = vmul.f32 %v1423_v30, %v4598_v11  ;;  %v1425_v53 = vmul.f32 %v1423_v30, %v4600_v54  ;;  %v4701_v7 = vadd.f32 %v1405_v6, %v4509_v39 }
 0x152   :  { %v4704_v34 = vadd.f32 %v1409_v22, %v4512_v1  ;;  %v4707_v12 = vadd.f32 %v1410_v9, %v4515_v52  ;;  %v4710_v42 = vadd.f32 %v1414_v45, %v4518_v51  ;;  %v4717_v30 = vadd.f32 %v1415_v25, %v4525_v48 }
 0x153   :  { %v4720_v39 = vadd.f32 %v1419_v58, %v4528_v50  ;;  %v4723_v1 = vadd.f32 %v1420_v47, %v4531_v21  ;;  %v4726_v52 = vadd.f32 %v1424_v49, %v4534_v14  ;;  %v1429_v51 = vmul.f32 %v1428_v31, %v4598_v11 }
 0x154   :  { %v1430_v48 = vmul.f32 %v1428_v31, %v4600_v54  ;;  %v1434_v50 = vmul.f32 %v1433_v59, %v4598_v11  ;;  %v1435_v32 = vmul.f32 %v1433_v59, %v4600_v54  ;;  %v4745_v21 = vadd.f32 %v1425_v53, %v4553_v36 }
 0x155   :  { %v1438_v14 = vstv %s4644_s15  ;;  %v1443_v56 = vstv %s4646_s16  ;;  %v1448_v63 = vstv %s4638_s14  ;;  %v4751_v28 = vadd.f32 %v1429_v51, %v4559_v44  ;;  %s4888_s14 = sld [smem:[#allocation10 + $0xd5]]  ;;  %s4890_s15 = sld [smem:[#allocation10 + $0xd6]] }
 0x156   :  { %v4754_v31 = vadd.f32 %v1430_v48, %v4562_v35  ;;  %v4757_v19 = vadd.f32 %v1434_v50, %v4565_v46  ;;  %v1451_v59 = vstv %s4654_s25  ;;  %v1439_v3 = vmul.f32 %v1438_v14, %v4598_v11  ;;  %s4904_s16 = sld [smem:[#allocation10 + $0xd7]]  ;;  %s4906_s25 = sld [smem:[#allocation10 + $0xd8]] }
 0x157   :  { %v1440_v36 = vmul.f32 %v1438_v14, %v4600_v54  ;;  %v1444_v38 = vmul.f32 %v1443_v56, %v4598_v11  ;;  %v1445_v44 = vmul.f32 %v1443_v56, %v4600_v54  ;;  %v4767_v35 = vadd.f32 %v1435_v32, %v4575_v0 }
 0x158   :  { %v1449_v46 = vmul.f32 %v3997_v40, %v1448_v63  ;;  %v1450_v15 = vmul.f32 %v4000_v43, %v1448_v63  ;;  %v1456_v60 = vstv %s4666_s17  ;;  %v4773_v29 = vadd.f32 %v1439_v3, %v4581_v33  ;;  %s4920_s17 = sld [smem:[#allocation10 + $0xd9]] }
 0x159   :  { %v4776_v11 = vadd.f32 %v1440_v36, %v4584_v57  ;;  %v4779_v54 = vadd.f32 %v1444_v38, %v4587_v20  ;;  %v1461_v0 = vstv %s4680_s18  ;;  %v4783_v40 = vadd.f32 %v1445_v44, %v4591_v16  ;;  %s4922_s18 = sld [smem:[#allocation10 + $0xda]] }
 0x15a   :  { %v1452_v43 = vadd.f32 %v1451_v59, %v1449_v46  ;;  %v1453_v4 = vadd.f32 %v1451_v59, %v1450_v15  ;;  %v1466_v61 = vstv %s4682_s19  ;;  %v1471_v6 = vstv %s4688_s20  ;;  %s4932_s19 = sld [smem:[#allocation10 + $0xdb]]  ;;  %s4934_s20 = sld [smem:[#allocation10 + $0xdc]] }
 0x15b   :  { %v1476_v33 = vstv %s4690_s21  ;;  %v1481_v22 = vstv %s4696_s23  ;;  %v1486_v9 = vstv %s4698_s26  ;;  %v1491_v25 = vstv %s4712_s27  ;;  %s4956_s21 = sld [smem:[#allocation10 + $0xdd]]  ;;  %s5026_s23 = sld [smem:[#allocation7 + $0xe]] }
 0x15c   :  { %v4790_v45 = vmax.f32 %v1452_v43, 0.0  ;;  %v4792_v57 = vmax.f32 %v1453_v4, 0.0  ;;  %v1496_v20 = vstv %s4714_s28  ;;  %v1501_v58 = vstv %s4728_s29  ;;  %s5032_s26 = sld [smem:[#allocation10 + $0xde]]  ;;  %s5034_s27 = sld [smem:[#allocation10 + $0xdf]] }
 0x15d   :  { %v1506_v47 = vstv %s4730_s24  ;;  %v1511_v49 = vstv %s4740_s30  ;;  %v1516_v53 = vstv %s4742_s8  ;;  %v1521_v38 = vstv %s4764_s9  ;;  %s5042_s28 = sld [smem:[#allocation8 + $0xe]]  ;;  %s5054_s29 = sld [smem:[#allocation10 + $0xe0]] }
 0x15e   :  { %v1457_v16 = vmul.f32 %v1456_v60, %v4790_v45  ;;  %v1458_v51 = vmul.f32 %v1456_v60, %v4792_v57  ;;  %v1462_v48 = vmul.f32 %v1461_v0, %v4790_v45  ;;  %v1463_v50 = vmul.f32 %v1461_v0, %v4792_v57  ;;  %s5068_s24 = sld [smem:[#allocation10 + $0xe1]]  ;;  %s5070_s30 = sld [smem:[#allocation10 + $0xe2]] }
 0x15f   :  { %v1467_v32 = vmul.f32 %v1466_v61, %v4790_v45  ;;  %v1468_v14 = vmul.f32 %v1466_v61, %v4792_v57  ;;  %v1472_v56 = vmul.f32 %v1471_v6, %v4790_v45  ;;  %v1473_v63 = vmul.f32 %v1471_v6, %v4792_v57  ;;  %s5076_s8 = sld [smem:[#allocation10 + $0xe3]]  ;;  %s5078_s9 = sld [smem:[#allocation10 + $0xe4]] }
 0x160   :  { %v4809_v59 = vadd.f32 %v1457_v16, %v4617_v37  ;;  %v4812_v3 = vadd.f32 %v1458_v51, %v4620_v13  ;;  %v4815_v36 = vadd.f32 %v1462_v48, %v4623_v55  ;;  %v4819_v44 = vadd.f32 %v1463_v50, %v4627_v5 }
 0x161   :  { %v4822_v46 = vadd.f32 %v1467_v32, %v4630_v2  ;;  %v4825_v15 = vadd.f32 %v1468_v14, %v4633_v23  ;;  %v4828_v60 = vadd.f32 %v1472_v56, %v4636_v24  ;;  %v1477_v37 = vmul.f32 %v1476_v33, %v4790_v45 }
 0x162   :  { %v1478_v13 = vmul.f32 %v1476_v33, %v4792_v57  ;;  %v1482_v55 = vmul.f32 %v1481_v22, %v4790_v45  ;;  %v1483_v5 = vmul.f32 %v1481_v22, %v4792_v57  ;;  %v4841_v2 = vadd.f32 %v1473_v63, %v4649_v17 }
 0x163   :  { %v1487_v23 = vmul.f32 %v1486_v9, %v4790_v45  ;;  %v1488_v24 = vmul.f32 %v1486_v9, %v4792_v57  ;;  %v1492_v0 = vmul.f32 %v1491_v25, %v4790_v45  ;;  %v4849_v43 = vadd.f32 %v1477_v37, %v4657_v41 }
 0x164   :  { %v4852_v4 = vadd.f32 %v1478_v13, %v4660_v26  ;;  %v4855_v61 = vadd.f32 %v1482_v55, %v4663_v18  ;;  %v1493_v17 = vmul.f32 %v1491_v25, %v4792_v57  ;;  %v4861_v6 = vadd.f32 %v1483_v5, %v4669_v10  ;;  %v4964_v13 = vld [vmem:[#allocation3 + $0x8] sm:$0xff] }
 0x165   :  { %v4864_v33 = vadd.f32 %v1487_v23, %v4672_v62  ;;  %v4867_v22 = vadd.f32 %v1488_v24, %v4675_v8  ;;  %v4870_v41 = vadd.f32 %v1492_v0, %v4678_v27  ;;  %v1497_v26 = vmul.f32 %v1496_v20, %v4790_v45 }
 0x166   :  { %v1498_v18 = vmul.f32 %v1496_v20, %v4792_v57  ;;  %v1502_v10 = vmul.f32 %v1501_v58, %v4790_v45  ;;  %v1503_v9 = vmul.f32 %v1501_v58, %v4792_v57  ;;  %v1507_v62 = vmul.f32 %v1506_v47, %v4790_v45 }
 0x167   :  { %v1508_v8 = vmul.f32 %v1506_v47, %v4792_v57  ;;  %v1512_v27 = vmul.f32 %v1511_v49, %v4790_v45  ;;  %v1513_v25 = vmul.f32 %v1511_v49, %v4792_v57  ;;  %v4893_v20 = vadd.f32 %v1493_v17, %v4701_v7 }
 0x168   :  { %v4896_v58 = vadd.f32 %v1497_v26, %v4704_v34  ;;  %v4899_v16 = vadd.f32 %v1498_v18, %v4707_v12  ;;  %v4902_v47 = vadd.f32 %v1502_v10, %v4710_v42  ;;  %v4909_v49 = vadd.f32 %v1503_v9, %v4717_v30 }
 0x169   :  { %v4912_v7 = vadd.f32 %v1507_v62, %v4720_v39  ;;  %v4915_v34 = vadd.f32 %v1508_v8, %v4723_v1  ;;  %v4918_v12 = vadd.f32 %v1512_v27, %v4726_v52  ;;  %v1517_v42 = vmul.f32 %v1516_v53, %v4790_v45 }
 0x16a   :  { %v1518_v30 = vmul.f32 %v1516_v53, %v4792_v57  ;;  %v1522_v39 = vmul.f32 %v1521_v38, %v4790_v45  ;;  %v1523_v51 = vmul.f32 %v1521_v38, %v4792_v57  ;;  %v4937_v1 = vadd.f32 %v1513_v25, %v4745_v21 }
 0x16b   :  { %v1526_v52 = vstv %s4836_s2  ;;  %v1531_v48 = vstv %s4838_s4  ;;  %v1536_v50 = vstv %s4830_s0  ;;  %v4943_v32 = vadd.f32 %v1517_v42, %v4751_v28  ;;  %s5084_s0 = sld [smem:[#allocation10 + $0xe5]]  ;;  %s5086_s2 = sld [smem:[#allocation10 + $0xe6]] }
 0x16c   :  { %v4946_v53 = vadd.f32 %v1518_v30, %v4754_v31  ;;  %v4949_v14 = vadd.f32 %v1522_v39, %v4757_v19  ;;  %v1539_v56 = vstv %s4846_s3  ;;  %v1527_v63 = vmul.f32 %v1526_v52, %v4790_v45  ;;  %v4961_v31 = vld [vmem:[#allocation3] sm:$0xff]  ;;  %s5100_s4 = sld [smem:[#allocation10 + $0xe7]]  ;;  %s5102_s3 = sld [smem:[#allocation10 + $0xe8]] }
 0x16d   :  { %v1528_v21 = vmul.f32 %v1526_v52, %v4792_v57  ;;  %v1532_v38 = vmul.f32 %v1531_v48, %v4790_v45  ;;  %v1533_v37 = vmul.f32 %v1531_v48, %v4792_v57  ;;  %v4959_v28 = vadd.f32 %v1523_v51, %v4767_v35 }
 0x16e   :  { %v1537_v19 = vmul.f32 %v4961_v31, %v1536_v50  ;;  %v1538_v45 = vmul.f32 %v4964_v13, %v1536_v50  ;;  %v1544_v55 = vstv %s4858_s5  ;;  %v4969_v57 = vadd.f32 %v1527_v63, %v4773_v29  ;;  %s5116_s5 = sld [smem:[#allocation10 + $0xe9]] }
 0x16f   :  { %v4972_v35 = vadd.f32 %v1528_v21, %v4776_v11  ;;  %v4975_v5 = vadd.f32 %v1532_v38, %v4779_v54  ;;  %v1549_v23 = vstv %s4872_s10  ;;  %v4979_v24 = vadd.f32 %v1533_v37, %v4783_v40  ;;  %s5118_s10 = sld [smem:[#allocation10 + $0xea]] }
 0x170   :  { %v1540_v0 = vadd.f32 %v1539_v56, %v1537_v19  ;;  %v1541_v17 = vadd.f32 %v1539_v56, %v1538_v45  ;;  %v1554_v26 = vstv %s4874_s11  ;;  %v1559_v18 = vstv %s4880_s12  ;;  %s5128_s11 = sld [smem:[#allocation10 + $0xeb]]  ;;  %s5130_s12 = sld [smem:[#allocation10 + $0xec]] }
 0x171   :  { %v1564_v29 = vstv %s4882_s13  ;;  %v1569_v10 = vstv %s4888_s14  ;;  %v1574_v9 = vstv %s4890_s15  ;;  %v1579_v8 = vstv %s4904_s16  ;;  %s5152_s13 = sld [smem:[#allocation10 + $0xed]]  ;;  %s5218_s14 = sld [smem:[#allocation7 + $0xf]] }
 0x172   :  { %v4986_v62 = vmax.f32 %v1540_v0, 0.0  ;;  %v4988_v11 = vmax.f32 %v1541_v17, 0.0  ;;  %v1584_v54 = vstv %s4906_s25  ;;  %v1589_v27 = vstv %s4920_s17  ;;  %s5224_s15 = sld [smem:[#allocation10 + $0xee]]  ;;  %s5226_s16 = sld [smem:[#allocation10 + $0xef]] }
 0x173   :  { %v1594_v25 = vstv %s4922_s18  ;;  %v1599_v42 = vstv %s4932_s19  ;;  %v1604_v30 = vstv %s4934_s20  ;;  %v1609_v19 = vstv %s4956_s21  ;;  %s5234_s25 = sld [smem:[#allocation8 + $0xf]]  ;;  %s5246_s17 = sld [smem:[#allocation10 + $0xf0]] }
 0x174   :  { %v1545_v40 = vmul.f32 %v1544_v55, %v4986_v62  ;;  %v1546_v39 = vmul.f32 %v1544_v55, %v4988_v11  ;;  %v1550_v51 = vmul.f32 %v1549_v23, %v4986_v62  ;;  %v1551_v52 = vmul.f32 %v1549_v23, %v4988_v11  ;;  %s5260_s18 = sld [smem:[#allocation10 + $0xf1]]  ;;  %s5262_s19 = sld [smem:[#allocation10 + $0xf2]] }
 0x175   :  { %v1555_v48 = vmul.f32 %v1554_v26, %v4986_v62  ;;  %v1556_v50 = vmul.f32 %v1554_v26, %v4988_v11  ;;  %v1560_v56 = vmul.f32 %v1559_v18, %v4986_v62  ;;  %v1561_v63 = vmul.f32 %v1559_v18, %v4988_v11  ;;  %s5268_s20 = sld [smem:[#allocation10 + $0xf3]]  ;;  %s5270_s21 = sld [smem:[#allocation10 + $0xf4]] }
 0x176   :  { %v5005_v21 = vadd.f32 %v1545_v40, %v4809_v59  ;;  %v5008_v38 = vadd.f32 %v1546_v39, %v4812_v3  ;;  %v5011_v37 = vadd.f32 %v1550_v51, %v4815_v36  ;;  %v5015_v45 = vadd.f32 %v1551_v52, %v4819_v44 }
 0x177   :  { %v5018_v55 = vadd.f32 %v1555_v48, %v4822_v46  ;;  %v5021_v23 = vadd.f32 %v1556_v50, %v4825_v15  ;;  %v5024_v0 = vadd.f32 %v1560_v56, %v4828_v60  ;;  %v1565_v59 = vmul.f32 %v1564_v29, %v4986_v62 }
 0x178   :  { %v1566_v3 = vmul.f32 %v1564_v29, %v4988_v11  ;;  %v1570_v36 = vmul.f32 %v1569_v10, %v4986_v62  ;;  %v1571_v44 = vmul.f32 %v1569_v10, %v4988_v11  ;;  %v5037_v46 = vadd.f32 %v1561_v63, %v4841_v2 }
 0x179   :  { %v1575_v15 = vmul.f32 %v1574_v9, %v4986_v62  ;;  %v1576_v60 = vmul.f32 %v1574_v9, %v4988_v11  ;;  %v1580_v17 = vmul.f32 %v1579_v8, %v4986_v62  ;;  %v5045_v26 = vadd.f32 %v1565_v59, %v4849_v43 }
 0x17a   :  { %v5048_v18 = vadd.f32 %v1566_v3, %v4852_v4  ;;  %v5051_v29 = vadd.f32 %v1570_v36, %v4855_v61  ;;  %v1581_v2 = vmul.f32 %v1579_v8, %v4988_v11  ;;  %v5057_v10 = vadd.f32 %v1571_v44, %v4861_v6 }
 0x17b   :  { %v5060_v9 = vadd.f32 %v1575_v15, %v4864_v33  ;;  %v5063_v40 = vadd.f32 %v1576_v60, %v4867_v22  ;;  %v5066_v43 = vadd.f32 %v1580_v17, %v4870_v41  ;;  %v1585_v4 = vmul.f32 %v1584_v54, %v4986_v62 }
 0x17c   :  { %v1586_v61 = vmul.f32 %v1584_v54, %v4988_v11  ;;  %v1590_v6 = vmul.f32 %v1589_v27, %v4986_v62  ;;  %v1591_v8 = vmul.f32 %v1589_v27, %v4988_v11  ;;  %v1595_v33 = vmul.f32 %v1594_v25, %v4986_v62 }
 0x17d   :  { %v1596_v22 = vmul.f32 %v1594_v25, %v4988_v11  ;;  %v1600_v41 = vmul.f32 %v1599_v42, %v4986_v62  ;;  %v1601_v39 = vmul.f32 %v1599_v42, %v4988_v11  ;;  %v5089_v54 = vadd.f32 %v1581_v2, %v4893_v20 }
 0x17e   :  { %v5092_v27 = vadd.f32 %v1585_v4, %v4896_v58  ;;  %v5095_v51 = vadd.f32 %v1586_v61, %v4899_v16  ;;  %v5098_v25 = vadd.f32 %v1590_v6, %v4902_v47  ;;  %v5105_v42 = vadd.f32 %v1591_v8, %v4909_v49 }
 0x17f   :  { %v5108_v20 = vadd.f32 %v1595_v33, %v4912_v7  ;;  %v5111_v58 = vadd.f32 %v1596_v22, %v4915_v34  ;;  %v5114_v16 = vadd.f32 %v1600_v41, %v4918_v12  ;;  %v1605_v47 = vmul.f32 %v1604_v30, %v4986_v62 }
 0x180   :  { %v1606_v49 = vmul.f32 %v1604_v30, %v4988_v11  ;;  %v1610_v7 = vmul.f32 %v1609_v19, %v4986_v62  ;;  %v1611_v52 = vmul.f32 %v1609_v19, %v4988_v11  ;;  %v5133_v34 = vadd.f32 %v1601_v39, %v4937_v1 }
 0x181   :  { %v1614_v12 = vstv %s5032_s26  ;;  %v1619_v48 = vstv %s5034_s27  ;;  %v1624_v50 = vstv %s5026_s23  ;;  %v5139_v56 = vadd.f32 %v1605_v47, %v4943_v32  ;;  %s5276_s23 = sld [smem:[#allocation10 + $0xf5]]  ;;  %s5278_s26 = sld [smem:[#allocation10 + $0xf6]] }
 0x182   :  { %v5142_v30 = vadd.f32 %v1606_v49, %v4946_v53  ;;  %v5145_v63 = vadd.f32 %v1610_v7, %v4949_v14  ;;  %v1627_v19 = vstv %s5042_s28  ;;  %v1615_v59 = vmul.f32 %v1614_v12, %v4986_v62  ;;  %s5292_s27 = sld [smem:[#allocation10 + $0xf7]]  ;;  %s5294_s28 = sld [smem:[#allocation10 + $0xf8]] }
 0x183   :  { %v1616_v1 = vmul.f32 %v1614_v12, %v4988_v11  ;;  %v1620_v3 = vmul.f32 %v1619_v48, %v4986_v62  ;;  %v1621_v32 = vmul.f32 %v1619_v48, %v4988_v11  ;;  %v5155_v53 = vadd.f32 %v1611_v52, %v4959_v28 }
 0x184   :  { %v1625_v14 = vmul.f32 %v4961_v31, %v1624_v50  ;;  %v1626_v36 = vmul.f32 %v4964_v13, %v1624_v50  ;;  %v1632_v44 = vstv %s5054_s29  ;;  %v5161_v15 = vadd.f32 %v1615_v59, %v4969_v57  ;;  %s5308_s29 = sld [smem:[#allocation10 + $0xf9]] }
 0x185   :  { %v5164_v62 = vadd.f32 %v1616_v1, %v4972_v35  ;;  %v5167_v11 = vadd.f32 %v1620_v3, %v4975_v5  ;;  %v1637_v28 = vstv %s5068_s24  ;;  %v5171_v60 = vadd.f32 %v1621_v32, %v4979_v24  ;;  %s5310_s24 = sld [smem:[#allocation10 + $0xfa]] }
 0x186   :  { %v1628_v17 = vadd.f32 %v1627_v19, %v1625_v14  ;;  %v1629_v2 = vadd.f32 %v1627_v19, %v1626_v36  ;;  %v1642_v4 = vstv %s5070_s30  ;;  %v1647_v61 = vstv %s5076_s8  ;;  %s5320_s30 = sld [smem:[#allocation10 + $0xfb]]  ;;  %s5322_s8 = sld [smem:[#allocation10 + $0xfc]] }
 0x187   :  { %v1652_v57 = vstv %s5078_s9  ;;  %v1657_v6 = vstv %s5084_s0  ;;  %v1662_v8 = vstv %s5086_s2  ;;  %v1667_v22 = vstv %s5100_s4  ;;  %s5344_s9 = sld [smem:[#allocation10 + $0xfd]]  ;;  %s5410_s0 = sld [smem:[#allocation10 + $0xfe]] }
 0x188   :  { %v5178_v33 = vmax.f32 %v1628_v17, 0.0  ;;  %v5180_v35 = vmax.f32 %v1629_v2, 0.0  ;;  %v1672_v5 = vstv %s5102_s3  ;;  %v1677_v41 = vstv %s5116_s5  ;;  %s5416_s2 = sld [smem:[#allocation10 + $0xff]]  ;;  %s5418_s4 = sld [smem:[#allocation11]] }
 0x189   :  { %v1682_v39 = vstv %s5118_s10  ;;  %v1687_v47 = vstv %s5128_s11  ;;  %v1692_v49 = vstv %s5130_s12  ;;  %v1697_v14 = vstv %s5152_s13  ;;  %s5426_s3 = sld [smem:[#allocation13]]  ;;  %s5450_s5 = sld [smem:[#allocation11 + $0x1]] }
 0x18a   :  { %v1633_v24 = vmul.f32 %v1632_v44, %v5178_v33  ;;  %v1634_v7 = vmul.f32 %v1632_v44, %v5180_v35  ;;  %v1638_v52 = vmul.f32 %v1637_v28, %v5178_v33  ;;  %v1639_v12 = vmul.f32 %v1637_v28, %v5180_v35  ;;  %s5456_s10 = sld [smem:[#allocation13 + $0x1]]  ;;  %s5462_s11 = sld [smem:[#allocation11 + $0x2]] }
 0x18b   :  { %v1643_v48 = vmul.f32 %v1642_v4, %v5178_v33  ;;  %v1644_v50 = vmul.f32 %v1642_v4, %v5180_v35  ;;  %v1648_v19 = vmul.f32 %v1647_v61, %v5178_v33  ;;  %v1649_v59 = vmul.f32 %v1647_v61, %v5180_v35  ;;  %s5464_s12 = sld [smem:[#allocation11 + $0x3]]  ;;  %s5478_s13 = sld [smem:[#allocation13 + $0x2]] }
 0x18c   :  { %v5197_v1 = vadd.f32 %v1633_v24, %v5005_v21  ;;  %v5200_v3 = vadd.f32 %v1634_v7, %v5008_v38  ;;  %v5203_v32 = vadd.f32 %v1638_v52, %v5011_v37  ;;  %v5207_v36 = vadd.f32 %v1639_v12, %v5015_v45 }
 0x18d   :  { %v5210_v44 = vadd.f32 %v1643_v48, %v5018_v55  ;;  %v5213_v28 = vadd.f32 %v1644_v50, %v5021_v23  ;;  %v5216_v17 = vadd.f32 %v1648_v19, %v5024_v0  ;;  %v1653_v21 = vmul.f32 %v1652_v57, %v5178_v33 }
 0x18e   :  { %v1654_v38 = vmul.f32 %v1652_v57, %v5180_v35  ;;  %v1658_v37 = vmul.f32 %v1657_v6, %v5178_v33  ;;  %v1659_v45 = vmul.f32 %v1657_v6, %v5180_v35  ;;  %v5229_v55 = vadd.f32 %v1649_v59, %v5037_v46 }
 0x18f   :  { %v1663_v23 = vmul.f32 %v1662_v8, %v5178_v33  ;;  %v1664_v0 = vmul.f32 %v1662_v8, %v5180_v35  ;;  %v1668_v2 = vmul.f32 %v1667_v22, %v5178_v33  ;;  %v5237_v4 = vadd.f32 %v1653_v21, %v5045_v26 }
 0x190   :  { %v5240_v61 = vadd.f32 %v1654_v38, %v5048_v18  ;;  %v5243_v57 = vadd.f32 %v1658_v37, %v5051_v29  ;;  %v1669_v46 = vmul.f32 %v1667_v22, %v5180_v35  ;;  %v5249_v6 = vadd.f32 %v1659_v45, %v5057_v10 }
 0x191   :  { %v5252_v8 = vadd.f32 %v1663_v23, %v5060_v9  ;;  %v5255_v24 = vadd.f32 %v1664_v0, %v5063_v40  ;;  %v5258_v26 = vadd.f32 %v1668_v2, %v5066_v43  ;;  %v1673_v18 = vmul.f32 %v1672_v5, %v5178_v33 }
 0x192   :  { %v1674_v29 = vmul.f32 %v1672_v5, %v5180_v35  ;;  %v1678_v10 = vmul.f32 %v1677_v41, %v5178_v33  ;;  %v1679_v22 = vmul.f32 %v1677_v41, %v5180_v35  ;;  %v1683_v9 = vmul.f32 %v1682_v39, %v5178_v33 }
 0x193   :  { %v1684_v40 = vmul.f32 %v1682_v39, %v5180_v35  ;;  %v1688_v43 = vmul.f32 %v1687_v47, %v5178_v33  ;;  %v1689_v7 = vmul.f32 %v1687_v47, %v5180_v35  ;;  %v5281_v5 = vadd.f32 %v1669_v46, %v5089_v54 }
 0x194   :  { %v5284_v41 = vadd.f32 %v1673_v18, %v5092_v27  ;;  %v5287_v52 = vadd.f32 %v1674_v29, %v5095_v51  ;;  %v5290_v39 = vadd.f32 %v1678_v10, %v5098_v25  ;;  %v5297_v47 = vadd.f32 %v1679_v22, %v5105_v42 }
 0x195   :  { %v5300_v54 = vadd.f32 %v1683_v9, %v5108_v20  ;;  %v5303_v27 = vadd.f32 %v1684_v40, %v5111_v58  ;;  %v5306_v51 = vadd.f32 %v1688_v43, %v5114_v16  ;;  %v1693_v25 = vmul.f32 %v1692_v49, %v5178_v33 }
 0x196   :  { %v1694_v42 = vmul.f32 %v1692_v49, %v5180_v35  ;;  %v1698_v20 = vmul.f32 %v1697_v14, %v5178_v33  ;;  %v1699_v12 = vmul.f32 %v1697_v14, %v5180_v35  ;;  %v5325_v58 = vadd.f32 %v1689_v7, %v5133_v34 }
 0x197   :  { %v1702_v16 = vstv %s5224_s15  ;;  %v1707_v48 = vstv %s5226_s16  ;;  %v1712_v50 = vstv %s5218_s14  ;;  %v5331_v19 = vadd.f32 %v1693_v25, %v5139_v56  ;;  %s5480_s14 = sld [smem:[#allocation13 + $0x3]]  ;;  %s5504_s15 = sld [smem:[#allocation11 + $0x4]] }
 0x198   :  { %v5334_v49 = vadd.f32 %v1694_v42, %v5142_v30  ;;  %v5337_v59 = vadd.f32 %v1698_v20, %v5145_v63  ;;  %v1715_v14 = vstv %s5234_s25  ;;  %v1703_v21 = vmul.f32 %v1702_v16, %v5178_v33  ;;  %s5506_s16 = sld [smem:[#allocation13 + $0x4]]  ;;  %s5538_s25 = sld [smem:[#allocation11 + $0x5]] }
 0x199   :  { %v1704_v34 = vmul.f32 %v1702_v16, %v5180_v35  ;;  %v1708_v38 = vmul.f32 %v1707_v48, %v5178_v33  ;;  %v1709_v56 = vmul.f32 %v1707_v48, %v5180_v35  ;;  %v5347_v30 = vadd.f32 %v1699_v12, %v5155_v53 }
 0x19a   :  { %v1713_v63 = vmul.f32 %v4961_v31, %v1712_v50  ;;  %v1714_v37 = vmul.f32 %v4964_v13, %v1712_v50  ;;  %v1720_v45 = vstv %s5246_s17  ;;  %v5353_v23 = vadd.f32 %v1703_v21, %v5161_v15  ;;  %s5546_s17 = sld [smem:[#allocation11 + $0x6]] }
 0x19b   :  { %v5356_v33 = vadd.f32 %v1704_v34, %v5164_v62  ;;  %v5359_v35 = vadd.f32 %v1708_v38, %v5167_v11  ;;  %v1725_v53 = vstv %s5260_s18  ;;  %v5363_v31 = vadd.f32 %v1709_v56, %v5171_v60  ;;  %s5548_s18 = sld [smem:[#allocation13 + $0x5]] }
 0x19c   :  { %v1716_v13 = vadd.f32 %v1715_v14, %v1713_v63  ;;  %v1717_v0 = vadd.f32 %v1715_v14, %v1714_v37  ;;  %v1730_v2 = vstv %s5262_s19  ;;  %v1735_v46 = vstv %s5268_s20  ;;  %s5554_s19 = sld [smem:[#allocation11 + $0x7]]  ;;  %s5556_s20 = sld [smem:[#allocation13 + $0x6]] }
 0x19d   :  { %v1740_v15 = vstv %s5270_s21  ;;  %v1745_v18 = vstv %s5276_s23  ;;  %v1750_v29 = vstv %s5278_s26  ;;  %v1755_v22 = vstv %s5292_s27  ;;  %s5562_s21 = sld [smem:[#allocation11 + $0x8]]  ;;  %s5564_s23 = sld [smem:[#allocation13 + $0x7]] }
 0x19e   :  { %v5370_v10 = vmax.f32 %v1716_v13, 0.0  ;;  %v5372_v62 = vmax.f32 %v1717_v0, 0.0  ;;  %v1760_v11 = vstv %s5294_s28  ;;  %v1765_v9 = vstv %s5308_s29  ;;  %s5570_s26 = sld [smem:[#allocation11 + $0x9]]  ;;  %s5572_s27 = sld [smem:[#allocation13 + $0x8]] }
 0x19f   :  { %v1770_v40 = vstv %s5310_s24  ;;  %v1775_v43 = vstv %s5320_s30  ;;  %v1780_v7 = vstv %s5322_s8  ;;  %v1785_v38 = vstv %s5344_s9  ;;  %s5578_s28 = sld [smem:[#allocation11 + $0xa]]  ;;  %s5580_s29 = sld [smem:[#allocation13 + $0x9]] }
 0x1a0   :  { %v1721_v60 = vmul.f32 %v1720_v45, %v5370_v10  ;;  %v1722_v25 = vmul.f32 %v1720_v45, %v5372_v62  ;;  %v1726_v42 = vmul.f32 %v1725_v53, %v5370_v10  ;;  %v1727_v20 = vmul.f32 %v1725_v53, %v5372_v62  ;;  %s5586_s24 = sld [smem:[#allocation11 + $0xb]]  ;;  %s5588_s30 = sld [smem:[#allocation13 + $0xa]] }
 0x1a1   :  { %v1731_v12 = vmul.f32 %v1730_v2, %v5370_v10  ;;  %v1732_v16 = vmul.f32 %v1730_v2, %v5372_v62  ;;  %v1736_v48 = vmul.f32 %v1735_v46, %v5370_v10  ;;  %v1737_v50 = vmul.f32 %v1735_v46, %v5372_v62  ;;  %s5594_s8 = sld [smem:[#allocation11 + $0xc]]  ;;  %s5596_s9 = sld [smem:[#allocation13 + $0xb]] }
 0x1a2   :  { %v5389_v14 = vadd.f32 %v1721_v60, %v5197_v1  ;;  %v5392_v21 = vadd.f32 %v1722_v25, %v5200_v3  ;;  %v5395_v34 = vadd.f32 %v1726_v42, %v5203_v32  ;;  %v5399_v56 = vadd.f32 %v1727_v20, %v5207_v36 }
 0x1a3   :  { %v5402_v63 = vadd.f32 %v1731_v12, %v5210_v44  ;;  %v5405_v37 = vadd.f32 %v1732_v16, %v5213_v28  ;;  %v5408_v45 = vadd.f32 %v1736_v48, %v5216_v17  ;;  %v1741_v1 = vmul.f32 %v1740_v15, %v5370_v10 }
 0x1a4   :  { %v1742_v3 = vmul.f32 %v1740_v15, %v5372_v62  ;;  %v1746_v32 = vmul.f32 %v1745_v18, %v5370_v10  ;;  %v1747_v36 = vmul.f32 %v1745_v18, %v5372_v62  ;;  %v5421_v44 = vadd.f32 %v1737_v50, %v5229_v55 }
 0x1a5   :  { %v1751_v28 = vmul.f32 %v1750_v29, %v5370_v10  ;;  %v1752_v17 = vmul.f32 %v1750_v29, %v5372_v62  ;;  %v1756_v53 = vmul.f32 %v1755_v22, %v5370_v10  ;;  %v5429_v13 = vadd.f32 %v1741_v1, %v5237_v4 }
 0x1a6   :  { %v5432_v0 = vadd.f32 %v1742_v3, %v5240_v61  ;;  %v5435_v2 = vadd.f32 %v1746_v32, %v5243_v57  ;;  %v1757_v55 = vmul.f32 %v1755_v22, %v5372_v62  ;;  %v5439_v46 = vadd.f32 %v1747_v36, %v5249_v6 }
 0x1a7   :  { %v5442_v15 = vadd.f32 %v1751_v28, %v5252_v8  ;;  %v5445_v18 = vadd.f32 %v1752_v17, %v5255_v24  ;;  %v5448_v4 = vadd.f32 %v1756_v53, %v5258_v26  ;;  %v1761_v61 = vmul.f32 %v1760_v11, %v5370_v10 }
 0x1a8   :  { %v1762_v57 = vmul.f32 %v1760_v11, %v5372_v62  ;;  %v1766_v29 = vmul.f32 %v1765_v9, %v5370_v10  ;;  %v1767_v6 = vmul.f32 %v1765_v9, %v5372_v62  ;;  %v1771_v8 = vmul.f32 %v1770_v40, %v5370_v10 }
 0x1a9   :  { %v1772_v24 = vmul.f32 %v1770_v40, %v5372_v62  ;;  %v1776_v22 = vmul.f32 %v1775_v43, %v5370_v10  ;;  %v1777_v26 = vmul.f32 %v1775_v43, %v5372_v62  ;;  %v5467_v11 = vadd.f32 %v1757_v55, %v5281_v5 }
 0x1aa   :  { %v5470_v9 = vadd.f32 %v1761_v61, %v5284_v41  ;;  %v5473_v60 = vadd.f32 %v1762_v57, %v5287_v52  ;;  %v5476_v40 = vadd.f32 %v1766_v29, %v5290_v39  ;;  %v5483_v43 = vadd.f32 %v1767_v6, %v5297_v47 }
 0x1ab   :  { %v5486_v5 = vadd.f32 %v1771_v8, %v5300_v54  ;;  %v5489_v41 = vadd.f32 %v1772_v24, %v5303_v27  ;;  %v5492_v52 = vadd.f32 %v1776_v22, %v5306_v51  ;;  %v1781_v39 = vmul.f32 %v1780_v7, %v5370_v10 }
 0x1ac   :  { %v1782_v25 = vmul.f32 %v1780_v7, %v5372_v62  ;;  %v1786_v42 = vmul.f32 %v1785_v38, %v5370_v10  ;;  %v1787_v20 = vmul.f32 %v1785_v38, %v5372_v62  ;;  %v5499_v47 = vadd.f32 %v1777_v26, %v5325_v58 }
 0x1ad   :  { %v1790_v54 = vstv %s5410_s0  ;;  %v1795_v12 = vstv %s5416_s2  ;;  %v1800_v16 = vstv %s5418_s4  ;;  %v5509_v27 = vadd.f32 %v1781_v39, %v5331_v19  ;;  %s5602_s0 = sld [smem:[#allocation11 + $0xd]]  ;;  %s5604_s2 = sld [smem:[#allocation13 + $0xc]] }
 0x1ae   :  { %v5512_v51 = vadd.f32 %v1782_v25, %v5334_v49  ;;  %v5515_v7 = vadd.f32 %v1786_v42, %v5337_v59  ;;  %v1805_v58 = vstv %s5426_s3  ;;  %v5519_v48 = vadd.f32 %v1787_v20, %v5347_v30  ;;  %s5610_s4 = sld [smem:[#allocation11 + $0xe]]  ;;  %s5612_s3 = sld [smem:[#allocation13 + $0xd]] }
 0x1af   :  { %v1791_v50 = vmul.f32 %v1790_v54, %v5370_v10  ;;  %v1792_v38 = vmul.f32 %v1790_v54, %v5372_v62  ;;  %v1796_v1 = vmul.f32 %v1795_v12, %v5370_v10  ;;  %v1797_v19 = vmul.f32 %v1795_v12, %v5372_v62 }
 0x1b0   :  { %v1801_v49 = vadd.f32 %v1800_v16, %v5389_v14  ;;  %v1802_v59 = vadd.f32 %v1800_v16, %v5392_v21  ;;  %v1808_v3 = vstv %s5450_s5  ;;  %v1813_v28 = vstv %s5456_s10  ;;  %s5618_s5 = sld [smem:[#allocation11 + $0xf]]  ;;  %s5620_s10 = sld [smem:[#allocation13 + $0xe]] }
 0x1b1   :  { %v5529_v30 = vadd.f32 %v1791_v50, %v5353_v23  ;;  %v5532_v32 = vadd.f32 %v1792_v38, %v5356_v33  ;;  %v5535_v36 = vadd.f32 %v1796_v1, %v5359_v35  ;;  %v1809_v17 = vadd.f32 %v1808_v3, %v5395_v34 }
 0x1b2   :  { %v1803_v10 = vmax.f32 %v1801_v49, 0.0  ;;  %v1804_v62 = vmax.f32 %v1802_v59, 0.0  ;;  %v1810_v14 = vadd.f32 %v1808_v3, %v5399_v56  ;;  %v1818_v21 = vstv %s5462_s11  ;;  %s5626_s11 = sld [smem:[#allocation13 + $0xf]] }
 0x1b3   :  { %v1823_v53 = vstv %s5478_s13  ;;  %v1828_v55 = vstv %s5464_s12  ;;  %v1833_v23 = vstv %s5480_s14  ;;  %v1811_v61 = vmax.f32 %v1809_v17, 0.0  ;;  %s2433_s14 = smov [#allocation14]  }
 0x1b4   :  { %v1806_v33 = vmul.f32 %v1805_v58, %v1803_v10  ;;  %v1807_v35 = vmul.f32 %v1805_v58, %v1804_v62  ;;  %v1812_v57 = vmax.f32 %v1810_v14, 0.0  ;;  %v1819_v29 = vadd.f32 %v1818_v21, %v5402_v63 }
 0x1b5   :  { %v1820_v34 = vadd.f32 %v1818_v21, %v5405_v37  ;;  %v1829_v56 = vadd.f32 %v1828_v55, %v5408_v45  ;;  %v1830_v6 = vadd.f32 %v1828_v55, %v5421_v44  ;;  %v1814_v8 = vmul.f32 %v1813_v28, %v1811_v61 }
 0x1b6   :  { %v1815_v24 = vmul.f32 %v1813_v28, %v1812_v57  ;;  %v1838_v22 = vstv %s5504_s15  ;;  %v1843_v26 = vstv %s5506_s16  ;;  %v1821_v39 = vmax.f32 %v1819_v29, 0.0  ;;  %s1968_s15 = sshll.u32 %s2433_s14, 4  ;;  %s1969_s15 = int_to_ptr.vmem [resolvable:$true] %s1968_s15 }
 0x1b7   :  { %v1822_v25 = vmax.f32 %v1820_v34, 0.0  ;;  %v1831_v42 = vmax.f32 %v1829_v56, 0.0  ;;  %v1832_v20 = vmax.f32 %v1830_v6, 0.0  ;;  %v1816_v63 = vadd.f32 %v1814_v8, %v1806_v33  ;;  %s2393_s16 = scalar_lea.vmem %s1969_s15, 256  ;;  %p2398_p6 = scmp.lt.s32.totalorder %s1969_s15, %s1969_s15 }
 0x1b8   :  { %v1817_v54 = vadd.f32 %v1815_v24, %v1807_v35  ;;  %v1839_v37 = vadd.f32 %v1838_v22, %v5429_v13  ;;  %v1840_v45 = vadd.f32 %v1838_v22, %v5432_v0  ;;  %v1824_v44 = vmul.f32 %v1823_v53, %v1821_v39  ;;  %p2394_p5 = scmp.ne.s32.totalorder %s1969_s15, %s2393_s16  ;;  %p2399_p7 = scmp.lt.s32.totalorder %s2393_s16, %s2393_s16 }
 0x1b9   :  { %v1825_v12 = vmul.f32 %v1823_v53, %v1822_v25  ;;  %v1834_v16 = vmul.f32 %v1833_v23, %v1831_v42  ;;  %v1835_v58 = vmul.f32 %v1833_v23, %v1832_v20  ;;  %v5567_v50 = vadd.f32 %v1797_v19, %v5363_v31 }
 0x1ba   :  { %v1841_v38 = vmax.f32 %v1839_v37, 0.0  ;;  %v1842_v1 = vmax.f32 %v1840_v45, 0.0  ;;  %v1848_v49 = vstv %s5538_s25  ;;  %v1826_v13 = vadd.f32 %v1824_v44, %v1816_v63  ;;  %p2400_p8 = por %p2399_p7, %p2398_p6 }
 0x1bb   :  { %v1827_v0 = vadd.f32 %v1825_v12, %v1817_v54  ;;  %v1849_v59 = vadd.f32 %v1848_v49, %v5435_v2  ;;  %v1850_v3 = vadd.f32 %v1848_v49, %v5439_v46  ;;  %v1853_v62 = vstv %s5548_s18 }
 0x1bc   :  { %v1844_v28 = vmul.f32 %v1843_v26, %v1841_v38  ;;  %v1845_v10 = vmul.f32 %v1843_v26, %v1842_v1  ;;  %v1858_v31 = vstv %s5546_s17  ;;  %v1836_v19 = vadd.f32 %v1834_v16, %v1826_v13  ;;  %p2401_p9 = pnand %p2400_p8, %p2394_p5 }
 0x1bd   :  { %v1837_v17 = vadd.f32 %v1835_v58, %v1827_v0  ;;  %v1851_v14 = vmax.f32 %v1849_v59, 0.0  ;;  %v1852_v21 = vmax.f32 %v1850_v3, 0.0  ;;  %v1859_v53 = vadd.f32 %v1858_v31, %v5442_v15 }
 0x1be   :  { %v1860_v55 = vadd.f32 %v1858_v31, %v5445_v18  ;;  %v1863_v2 = vstv %s5556_s20  ;;  %v1868_v46 = vstv %s5554_s19  ;;  %v1846_v23 = vadd.f32 %v1844_v28, %v1836_v19 }
 0x1bf   :  { %v1847_v33 = vadd.f32 %v1845_v10, %v1837_v17  ;;  %v1854_v35 = vmul.f32 %v1853_v62, %v1851_v14  ;;  %v1855_v61 = vmul.f32 %v1853_v62, %v1852_v21  ;;  %v1861_v57 = vmax.f32 %v1859_v53, 0.0 }
 0x1c0   :  { %v1862_v29 = vmax.f32 %v1860_v55, 0.0  ;;  %v1869_v15 = vadd.f32 %v1868_v46, %v5448_v4  ;;  %v1870_v34 = vadd.f32 %v1868_v46, %v5467_v11  ;;  %v1873_v6 = vstv %s5564_s23 }
 0x1c1   :  { %v1856_v18 = vadd.f32 %v1854_v35, %v1846_v23  ;;  %v1857_v56 = vadd.f32 %v1855_v61, %v1847_v33  ;;  %v1878_v8 = vstv %s5562_s21  ;;  %v1864_v24 = vmul.f32 %v1863_v2, %v1861_v57 }
 0x1c2   :  { %v1865_v22 = vmul.f32 %v1863_v2, %v1862_v29  ;;  %v1871_v26 = vmax.f32 %v1869_v15, 0.0  ;;  %v1872_v39 = vmax.f32 %v1870_v34, 0.0  ;;  %v1879_v25 = vadd.f32 %v1878_v8, %v5470_v9 }
 0x1c3   :  { %v1880_v42 = vadd.f32 %v1878_v8, %v5473_v60  ;;  %v1883_v4 = vstv %s5572_s27  ;;  %v1888_v11 = vstv %s5570_s26  ;;  %v1866_v20 = vadd.f32 %v1864_v24, %v1856_v18 }
 0x1c4   :  { %v1867_v63 = vadd.f32 %v1865_v22, %v1857_v56  ;;  %v1874_v54 = vmul.f32 %v1873_v6, %v1871_v26  ;;  %v1875_v37 = vmul.f32 %v1873_v6, %v1872_v39  ;;  %v1881_v45 = vmax.f32 %v1879_v25, 0.0 }
 0x1c5   :  { %v1882_v44 = vmax.f32 %v1880_v42, 0.0  ;;  %v1889_v9 = vadd.f32 %v1888_v11, %v5476_v40  ;;  %v1890_v12 = vadd.f32 %v1888_v11, %v5483_v43  ;;  %v1893_v58 = vstv %s5580_s29 }
 0x1c6   :  { %v1876_v60 = vadd.f32 %v1874_v54, %v1866_v20  ;;  %v1877_v16 = vadd.f32 %v1875_v37, %v1867_v63  ;;  %v1898_v38 = vstv %s5578_s28  ;;  %v1884_v1 = vmul.f32 %v1883_v4, %v1881_v45 }
 0x1c7   :  { %v1885_v49 = vmul.f32 %v1883_v4, %v1882_v44  ;;  %v1891_v13 = vmax.f32 %v1889_v9, 0.0  ;;  %v1892_v0 = vmax.f32 %v1890_v12, 0.0  ;;  %v1899_v59 = vadd.f32 %v1898_v38, %v5486_v5 }
 0x1c8   :  { %v1900_v3 = vadd.f32 %v1898_v38, %v5489_v41  ;;  %v1903_v40 = vstv %s5588_s30  ;;  %v1908_v43 = vstv %s5586_s24  ;;  %v1886_v28 = vadd.f32 %v1884_v1, %v1876_v60 }
 0x1c9   :  { %v1887_v10 = vadd.f32 %v1885_v49, %v1877_v16  ;;  %v1894_v62 = vmul.f32 %v1893_v58, %v1891_v13  ;;  %v1895_v31 = vmul.f32 %v1893_v58, %v1892_v0  ;;  %v1901_v19 = vmax.f32 %v1899_v59, 0.0 }
 0x1ca   :  { %v1902_v17 = vmax.f32 %v1900_v3, 0.0  ;;  %v1909_v5 = vadd.f32 %v1908_v43, %v5492_v52  ;;  %v1910_v14 = vadd.f32 %v1908_v43, %v5499_v47  ;;  %v1913_v53 = vstv %s5596_s9 }
 0x1cb   :  { %v1896_v41 = vadd.f32 %v1894_v62, %v1886_v28  ;;  %v1897_v21 = vadd.f32 %v1895_v31, %v1887_v10  ;;  %v1918_v55 = vstv %s5594_s8  ;;  %v1904_v2 = vmul.f32 %v1903_v40, %v1901_v19 }
 0x1cc   :  { %v1905_v46 = vmul.f32 %v1903_v40, %v1902_v17  ;;  %v1911_v23 = vmax.f32 %v1909_v5, 0.0  ;;  %v1912_v33 = vmax.f32 %v1910_v14, 0.0  ;;  %v1919_v35 = vadd.f32 %v1918_v55, %v5509_v27 }
 0x1cd   :  { %v1920_v61 = vadd.f32 %v1918_v55, %v5512_v51  ;;  %v1923_v57 = vstv %s5604_s2  ;;  %v1928_v52 = vstv %s5602_s0  ;;  %v1906_v29 = vadd.f32 %v1904_v2, %v1896_v41 }
 0x1ce   :  { %v1907_v47 = vadd.f32 %v1905_v46, %v1897_v21  ;;  %v1914_v15 = vmul.f32 %v1913_v53, %v1911_v23  ;;  %v1915_v34 = vmul.f32 %v1913_v53, %v1912_v33  ;;  %v1921_v18 = vmax.f32 %v1919_v35, 0.0 }
 0x1cf   :  { %v1922_v56 = vmax.f32 %v1920_v61, 0.0  ;;  %v1929_v6 = vadd.f32 %v1928_v52, %v5515_v7  ;;  %v1930_v8 = vadd.f32 %v1928_v52, %v5519_v48  ;;  %v1933_v26 = vstv %s5612_s3 }
 0x1d0   :  { %v1916_v24 = vadd.f32 %v1914_v15, %v1906_v29  ;;  %v1917_v22 = vadd.f32 %v1915_v34, %v1907_v47  ;;  %v1938_v27 = vstv %s5610_s4  ;;  %v1924_v39 = vmul.f32 %v1923_v57, %v1921_v18 }
 0x1d1   :  { %v1925_v51 = vmul.f32 %v1923_v57, %v1922_v56  ;;  %v1931_v25 = vmax.f32 %v1929_v6, 0.0  ;;  %v1932_v42 = vmax.f32 %v1930_v8, 0.0  ;;  %v1939_v4 = vadd.f32 %v1938_v27, %v5529_v30 }
 0x1d2   :  { %v1940_v11 = vadd.f32 %v1938_v27, %v5532_v32  ;;  %v1943_v20 = vstv %s5620_s10  ;;  %v1948_v63 = vstv %s5618_s5  ;;  %v1926_v54 = vadd.f32 %v1924_v39, %v1916_v24 }
 0x1d3   :  { %v1927_v37 = vadd.f32 %v1925_v51, %v1917_v22  ;;  %v1934_v7 = vmul.f32 %v1933_v26, %v1931_v25  ;;  %v1935_v45 = vmul.f32 %v1933_v26, %v1932_v42  ;;  %v1941_v48 = vmax.f32 %v1939_v4, 0.0 }
 0x1d4   :  { %v1942_v44 = vmax.f32 %v1940_v11, 0.0  ;;  %v1949_v9 = vadd.f32 %v1948_v63, %v5535_v36  ;;  %v1950_v12 = vadd.f32 %v1948_v63, %v5567_v50  ;;  %v1953_v58 = vstv %s5626_s11 }
 0x1d5   :  { %v1936_v60 = vadd.f32 %v1934_v7, %v1926_v54  ;;  %v1937_v16 = vadd.f32 %v1935_v45, %v1927_v37  ;;  %v1944_v38 = vmul.f32 %v1943_v20, %v1941_v48  ;;  %v1958_v3 = vstv %s5667_s6 }
 0x1d6   :  { %v1945_v1 = vmul.f32 %v1943_v20, %v1942_v44  ;;  %v1951_v30 = vmax.f32 %v1949_v9, 0.0  ;;  %v1952_v49 = vmax.f32 %v1950_v12, 0.0 }
 0x1d7   :  { %v1946_v32 = vadd.f32 %v1944_v38, %v1936_v60 }
 0x1d8   :  { %v1947_v13 = vadd.f32 %v1945_v1, %v1937_v16  ;;  %v1954_v0 = vmul.f32 %v1953_v58, %v1951_v30  ;;  %v1955_v59 = vmul.f32 %v1953_v58, %v1952_v49 }
 0x1da   :  { %v1956_v36 = vadd.f32 %v1954_v0, %v1946_v32  ;;  %v1957_v40 = vadd.f32 %v1955_v59, %v1947_v13 }
 0x1dc   :  { %v1959_v50 = vadd.f32 %v1958_v3, %v1956_v36  ;;  %v1960_v43 = vadd.f32 %v1958_v3, %v1957_v40 }
 0x1de   :  { %1961 = vst [vmem:[#allocation14] sm:$0xff] %v1959_v50  ;;  %1962 = vst [vmem:[#allocation14 + $0x8] sm:$0xff] %v1960_v43 }
 0x1df   :  { %2404 = shalt.err (!%p2401_p9)
}
 0x1e0   :  { %s2405_s6 = scalar_lea.hbm %s5668_s7, 256 }
 0x1e1   :  { %p2406_p10 = scmp.ne.s32.totalorder %s5668_s7, %s2405_s6  ;;  %p2409_p11 = scmp.lt.u32.totalorder %s2405_s6, %s5668_s7 }
 0x1e3   :  { %p2411_p12 = pnand %p2409_p11, %p2406_p10 }
 0x1e5   :  { %2414 = shalt.err (!%p2411_p12)
}
 0x1e6   :  { %1974 = dma.vmem_to_hbm [thread:$0]  %s1969_s15, 256, %s5668_s7, [#allocation5], %s2428_s1, %s2428_s1, %s2429_s22  }
 0x1e7   :  { %2423 = dma.done.wait [#allocation5], 256  }
 0x1e8   :  { %2424 = vsyncadd [#allocation5], 4294967040 }
 0x1e9   :  { %1978 = vsyncpa [#allocation4], 1 }
 0x1ea   :  { %1979 = vsyncpa [#allocation5], 1 }
 0x1eb   :  { %1980 = vsyncpa [#allocation6], 1 }
 0x1ec   :  { %1981 = vsyncpa [#allocation9], 1 }
 0x1ed   :  { %1982 = vsyncpa [#allocation12], 1 }

</bundles_post_ra>
